<compile_context>
chip_gen: v7x
topology: tpu7x:2x2x1
jax: 0.10.0
libtpu: 0.0.40
codegen_flags: <defaults>
</compile_context>

<pallas_src>
import jax
import jax.numpy as jnp
from jax.experimental import pallas as pl
from jax.experimental.pallas import tpu as pltpu

LANE = 128


def _round_up(n, m):
    return (n + m - 1) // m * m


def _pad_gate_dim(w, H, Hp):
    """Zero-pad the leading 4H gate dimension of a PyTorch LSTM param to 4Hp.

    w: (4H,) or (4H, K) -> (4Hp,) or (4Hp, K); each of the four gate blocks
    [i, f, g, o] is padded from H to Hp independently.
    """
    tail = w.shape[1:]
    g = w.reshape((4, H) + tail)
    pad = ((0, 0), (0, Hp - H)) + ((0, 0),) * len(tail)
    return jnp.pad(g, pad).reshape((4 * Hp,) + tail)


def lstm_regression_kernel(x_ref, wih1_ref, whh1_ref, b1_ref,
                           w2_ref, b2_ref, wfc_ref, bfc_ref, out_ref):
    """Whole forward pass in one kernel.

    Shapes (padded to lane multiples in the wrapper):
      x_ref   : (S, Ip)       wih1_ref : (Ip, 4Hp)    whh1_ref : (Hp, 4Hp)
      b1_ref  : (1, 4Hp)      w2_ref   : (2Hp, 4Hp)   b2_ref   : (1, 4Hp)
      wfc_ref : (Hp, Op)      bfc_ref  : (1, Op)      out_ref  : (S, Op)
    Gate order along the 4Hp axis matches PyTorch: [i, f, g, o].
    """
    S = x_ref.shape[0]
    Hp = whh1_ref.shape[0]

    # Small biases hoisted once (a few vregs each).
    b1 = b1_ref[...]
    b2 = b2_ref[...]

    # Per-gate-block affine constants so all four activations are ONE tanh:
    #   act = pre * tanh(pre * g) + post   with
    #   pre  = [0.5, 0.5, 1.0, 0.5]  (i, f, g, o blocks)
    #   post = [0.5, 0.5, 0.0, 0.5]
    # giving sigmoid for i/f/o and plain tanh for the g gate.
    half = jnp.full((1, Hp), 0.5, jnp.float32)
    one = jnp.ones((1, Hp), jnp.float32)
    zero_blk = jnp.zeros((1, Hp), jnp.float32)
    pre = jnp.concatenate([half, half, one, half], axis=1)      # (1, 4Hp)
    post = jnp.concatenate([half, half, zero_blk, half], axis=1)  # (1, 4Hp)

    # Layer-1 input projection for all timesteps at once (bias folded in),
    # taken completely off the serial recurrence path.
    xw1 = jnp.dot(x_ref[...], wih1_ref[...],
                  preferred_element_type=jnp.float32) + b1        # (S, 4Hp)

    def gates_to_hc(g, c):
        # Fused activations: single EUP tanh over the whole (1, 4Hp) row.
        act = pre * jnp.tanh(pre * g) + post
        i_g = act[:, 0 * Hp:1 * Hp]
        f_g = act[:, 1 * Hp:2 * Hp]
        g_g = act[:, 2 * Hp:3 * Hp]
        o_g = act[:, 3 * Hp:4 * Hp]
        c_new = f_g * c + i_g * g_g
        h_new = o_g * jnp.tanh(c_new)
        return h_new, c_new

    zero = jnp.zeros((1, Hp), jnp.float32)
    h1, c1, h2, c2 = zero, zero, zero, zero
    h2_rows = []
    # S is small and static: fully unroll the recurrence.
    for t in range(S):
        # layer 1: only the h-recurrence matmul is serial
        g1 = xw1[t:t + 1, :] + jnp.dot(h1, whh1_ref[...],
                                       preferred_element_type=jnp.float32)
        h1, c1 = gates_to_hc(g1, c1)
        # layer 2: fused input + recurrent matmul
        g2 = jnp.dot(jnp.concatenate([h1, h2], axis=1), w2_ref[...],
                     preferred_element_type=jnp.float32) + b2
        h2, c2 = gates_to_hc(g2, c2)
        h2_rows.append(h2)

    h2_all = jnp.concatenate(h2_rows, axis=0)                      # (S, Hp)
    # fc head once; single lane-dense full-block store.
    out_ref[...] = (jnp.dot(h2_all, wfc_ref[...],
                            preferred_element_type=jnp.float32)
                    + bfc_ref[...])


def lstm_regression_forward(x, params):
    """x: (S, B=1, I) float32 -> (S, O) float32 (matches the PyTorch module)."""
    S, B, I = x.shape
    assert B == 1, "kernel mirrors the reference with B == days_for_train == 1"
    (wih1, whh1, bih1, bhh1,
     wih2, whh2, bih2, bhh2,
     wfc, bfc) = params
    H = whh1.shape[1]
    O = wfc.shape[0]

    Hp = _round_up(max(H, LANE), LANE)
    Ip = _round_up(max(I, LANE), LANE)
    Op = _round_up(max(O, LANE), LANE)

    # ---- layer 1 ----
    # (4H, I) -> gate-pad rows -> transpose -> (I, 4Hp) -> pad K rows to Ip
    wih1_k = jnp.pad(jnp.transpose(_pad_gate_dim(wih1, H, Hp)),
                     ((0, Ip - I), (0, 0)))
    # (4H, H) -> pad input cols to Hp -> gate-pad rows -> transpose -> (Hp, 4Hp)
    whh1_k = jnp.transpose(
        _pad_gate_dim(jnp.pad(whh1, ((0, 0), (0, Hp - H))), H, Hp))
    b1_k = _pad_gate_dim(bih1 + bhh1, H, Hp)[None, :]

    # ---- layer 2 (input + recurrent weights stacked for one fused matmul) ----
    wih2_k = jnp.transpose(
        _pad_gate_dim(jnp.pad(wih2, ((0, 0), (0, Hp - H))), H, Hp))
    whh2_k = jnp.transpose(
        _pad_gate_dim(jnp.pad(whh2, ((0, 0), (0, Hp - H))), H, Hp))
    w2_k = jnp.concatenate([wih2_k, whh2_k], axis=0)               # (2Hp, 4Hp)
    b2_k = _pad_gate_dim(bih2 + bhh2, H, Hp)[None, :]

    # ---- fc head ----
    wfc_k = jnp.pad(jnp.transpose(wfc), ((0, Hp - H), (0, Op - O)))  # (Hp, Op)
    bfc_k = jnp.pad(bfc, ((0, Op - O),))[None, :]                    # (1, Op)

    # ---- input ----
    x_k = jnp.pad(x.reshape(S, I), ((0, 0), (0, Ip - I)))            # (S, Ip)

    vmem = pl.BlockSpec(memory_space=pltpu.MemorySpace.VMEM)
    y_pad = pl.pallas_call(
        lstm_regression_kernel,
        out_shape=jax.ShapeDtypeStruct((S, Op), jnp.float32),
        in_specs=[vmem] * 8,
        out_specs=vmem,
    )(x_k, wih1_k, whh1_k, b1_k, w2_k, b2_k, wfc_k, bfc_k)
    # TODO(synk): for many independent sequences, add a leading grid axis with
    # dimension_semantics=("parallel",) to use both TensorCores on v7x.
    return y_pad[:, :O]


def lstm_regression_ref(x, params):
    """Pure-JAX reference mirroring torch nn.LSTM(num_layers=2) + nn.Linear."""
    (wih1, whh1, bih1, bhh1,
     wih2, whh2, bih2, bhh2,
     wfc, bfc) = params
    S, B, I = x.shape
    H = whh1.shape[1]

    def cell(x_t, h, c, wih, whh, bih, bhh):
        g = x_t @ wih.T + bih + h @ whh.T + bhh
        i = jax.nn.sigmoid(g[:, 0 * H:1 * H])
        f = jax.nn.sigmoid(g[:, 1 * H:2 * H])
        gg = jnp.tanh(g[:, 2 * H:3 * H])
        o = jax.nn.sigmoid(g[:, 3 * H:4 * H])
        c = f * c + i * gg
        h = o * jnp.tanh(c)
        return h, c

    h1 = c1 = h2 = c2 = jnp.zeros((B, H), jnp.float32)
    outs = []
    for t in range(S):
        h1, c1 = cell(x[t], h1, c1, wih1, whh1, bih1, bhh1)
        h2, c2 = cell(h1, h2, c2, wih2, whh2, bih2, bhh2)
        outs.append(h2)
    hs = jnp.stack(outs, axis=0)            # (S, B, H)
    flat = hs.reshape(S, B * H)             # x.view(s, b*h)
    return flat @ wfc.T + bfc


def init_params(key, input_size, hidden_size, output_size):
    """Deterministic init matching the shapes of nn.LSTM/nn.Linear params."""
    k = 1.0 / jnp.sqrt(hidden_size)
    keys = jax.random.split(key, 10)

    def u(kk, shape):
        return jax.random.uniform(kk, shape, jnp.float32, -k, k)

    wih1 = u(keys[0], (4 * hidden_size, input_size))
    whh1 = u(keys[1], (4 * hidden_size, hidden_size))
    bih1 = u(keys[2], (4 * hidden_size,))
    bhh1 = u(keys[3], (4 * hidden_size,))
    wih2 = u(keys[4], (4 * hidden_size, hidden_size))
    whh2 = u(keys[5], (4 * hidden_size, hidden_size))
    bih2 = u(keys[6], (4 * hidden_size,))
    bhh2 = u(keys[7], (4 * hidden_size,))
    wfc = u(keys[8], (output_size, hidden_size * 1))   # days_for_train = 1
    bfc = u(keys[9], (output_size,))
    return (wih1, whh1, bih1, bhh1, wih2, whh2, bih2, bhh2, wfc, bfc)


if __name__ == "__main__":
    SEQ, BATCH, INPUT, HIDDEN, OUTPUT = 8, 1, 4, 32, 1   # batch == days_for_train == 1

    key = jax.random.PRNGKey(0)
    kx, kp = jax.random.split(key)
    x = jax.random.normal(kx, (SEQ, BATCH, INPUT), jnp.float32)
    params = init_params(kp, INPUT, HIDDEN, OUTPUT)

    fwd = jax.jit(lstm_regression_forward)
    y = fwd(x, params)
    jax.block_until_ready(y)

    y_ref = lstm_regression_ref(x, params)
    assert y.shape == (SEQ, OUTPUT), y.shape
    assert jnp.allclose(y, y_ref, rtol=1e-3, atol=1e-3), (
        f"max abs diff {jnp.max(jnp.abs(y - y_ref))}")

    print("KERNEL_OK")
</pallas_src>

<mosaic_0001>
module attributes {stable_mosaic.version = 11 : i64} {
  func.func @lstm_regression_kernel(%arg0: memref<8x128xf32, #tpu.memory_space<vmem>>, %arg1: memref<128x512xf32, #tpu.memory_space<vmem>>, %arg2: memref<128x512xf32, #tpu.memory_space<vmem>>, %arg3: memref<1x512xf32, #tpu.memory_space<vmem>>, %arg4: memref<256x512xf32, #tpu.memory_space<vmem>>, %arg5: memref<1x512xf32, #tpu.memory_space<vmem>>, %arg6: memref<128x128xf32, #tpu.memory_space<vmem>>, %arg7: memref<1x128xf32, #tpu.memory_space<vmem>>, %arg8: memref<8x128xf32, #tpu.memory_space<vmem>>) attributes {dimension_semantics = [], scalar_prefetch = 0 : i64, scratch_operands = 0 : i64, tpu.core_type = #tpu.core_type<tc>} {
    %c0 = arith.constant 0 : index
    %c0_0 = arith.constant 0 : index
    %0 = vector.load %arg3[%c0, %c0_0] : memref<1x512xf32, #tpu.memory_space<vmem>>, vector<1x512xf32>
    %c0_1 = arith.constant 0 : index
    %c0_2 = arith.constant 0 : index
    %1 = vector.load %arg5[%c0_1, %c0_2] : memref<1x512xf32, #tpu.memory_space<vmem>>, vector<1x512xf32>
    %cst = arith.constant 5.000000e-01 : f32
    %2 = vector.broadcast %cst : f32 to vector<1x128xf32>
    %cst_3 = arith.constant 1.000000e+00 : f32
    %3 = vector.broadcast %cst_3 : f32 to vector<1x128xf32>
    %cst_4 = arith.constant 0.000000e+00 : f32
    %4 = vector.broadcast %cst_4 : f32 to vector<1x128xf32>
    %5 = tpu.concatenate %2, %2, %3, %2 in 1 : vector<1x128xf32>, vector<1x128xf32>, vector<1x128xf32>, vector<1x128xf32> -> vector<1x512xf32>
    %6 = tpu.concatenate %2, %2, %4, %2 in 1 : vector<1x128xf32>, vector<1x128xf32>, vector<1x128xf32>, vector<1x128xf32> -> vector<1x512xf32>
    %c0_5 = arith.constant 0 : index
    %c0_6 = arith.constant 0 : index
    %7 = vector.load %arg0[%c0_5, %c0_6] : memref<8x128xf32, #tpu.memory_space<vmem>>, vector<8x128xf32>
    %c0_7 = arith.constant 0 : index
    %c0_8 = arith.constant 0 : index
    %8 = vector.load %arg1[%c0_7, %c0_8] : memref<128x512xf32, #tpu.memory_space<vmem>>, vector<128x512xf32>
    %cst_9 = arith.constant dense<0.000000e+00> : vector<8x512xf32>
    %9 = tpu.matmul %7, %8, %cst_9 {dimension_numbers = #tpu.dot_dimension_numbers<[1], [0], [0], [1], [0, 0, 1, 1], [], []>} : vector<8x128xf32>, vector<128x512xf32>, vector<8x512xf32> -> vector<8x512xf32>
    %10 = vector.broadcast %0 : vector<1x512xf32> to vector<8x512xf32>
    %11 = arith.addf %9, %10 : vector<8x512xf32>
    %cst_10 = arith.constant 0.000000e+00 : f32
    %12 = vector.broadcast %cst_10 : f32 to vector<1x128xf32>
    %13 = vector.extract_strided_slice %11 {offsets = [0, 0], sizes = [1, 512], strides = [1, 1]} : vector<8x512xf32> to vector<1x512xf32>
    %c0_11 = arith.constant 0 : index
    %c0_12 = arith.constant 0 : index
    %14 = vector.load %arg2[%c0_11, %c0_12] : memref<128x512xf32, #tpu.memory_space<vmem>>, vector<128x512xf32>
    %cst_13 = arith.constant dense<0.000000e+00> : vector<1x512xf32>
    %15 = tpu.matmul %12, %14, %cst_13 {dimension_numbers = #tpu.dot_dimension_numbers<[1], [0], [0], [1], [0, 0, 1, 1], [], []>} : vector<1x128xf32>, vector<128x512xf32>, vector<1x512xf32> -> vector<1x512xf32>
    %16 = arith.addf %13, %15 : vector<1x512xf32>
    %17 = arith.mulf %5, %16 : vector<1x512xf32>
    %18 = math.tanh %17 : vector<1x512xf32>
    %19 = arith.mulf %5, %18 : vector<1x512xf32>
    %20 = arith.addf %19, %6 : vector<1x512xf32>
    %21 = vector.extract_strided_slice %20 {offsets = [0, 0], sizes = [1, 128], strides = [1, 1]} : vector<1x512xf32> to vector<1x128xf32>
    %22 = vector.extract_strided_slice %20 {offsets = [0, 128], sizes = [1, 128], strides = [1, 1]} : vector<1x512xf32> to vector<1x128xf32>
    %23 = vector.extract_strided_slice %20 {offsets = [0, 256], sizes = [1, 128], strides = [1, 1]} : vector<1x512xf32> to vector<1x128xf32>
    %24 = vector.extract_strided_slice %20 {offsets = [0, 384], sizes = [1, 128], strides = [1, 1]} : vector<1x512xf32> to vector<1x128xf32>
    %25 = arith.mulf %22, %12 : vector<1x128xf32>
    %26 = arith.mulf %21, %23 : vector<1x128xf32>
    %27 = arith.addf %25, %26 : vector<1x128xf32>
    %28 = math.tanh %27 : vector<1x128xf32>
    %29 = arith.mulf %24, %28 : vector<1x128xf32>
    %30 = tpu.concatenate %29, %12 in 1 : vector<1x128xf32>, vector<1x128xf32> -> vector<1x256xf32>
    %c0_14 = arith.constant 0 : index
    %c0_15 = arith.constant 0 : index
    %31 = vector.load %arg4[%c0_14, %c0_15] : memref<256x512xf32, #tpu.memory_space<vmem>>, vector<256x512xf32>
    %cst_16 = arith.constant dense<0.000000e+00> : vector<1x512xf32>
    %32 = tpu.matmul %30, %31, %cst_16 {dimension_numbers = #tpu.dot_dimension_numbers<[1], [0], [0], [1], [0, 0, 1, 1], [], []>} : vector<1x256xf32>, vector<256x512xf32>, vector<1x512xf32> -> vector<1x512xf32>
    %33 = arith.addf %32, %1 : vector<1x512xf32>
    %34 = arith.mulf %5, %33 : vector<1x512xf32>
    %35 = math.tanh %34 : vector<1x512xf32>
    %36 = arith.mulf %5, %35 : vector<1x512xf32>
    %37 = arith.addf %36, %6 : vector<1x512xf32>
    %38 = vector.extract_strided_slice %37 {offsets = [0, 0], sizes = [1, 128], strides = [1, 1]} : vector<1x512xf32> to vector<1x128xf32>
    %39 = vector.extract_strided_slice %37 {offsets = [0, 128], sizes = [1, 128], strides = [1, 1]} : vector<1x512xf32> to vector<1x128xf32>
    %40 = vector.extract_strided_slice %37 {offsets = [0, 256], sizes = [1, 128], strides = [1, 1]} : vector<1x512xf32> to vector<1x128xf32>
    %41 = vector.extract_strided_slice %37 {offsets = [0, 384], sizes = [1, 128], strides = [1, 1]} : vector<1x512xf32> to vector<1x128xf32>
    %42 = arith.mulf %39, %12 : vector<1x128xf32>
    %43 = arith.mulf %38, %40 : vector<1x128xf32>
    %44 = arith.addf %42, %43 : vector<1x128xf32>
    %45 = math.tanh %44 : vector<1x128xf32>
    %46 = arith.mulf %41, %45 : vector<1x128xf32>
    %47 = vector.extract_strided_slice %11 {offsets = [1, 0], sizes = [1, 512], strides = [1, 1]} : vector<8x512xf32> to vector<1x512xf32>
    %c0_17 = arith.constant 0 : index
    %c0_18 = arith.constant 0 : index
    %48 = vector.load %arg2[%c0_17, %c0_18] : memref<128x512xf32, #tpu.memory_space<vmem>>, vector<128x512xf32>
    %cst_19 = arith.constant dense<0.000000e+00> : vector<1x512xf32>
    %49 = tpu.matmul %29, %48, %cst_19 {dimension_numbers = #tpu.dot_dimension_numbers<[1], [0], [0], [1], [0, 0, 1, 1], [], []>} : vector<1x128xf32>, vector<128x512xf32>, vector<1x512xf32> -> vector<1x512xf32>
    %50 = arith.addf %47, %49 : vector<1x512xf32>
    %51 = arith.mulf %5, %50 : vector<1x512xf32>
    %52 = math.tanh %51 : vector<1x512xf32>
    %53 = arith.mulf %5, %52 : vector<1x512xf32>
    %54 = arith.addf %53, %6 : vector<1x512xf32>
    %55 = vector.extract_strided_slice %54 {offsets = [0, 0], sizes = [1, 128], strides = [1, 1]} : vector<1x512xf32> to vector<1x128xf32>
    %56 = vector.extract_strided_slice %54 {offsets = [0, 128], sizes = [1, 128], strides = [1, 1]} : vector<1x512xf32> to vector<1x128xf32>
    %57 = vector.extract_strided_slice %54 {offsets = [0, 256], sizes = [1, 128], strides = [1, 1]} : vector<1x512xf32> to vector<1x128xf32>
    %58 = vector.extract_strided_slice %54 {offsets = [0, 384], sizes = [1, 128], strides = [1, 1]} : vector<1x512xf32> to vector<1x128xf32>
    %59 = arith.mulf %56, %27 : vector<1x128xf32>
    %60 = arith.mulf %55, %57 : vector<1x128xf32>
    %61 = arith.addf %59, %60 : vector<1x128xf32>
    %62 = math.tanh %61 : vector<1x128xf32>
    %63 = arith.mulf %58, %62 : vector<1x128xf32>
    %64 = tpu.concatenate %63, %46 in 1 : vector<1x128xf32>, vector<1x128xf32> -> vector<1x256xf32>
    %c0_20 = arith.constant 0 : index
    %c0_21 = arith.constant 0 : index
    %65 = vector.load %arg4[%c0_20, %c0_21] : memref<256x512xf32, #tpu.memory_space<vmem>>, vector<256x512xf32>
    %cst_22 = arith.constant dense<0.000000e+00> : vector<1x512xf32>
    %66 = tpu.matmul %64, %65, %cst_22 {dimension_numbers = #tpu.dot_dimension_numbers<[1], [0], [0], [1], [0, 0, 1, 1], [], []>} : vector<1x256xf32>, vector<256x512xf32>, vector<1x512xf32> -> vector<1x512xf32>
    %67 = arith.addf %66, %1 : vector<1x512xf32>
    %68 = arith.mulf %5, %67 : vector<1x512xf32>
    %69 = math.tanh %68 : vector<1x512xf32>
    %70 = arith.mulf %5, %69 : vector<1x512xf32>
    %71 = arith.addf %70, %6 : vector<1x512xf32>
    %72 = vector.extract_strided_slice %71 {offsets = [0, 0], sizes = [1, 128], strides = [1, 1]} : vector<1x512xf32> to vector<1x128xf32>
    %73 = vector.extract_strided_slice %71 {offsets = [0, 128], sizes = [1, 128], strides = [1, 1]} : vector<1x512xf32> to vector<1x128xf32>
    %74 = vector.extract_strided_slice %71 {offsets = [0, 256], sizes = [1, 128], strides = [1, 1]} : vector<1x512xf32> to vector<1x128xf32>
    %75 = vector.extract_strided_slice %71 {offsets = [0, 384], sizes = [1, 128], strides = [1, 1]} : vector<1x512xf32> to vector<1x128xf32>
    %76 = arith.mulf %73, %44 : vector<1x128xf32>
    %77 = arith.mulf %72, %74 : vector<1x128xf32>
    %78 = arith.addf %76, %77 : vector<1x128xf32>
    %79 = math.tanh %78 : vector<1x128xf32>
    %80 = arith.mulf %75, %79 : vector<1x128xf32>
    %81 = vector.extract_strided_slice %11 {offsets = [2, 0], sizes = [1, 512], strides = [1, 1]} : vector<8x512xf32> to vector<1x512xf32>
    %c0_23 = arith.constant 0 : index
    %c0_24 = arith.constant 0 : index
    %82 = vector.load %arg2[%c0_23, %c0_24] : memref<128x512xf32, #tpu.memory_space<vmem>>, vector<128x512xf32>
    %cst_25 = arith.constant dense<0.000000e+00> : vector<1x512xf32>
    %83 = tpu.matmul %63, %82, %cst_25 {dimension_numbers = #tpu.dot_dimension_numbers<[1], [0], [0], [1], [0, 0, 1, 1], [], []>} : vector<1x128xf32>, vector<128x512xf32>, vector<1x512xf32> -> vector<1x512xf32>
    %84 = arith.addf %81, %83 : vector<1x512xf32>
    %85 = arith.mulf %5, %84 : vector<1x512xf32>
    %86 = math.tanh %85 : vector<1x512xf32>
    %87 = arith.mulf %5, %86 : vector<1x512xf32>
    %88 = arith.addf %87, %6 : vector<1x512xf32>
    %89 = vector.extract_strided_slice %88 {offsets = [0, 0], sizes = [1, 128], strides = [1, 1]} : vector<1x512xf32> to vector<1x128xf32>
    %90 = vector.extract_strided_slice %88 {offsets = [0, 128], sizes = [1, 128], strides = [1, 1]} : vector<1x512xf32> to vector<1x128xf32>
    %91 = vector.extract_strided_slice %88 {offsets = [0, 256], sizes = [1, 128], strides = [1, 1]} : vector<1x512xf32> to vector<1x128xf32>
    %92 = vector.extract_strided_slice %88 {offsets = [0, 384], sizes = [1, 128], strides = [1, 1]} : vector<1x512xf32> to vector<1x128xf32>
    %93 = arith.mulf %90, %61 : vector<1x128xf32>
    %94 = arith.mulf %89, %91 : vector<1x128xf32>
    %95 = arith.addf %93, %94 : vector<1x128xf32>
    %96 = math.tanh %95 : vector<1x128xf32>
    %97 = arith.mulf %92, %96 : vector<1x128xf32>
    %98 = tpu.concatenate %97, %80 in 1 : vector<1x128xf32>, vector<1x128xf32> -> vector<1x256xf32>
    %c0_26 = arith.constant 0 : index
    %c0_27 = arith.constant 0 : index
    %99 = vector.load %arg4[%c0_26, %c0_27] : memref<256x512xf32, #tpu.memory_space<vmem>>, vector<256x512xf32>
    %cst_28 = arith.constant dense<0.000000e+00> : vector<1x512xf32>
    %100 = tpu.matmul %98, %99, %cst_28 {dimension_numbers = #tpu.dot_dimension_numbers<[1], [0], [0], [1], [0, 0, 1, 1], [], []>} : vector<1x256xf32>, vector<256x512xf32>, vector<1x512xf32> -> vector<1x512xf32>
    %101 = arith.addf %100, %1 : vector<1x512xf32>
    %102 = arith.mulf %5, %101 : vector<1x512xf32>
    %103 = math.tanh %102 : vector<1x512xf32>
    %104 = arith.mulf %5, %103 : vector<1x512xf32>
    %105 = arith.addf %104, %6 : vector<1x512xf32>
    %106 = vector.extract_strided_slice %105 {offsets = [0, 0], sizes = [1, 128], strides = [1, 1]} : vector<1x512xf32> to vector<1x128xf32>
    %107 = vector.extract_strided_slice %105 {offsets = [0, 128], sizes = [1, 128], strides = [1, 1]} : vector<1x512xf32> to vector<1x128xf32>
    %108 = vector.extract_strided_slice %105 {offsets = [0, 256], sizes = [1, 128], strides = [1, 1]} : vector<1x512xf32> to vector<1x128xf32>
    %109 = vector.extract_strided_slice %105 {offsets = [0, 384], sizes = [1, 128], strides = [1, 1]} : vector<1x512xf32> to vector<1x128xf32>
    %110 = arith.mulf %107, %78 : vector<1x128xf32>
    %111 = arith.mulf %106, %108 : vector<1x128xf32>
    %112 = arith.addf %110, %111 : vector<1x128xf32>
    %113 = math.tanh %112 : vector<1x128xf32>
    %114 = arith.mulf %109, %113 : vector<1x128xf32>
    %115 = vector.extract_strided_slice %11 {offsets = [3, 0], sizes = [1, 512], strides = [1, 1]} : vector<8x512xf32> to vector<1x512xf32>
    %c0_29 = arith.constant 0 : index
    %c0_30 = arith.constant 0 : index
    %116 = vector.load %arg2[%c0_29, %c0_30] : memref<128x512xf32, #tpu.memory_space<vmem>>, vector<128x512xf32>
    %cst_31 = arith.constant dense<0.000000e+00> : vector<1x512xf32>
    %117 = tpu.matmul %97, %116, %cst_31 {dimension_numbers = #tpu.dot_dimension_numbers<[1], [0], [0], [1], [0, 0, 1, 1], [], []>} : vector<1x128xf32>, vector<128x512xf32>, vector<1x512xf32> -> vector<1x512xf32>
    %118 = arith.addf %115, %117 : vector<1x512xf32>
    %119 = arith.mulf %5, %118 : vector<1x512xf32>
    %120 = math.tanh %119 : vector<1x512xf32>
    %121 = arith.mulf %5, %120 : vector<1x512xf32>
    %122 = arith.addf %121, %6 : vector<1x512xf32>
    %123 = vector.extract_strided_slice %122 {offsets = [0, 0], sizes = [1, 128], strides = [1, 1]} : vector<1x512xf32> to vector<1x128xf32>
    %124 = vector.extract_strided_slice %122 {offsets = [0, 128], sizes = [1, 128], strides = [1, 1]} : vector<1x512xf32> to vector<1x128xf32>
    %125 = vector.extract_strided_slice %122 {offsets = [0, 256], sizes = [1, 128], strides = [1, 1]} : vector<1x512xf32> to vector<1x128xf32>
    %126 = vector.extract_strided_slice %122 {offsets = [0, 384], sizes = [1, 128], strides = [1, 1]} : vector<1x512xf32> to vector<1x128xf32>
    %127 = arith.mulf %124, %95 : vector<1x128xf32>
    %128 = arith.mulf %123, %125 : vector<1x128xf32>
    %129 = arith.addf %127, %128 : vector<1x128xf32>
    %130 = math.tanh %129 : vector<1x128xf32>
    %131 = arith.mulf %126, %130 : vector<1x128xf32>
    %132 = tpu.concatenate %131, %114 in 1 : vector<1x128xf32>, vector<1x128xf32> -> vector<1x256xf32>
    %c0_32 = arith.constant 0 : index
    %c0_33 = arith.constant 0 : index
    %133 = vector.load %arg4[%c0_32, %c0_33] : memref<256x512xf32, #tpu.memory_space<vmem>>, vector<256x512xf32>
    %cst_34 = arith.constant dense<0.000000e+00> : vector<1x512xf32>
    %134 = tpu.matmul %132, %133, %cst_34 {dimension_numbers = #tpu.dot_dimension_numbers<[1], [0], [0], [1], [0, 0, 1, 1], [], []>} : vector<1x256xf32>, vector<256x512xf32>, vector<1x512xf32> -> vector<1x512xf32>
    %135 = arith.addf %134, %1 : vector<1x512xf32>
    %136 = arith.mulf %5, %135 : vector<1x512xf32>
    %137 = math.tanh %136 : vector<1x512xf32>
    %138 = arith.mulf %5, %137 : vector<1x512xf32>
    %139 = arith.addf %138, %6 : vector<1x512xf32>
    %140 = vector.extract_strided_slice %139 {offsets = [0, 0], sizes = [1, 128], strides = [1, 1]} : vector<1x512xf32> to vector<1x128xf32>
    %141 = vector.extract_strided_slice %139 {offsets = [0, 128], sizes = [1, 128], strides = [1, 1]} : vector<1x512xf32> to vector<1x128xf32>
    %142 = vector.extract_strided_slice %139 {offsets = [0, 256], sizes = [1, 128], strides = [1, 1]} : vector<1x512xf32> to vector<1x128xf32>
    %143 = vector.extract_strided_slice %139 {offsets = [0, 384], sizes = [1, 128], strides = [1, 1]} : vector<1x512xf32> to vector<1x128xf32>
    %144 = arith.mulf %141, %112 : vector<1x128xf32>
    %145 = arith.mulf %140, %142 : vector<1x128xf32>
    %146 = arith.addf %144, %145 : vector<1x128xf32>
    %147 = math.tanh %146 : vector<1x128xf32>
    %148 = arith.mulf %143, %147 : vector<1x128xf32>
    %149 = vector.extract_strided_slice %11 {offsets = [4, 0], sizes = [1, 512], strides = [1, 1]} : vector<8x512xf32> to vector<1x512xf32>
    %c0_35 = arith.constant 0 : index
    %c0_36 = arith.constant 0 : index
    %150 = vector.load %arg2[%c0_35, %c0_36] : memref<128x512xf32, #tpu.memory_space<vmem>>, vector<128x512xf32>
    %cst_37 = arith.constant dense<0.000000e+00> : vector<1x512xf32>
    %151 = tpu.matmul %131, %150, %cst_37 {dimension_numbers = #tpu.dot_dimension_numbers<[1], [0], [0], [1], [0, 0, 1, 1], [], []>} : vector<1x128xf32>, vector<128x512xf32>, vector<1x512xf32> -> vector<1x512xf32>
    %152 = arith.addf %149, %151 : vector<1x512xf32>
    %153 = arith.mulf %5, %152 : vector<1x512xf32>
    %154 = math.tanh %153 : vector<1x512xf32>
    %155 = arith.mulf %5, %154 : vector<1x512xf32>
    %156 = arith.addf %155, %6 : vector<1x512xf32>
    %157 = vector.extract_strided_slice %156 {offsets = [0, 0], sizes = [1, 128], strides = [1, 1]} : vector<1x512xf32> to vector<1x128xf32>
    %158 = vector.extract_strided_slice %156 {offsets = [0, 128], sizes = [1, 128], strides = [1, 1]} : vector<1x512xf32> to vector<1x128xf32>
    %159 = vector.extract_strided_slice %156 {offsets = [0, 256], sizes = [1, 128], strides = [1, 1]} : vector<1x512xf32> to vector<1x128xf32>
    %160 = vector.extract_strided_slice %156 {offsets = [0, 384], sizes = [1, 128], strides = [1, 1]} : vector<1x512xf32> to vector<1x128xf32>
    %161 = arith.mulf %158, %129 : vector<1x128xf32>
    %162 = arith.mulf %157, %159 : vector<1x128xf32>
    %163 = arith.addf %161, %162 : vector<1x128xf32>
    %164 = math.tanh %163 : vector<1x128xf32>
    %165 = arith.mulf %160, %164 : vector<1x128xf32>
    %166 = tpu.concatenate %165, %148 in 1 : vector<1x128xf32>, vector<1x128xf32> -> vector<1x256xf32>
    %c0_38 = arith.constant 0 : index
    %c0_39 = arith.constant 0 : index
    %167 = vector.load %arg4[%c0_38, %c0_39] : memref<256x512xf32, #tpu.memory_space<vmem>>, vector<256x512xf32>
    %cst_40 = arith.constant dense<0.000000e+00> : vector<1x512xf32>
    %168 = tpu.matmul %166, %167, %cst_40 {dimension_numbers = #tpu.dot_dimension_numbers<[1], [0], [0], [1], [0, 0, 1, 1], [], []>} : vector<1x256xf32>, vector<256x512xf32>, vector<1x512xf32> -> vector<1x512xf32>
    %169 = arith.addf %168, %1 : vector<1x512xf32>
    %170 = arith.mulf %5, %169 : vector<1x512xf32>
    %171 = math.tanh %170 : vector<1x512xf32>
    %172 = arith.mulf %5, %171 : vector<1x512xf32>
    %173 = arith.addf %172, %6 : vector<1x512xf32>
    %174 = vector.extract_strided_slice %173 {offsets = [0, 0], sizes = [1, 128], strides = [1, 1]} : vector<1x512xf32> to vector<1x128xf32>
    %175 = vector.extract_strided_slice %173 {offsets = [0, 128], sizes = [1, 128], strides = [1, 1]} : vector<1x512xf32> to vector<1x128xf32>
    %176 = vector.extract_strided_slice %173 {offsets = [0, 256], sizes = [1, 128], strides = [1, 1]} : vector<1x512xf32> to vector<1x128xf32>
    %177 = vector.extract_strided_slice %173 {offsets = [0, 384], sizes = [1, 128], strides = [1, 1]} : vector<1x512xf32> to vector<1x128xf32>
    %178 = arith.mulf %175, %146 : vector<1x128xf32>
    %179 = arith.mulf %174, %176 : vector<1x128xf32>
    %180 = arith.addf %178, %179 : vector<1x128xf32>
    %181 = math.tanh %180 : vector<1x128xf32>
    %182 = arith.mulf %177, %181 : vector<1x128xf32>
    %183 = vector.extract_strided_slice %11 {offsets = [5, 0], sizes = [1, 512], strides = [1, 1]} : vector<8x512xf32> to vector<1x512xf32>
    %c0_41 = arith.constant 0 : index
    %c0_42 = arith.constant 0 : index
    %184 = vector.load %arg2[%c0_41, %c0_42] : memref<128x512xf32, #tpu.memory_space<vmem>>, vector<128x512xf32>
    %cst_43 = arith.constant dense<0.000000e+00> : vector<1x512xf32>
    %185 = tpu.matmul %165, %184, %cst_43 {dimension_numbers = #tpu.dot_dimension_numbers<[1], [0], [0], [1], [0, 0, 1, 1], [], []>} : vector<1x128xf32>, vector<128x512xf32>, vector<1x512xf32> -> vector<1x512xf32>
    %186 = arith.addf %183, %185 : vector<1x512xf32>
    %187 = arith.mulf %5, %186 : vector<1x512xf32>
    %188 = math.tanh %187 : vector<1x512xf32>
    %189 = arith.mulf %5, %188 : vector<1x512xf32>
    %190 = arith.addf %189, %6 : vector<1x512xf32>
    %191 = vector.extract_strided_slice %190 {offsets = [0, 0], sizes = [1, 128], strides = [1, 1]} : vector<1x512xf32> to vector<1x128xf32>
    %192 = vector.extract_strided_slice %190 {offsets = [0, 128], sizes = [1, 128], strides = [1, 1]} : vector<1x512xf32> to vector<1x128xf32>
    %193 = vector.extract_strided_slice %190 {offsets = [0, 256], sizes = [1, 128], strides = [1, 1]} : vector<1x512xf32> to vector<1x128xf32>
    %194 = vector.extract_strided_slice %190 {offsets = [0, 384], sizes = [1, 128], strides = [1, 1]} : vector<1x512xf32> to vector<1x128xf32>
    %195 = arith.mulf %192, %163 : vector<1x128xf32>
    %196 = arith.mulf %191, %193 : vector<1x128xf32>
    %197 = arith.addf %195, %196 : vector<1x128xf32>
    %198 = math.tanh %197 : vector<1x128xf32>
    %199 = arith.mulf %194, %198 : vector<1x128xf32>
    %200 = tpu.concatenate %199, %182 in 1 : vector<1x128xf32>, vector<1x128xf32> -> vector<1x256xf32>
    %c0_44 = arith.constant 0 : index
    %c0_45 = arith.constant 0 : index
    %201 = vector.load %arg4[%c0_44, %c0_45] : memref<256x512xf32, #tpu.memory_space<vmem>>, vector<256x512xf32>
    %cst_46 = arith.constant dense<0.000000e+00> : vector<1x512xf32>
    %202 = tpu.matmul %200, %201, %cst_46 {dimension_numbers = #tpu.dot_dimension_numbers<[1], [0], [0], [1], [0, 0, 1, 1], [], []>} : vector<1x256xf32>, vector<256x512xf32>, vector<1x512xf32> -> vector<1x512xf32>
    %203 = arith.addf %202, %1 : vector<1x512xf32>
    %204 = arith.mulf %5, %203 : vector<1x512xf32>
    %205 = math.tanh %204 : vector<1x512xf32>
    %206 = arith.mulf %5, %205 : vector<1x512xf32>
    %207 = arith.addf %206, %6 : vector<1x512xf32>
    %208 = vector.extract_strided_slice %207 {offsets = [0, 0], sizes = [1, 128], strides = [1, 1]} : vector<1x512xf32> to vector<1x128xf32>
    %209 = vector.extract_strided_slice %207 {offsets = [0, 128], sizes = [1, 128], strides = [1, 1]} : vector<1x512xf32> to vector<1x128xf32>
    %210 = vector.extract_strided_slice %207 {offsets = [0, 256], sizes = [1, 128], strides = [1, 1]} : vector<1x512xf32> to vector<1x128xf32>
    %211 = vector.extract_strided_slice %207 {offsets = [0, 384], sizes = [1, 128], strides = [1, 1]} : vector<1x512xf32> to vector<1x128xf32>
    %212 = arith.mulf %209, %180 : vector<1x128xf32>
    %213 = arith.mulf %208, %210 : vector<1x128xf32>
    %214 = arith.addf %212, %213 : vector<1x128xf32>
    %215 = math.tanh %214 : vector<1x128xf32>
    %216 = arith.mulf %211, %215 : vector<1x128xf32>
    %217 = vector.extract_strided_slice %11 {offsets = [6, 0], sizes = [1, 512], strides = [1, 1]} : vector<8x512xf32> to vector<1x512xf32>
    %c0_47 = arith.constant 0 : index
    %c0_48 = arith.constant 0 : index
    %218 = vector.load %arg2[%c0_47, %c0_48] : memref<128x512xf32, #tpu.memory_space<vmem>>, vector<128x512xf32>
    %cst_49 = arith.constant dense<0.000000e+00> : vector<1x512xf32>
    %219 = tpu.matmul %199, %218, %cst_49 {dimension_numbers = #tpu.dot_dimension_numbers<[1], [0], [0], [1], [0, 0, 1, 1], [], []>} : vector<1x128xf32>, vector<128x512xf32>, vector<1x512xf32> -> vector<1x512xf32>
    %220 = arith.addf %217, %219 : vector<1x512xf32>
    %221 = arith.mulf %5, %220 : vector<1x512xf32>
    %222 = math.tanh %221 : vector<1x512xf32>
    %223 = arith.mulf %5, %222 : vector<1x512xf32>
    %224 = arith.addf %223, %6 : vector<1x512xf32>
    %225 = vector.extract_strided_slice %224 {offsets = [0, 0], sizes = [1, 128], strides = [1, 1]} : vector<1x512xf32> to vector<1x128xf32>
    %226 = vector.extract_strided_slice %224 {offsets = [0, 128], sizes = [1, 128], strides = [1, 1]} : vector<1x512xf32> to vector<1x128xf32>
    %227 = vector.extract_strided_slice %224 {offsets = [0, 256], sizes = [1, 128], strides = [1, 1]} : vector<1x512xf32> to vector<1x128xf32>
    %228 = vector.extract_strided_slice %224 {offsets = [0, 384], sizes = [1, 128], strides = [1, 1]} : vector<1x512xf32> to vector<1x128xf32>
    %229 = arith.mulf %226, %197 : vector<1x128xf32>
    %230 = arith.mulf %225, %227 : vector<1x128xf32>
    %231 = arith.addf %229, %230 : vector<1x128xf32>
    %232 = math.tanh %231 : vector<1x128xf32>
    %233 = arith.mulf %228, %232 : vector<1x128xf32>
    %234 = tpu.concatenate %233, %216 in 1 : vector<1x128xf32>, vector<1x128xf32> -> vector<1x256xf32>
    %c0_50 = arith.constant 0 : index
    %c0_51 = arith.constant 0 : index
    %235 = vector.load %arg4[%c0_50, %c0_51] : memref<256x512xf32, #tpu.memory_space<vmem>>, vector<256x512xf32>
    %cst_52 = arith.constant dense<0.000000e+00> : vector<1x512xf32>
    %236 = tpu.matmul %234, %235, %cst_52 {dimension_numbers = #tpu.dot_dimension_numbers<[1], [0], [0], [1], [0, 0, 1, 1], [], []>} : vector<1x256xf32>, vector<256x512xf32>, vector<1x512xf32> -> vector<1x512xf32>
    %237 = arith.addf %236, %1 : vector<1x512xf32>
    %238 = arith.mulf %5, %237 : vector<1x512xf32>
    %239 = math.tanh %238 : vector<1x512xf32>
    %240 = arith.mulf %5, %239 : vector<1x512xf32>
    %241 = arith.addf %240, %6 : vector<1x512xf32>
    %242 = vector.extract_strided_slice %241 {offsets = [0, 0], sizes = [1, 128], strides = [1, 1]} : vector<1x512xf32> to vector<1x128xf32>
    %243 = vector.extract_strided_slice %241 {offsets = [0, 128], sizes = [1, 128], strides = [1, 1]} : vector<1x512xf32> to vector<1x128xf32>
    %244 = vector.extract_strided_slice %241 {offsets = [0, 256], sizes = [1, 128], strides = [1, 1]} : vector<1x512xf32> to vector<1x128xf32>
    %245 = vector.extract_strided_slice %241 {offsets = [0, 384], sizes = [1, 128], strides = [1, 1]} : vector<1x512xf32> to vector<1x128xf32>
    %246 = arith.mulf %243, %214 : vector<1x128xf32>
    %247 = arith.mulf %242, %244 : vector<1x128xf32>
    %248 = arith.addf %246, %247 : vector<1x128xf32>
    %249 = math.tanh %248 : vector<1x128xf32>
    %250 = arith.mulf %245, %249 : vector<1x128xf32>
    %251 = vector.extract_strided_slice %11 {offsets = [7, 0], sizes = [1, 512], strides = [1, 1]} : vector<8x512xf32> to vector<1x512xf32>
    %c0_53 = arith.constant 0 : index
    %c0_54 = arith.constant 0 : index
    %252 = vector.load %arg2[%c0_53, %c0_54] : memref<128x512xf32, #tpu.memory_space<vmem>>, vector<128x512xf32>
    %cst_55 = arith.constant dense<0.000000e+00> : vector<1x512xf32>
    %253 = tpu.matmul %233, %252, %cst_55 {dimension_numbers = #tpu.dot_dimension_numbers<[1], [0], [0], [1], [0, 0, 1, 1], [], []>} : vector<1x128xf32>, vector<128x512xf32>, vector<1x512xf32> -> vector<1x512xf32>
    %254 = arith.addf %251, %253 : vector<1x512xf32>
    %255 = arith.mulf %5, %254 : vector<1x512xf32>
    %256 = math.tanh %255 : vector<1x512xf32>
    %257 = arith.mulf %5, %256 : vector<1x512xf32>
    %258 = arith.addf %257, %6 : vector<1x512xf32>
    %259 = vector.extract_strided_slice %258 {offsets = [0, 0], sizes = [1, 128], strides = [1, 1]} : vector<1x512xf32> to vector<1x128xf32>
    %260 = vector.extract_strided_slice %258 {offsets = [0, 128], sizes = [1, 128], strides = [1, 1]} : vector<1x512xf32> to vector<1x128xf32>
    %261 = vector.extract_strided_slice %258 {offsets = [0, 256], sizes = [1, 128], strides = [1, 1]} : vector<1x512xf32> to vector<1x128xf32>
    %262 = vector.extract_strided_slice %258 {offsets = [0, 384], sizes = [1, 128], strides = [1, 1]} : vector<1x512xf32> to vector<1x128xf32>
    %263 = arith.mulf %260, %231 : vector<1x128xf32>
    %264 = arith.mulf %259, %261 : vector<1x128xf32>
    %265 = arith.addf %263, %264 : vector<1x128xf32>
    %266 = math.tanh %265 : vector<1x128xf32>
    %267 = arith.mulf %262, %266 : vector<1x128xf32>
    %268 = tpu.concatenate %267, %250 in 1 : vector<1x128xf32>, vector<1x128xf32> -> vector<1x256xf32>
    %c0_56 = arith.constant 0 : index
    %c0_57 = arith.constant 0 : index
    %269 = vector.load %arg4[%c0_56, %c0_57] : memref<256x512xf32, #tpu.memory_space<vmem>>, vector<256x512xf32>
    %cst_58 = arith.constant dense<0.000000e+00> : vector<1x512xf32>
    %270 = tpu.matmul %268, %269, %cst_58 {dimension_numbers = #tpu.dot_dimension_numbers<[1], [0], [0], [1], [0, 0, 1, 1], [], []>} : vector<1x256xf32>, vector<256x512xf32>, vector<1x512xf32> -> vector<1x512xf32>
    %271 = arith.addf %270, %1 : vector<1x512xf32>
    %272 = arith.mulf %5, %271 : vector<1x512xf32>
    %273 = math.tanh %272 : vector<1x512xf32>
    %274 = arith.mulf %5, %273 : vector<1x512xf32>
    %275 = arith.addf %274, %6 : vector<1x512xf32>
    %276 = vector.extract_strided_slice %275 {offsets = [0, 0], sizes = [1, 128], strides = [1, 1]} : vector<1x512xf32> to vector<1x128xf32>
    %277 = vector.extract_strided_slice %275 {offsets = [0, 128], sizes = [1, 128], strides = [1, 1]} : vector<1x512xf32> to vector<1x128xf32>
    %278 = vector.extract_strided_slice %275 {offsets = [0, 256], sizes = [1, 128], strides = [1, 1]} : vector<1x512xf32> to vector<1x128xf32>
    %279 = vector.extract_strided_slice %275 {offsets = [0, 384], sizes = [1, 128], strides = [1, 1]} : vector<1x512xf32> to vector<1x128xf32>
    %280 = arith.mulf %277, %248 : vector<1x128xf32>
    %281 = arith.mulf %276, %278 : vector<1x128xf32>
    %282 = arith.addf %280, %281 : vector<1x128xf32>
    %283 = math.tanh %282 : vector<1x128xf32>
    %284 = arith.mulf %279, %283 : vector<1x128xf32>
    %285 = tpu.concatenate %46, %80, %114, %148, %182, %216, %250, %284 in 0 : vector<1x128xf32>, vector<1x128xf32>, vector<1x128xf32>, vector<1x128xf32>, vector<1x128xf32>, vector<1x128xf32>, vector<1x128xf32>, vector<1x128xf32> -> vector<8x128xf32>
    %c0_59 = arith.constant 0 : index
    %c0_60 = arith.constant 0 : index
    %286 = vector.load %arg6[%c0_59, %c0_60] : memref<128x128xf32, #tpu.memory_space<vmem>>, vector<128x128xf32>
    %cst_61 = arith.constant dense<0.000000e+00> : vector<8x128xf32>
    %287 = tpu.matmul %285, %286, %cst_61 {dimension_numbers = #tpu.dot_dimension_numbers<[1], [0], [0], [1], [0, 0, 1, 1], [], []>} : vector<8x128xf32>, vector<128x128xf32>, vector<8x128xf32> -> vector<8x128xf32>
    %c0_62 = arith.constant 0 : index
    %c0_63 = arith.constant 0 : index
    %288 = vector.load %arg7[%c0_62, %c0_63] : memref<1x128xf32, #tpu.memory_space<vmem>>, vector<1x128xf32>
    %289 = vector.broadcast %288 : vector<1x128xf32> to vector<8x128xf32>
    %290 = arith.addf %287, %289 : vector<8x128xf32>
    %c0_64 = arith.constant 0 : index
    %c0_65 = arith.constant 0 : index
    %291 = vector.load %arg8[%c0_64, %c0_65] : memref<8x128xf32, #tpu.memory_space<vmem>>, vector<8x128xf32>
    tpu.vector_store %arg8[%c0_64, %c0_65], %290 {strides = array<i32>} : memref<8x128xf32, #tpu.memory_space<vmem>>, vector<8x128xf32>,
    return
  }
}

</mosaic_0001>

<bundles_post_ra>
// kernel: lstm_regression_forward.1
= control target key start
LH: loop header
LB: loop body
LE: loop exit
PB: predicated region body
PF: predicated region fallthrough
CT: control target
= control target key end

     0   :  { %v7275_v3 = vmov 0.0   ;;  %vm3269_vm0 = vcmask 1040384   ;;  %vm3271_vm1 = vcmask 1041408   ;;  %vm3273_vm2 = vcmask 1042432   ;;  %s7266_s1 = inlined_call_operand.vmem [shape: f32[128,512], index: 1, kind: input, shape index: {}]   ;;  %s7267_s2 = inlined_call_operand.vmem [shape: f32[128,512], index: 2, kind: input, shape index: {}]   ;;  %s7268_s0 = inlined_call_operand.vmem [shape: f32[8,128], index: 0, kind: input, shape index: {}]   ;;  %s7269_s4 = inlined_call_operand.vmem [shape: f32[256,512], index: 4, kind: input, shape index: {}]   ;;  %s7270_s3 = inlined_call_operand.vmem [shape: f32[1,512], index: 3, kind: input, shape index: {}]   ;;  %s7271_s5 = inlined_call_operand.vmem [shape: f32[1,512], index: 5, kind: input, shape index: {}]   ;;  %s7272_s6 = inlined_call_operand.vmem [shape: f32[128,128], index: 6, kind: input, shape index: {}]   ;;  %s7273_s7 = inlined_call_operand.vmem [shape: f32[1,128], index: 7, kind: input, shape index: {}]   ;;  %s7274_s8 = inlined_call_operand.vmem [shape: f32[8,128], index: 8, kind: output, shape index: {}]  }
   0x1   :  { %v33_v0 = vld [vmem:[%s7266_s1 + $0x8] sm:$0xff]  ;;  %v35_v2 = vld [vmem:[%s7266_s1 + $0x18] sm:$0xff]  ;;  %181 = vmatprep.mubr.f32.mxu0 %v7275_v3  ;;  %252 = vmatprep.mubr.f32.mxu1 %v7275_v3  ;;  %v32_v6 = vld [vmem:[%s7266_s1] sm:$0xff]  ;;  %vm3275_vm3 = vcmask 1043456   ;;  %vm3277_vm4 = vcmask 1044480   ;;  %vm3279_vm5 = vcmask 1045504  }
   0x2   :  { %v37_v1 = vld [vmem:[%s7266_s1 + $0x28] sm:$0xff]  ;;  %v39_v5 = vld [vmem:[%s7266_s1 + $0x38] sm:$0xff]  ;;  %v36_v7 = vld [vmem:[%s7266_s1 + $0x20] sm:$0xff]  ;;  %vm5223_vm6 = vmmov 0   ;;  %vm3281_vm7 = vcmask 1046528  }
   0x3   :  { %v3434_v4 = vpack.c.bf16 %v37_v1, %v33_v0  ;;  %v3466_v8 = vpack.c.bf16 %v39_v5, %v35_v2  ;;  %v3436_v9 = vpack.c.bf16 %v36_v7, %v32_v6  ;;  %v34_v10 = vld [vmem:[%s7266_s1 + $0x10] sm:$0xff]  ;;  %v41_v12 = vld [vmem:[%s7266_s1 + $0x48] sm:$0xff]  ;;  %v43_v15 = vld [vmem:[%s7266_s1 + $0x58] sm:$0xff] }
   0x4   :  { %v38_v11 = vld [vmem:[%s7266_s1 + $0x30] sm:$0xff]  ;;  %v45_v14 = vld [vmem:[%s7266_s1 + $0x68] sm:$0xff]  ;;  %v47_v16 = vld [vmem:[%s7266_s1 + $0x78] sm:$0xff] }
   0x5   :  { %3435 = vmatprep.subr.bf16.mxu0 %v3434_v4  ;;  %v3468_v13 = vpack.c.bf16 %v38_v11, %v34_v10  ;;  %3467 = vmatprep.subr.bf16.mxu1 %v3466_v8  ;;  %v3438_v17 = vpack.c.bf16 %v45_v14, %v41_v12  ;;  %v3470_v18 = vpack.c.bf16 %v47_v16, %v43_v15  ;;  %v40_v19 = vld [vmem:[%s7266_s1 + $0x40] sm:$0xff]  ;;  %v42_v21 = vld [vmem:[%s7266_s1 + $0x50] sm:$0xff]  ;;  %v49_v24 = vld [vmem:[%s7266_s1 + $0x88] sm:$0xff] }
   0x6   :  { %3437 = vmatpush1.bf16.msra.mxu0 %v3436_v9  ;;  %v44_v20 = vld [vmem:[%s7266_s1 + $0x60] sm:$0xff]  ;;  %v46_v23 = vld [vmem:[%s7266_s1 + $0x70] sm:$0xff]  ;;  %v53_v25 = vld [vmem:[%s7266_s1 + $0xa8] sm:$0xff] }
   0x7   :  { %3469 = vmatpush1.bf16.msra.mxu1 %v3468_v13  ;;  %v3440_v22 = vpack.c.bf16 %v44_v20, %v40_v19  ;;  %3439 = vmatprep.subr.bf16.mxu0 %v3438_v17  ;;  %v3472_v26 = vpack.c.bf16 %v46_v23, %v42_v21  ;;  %v3442_v27 = vpack.c.bf16 %v53_v25, %v49_v24  ;;  %v51_v28 = vld [vmem:[%s7266_s1 + $0x98] sm:$0xff]  ;;  %v48_v30 = vld [vmem:[%s7266_s1 + $0x80] sm:$0xff]  ;;  %v50_v33 = vld [vmem:[%s7266_s1 + $0x90] sm:$0xff] }
   0x8   :  { %3471 = vmatprep.subr.bf16.mxu1 %v3470_v18  ;;  %v55_v29 = vld [vmem:[%s7266_s1 + $0xb8] sm:$0xff]  ;;  %v52_v32 = vld [vmem:[%s7266_s1 + $0xa0] sm:$0xff]  ;;  %v54_v34 = vld [vmem:[%s7266_s1 + $0xb0] sm:$0xff] }
   0x9   :  { %v3474_v31 = vpack.c.bf16 %v55_v29, %v51_v28  ;;  %v3444_v35 = vpack.c.bf16 %v52_v32, %v48_v30  ;;  %v57_v36 = vld [vmem:[%s7266_s1 + $0xc8] sm:$0xff]  ;;  %v59_v38 = vld [vmem:[%s7266_s1 + $0xd8] sm:$0xff]  ;;  %v3476_v39 = vpack.c.bf16 %v54_v34, %v50_v33  ;;  %v56_v42 = vld [vmem:[%s7266_s1 + $0xc0] sm:$0xff] }
   0xa   :  { %3441 = vmatpush1.bf16.msra.mxu0 %v3440_v22  ;;  %v61_v37 = vld [vmem:[%s7266_s1 + $0xe8] sm:$0xff]  ;;  %v63_v41 = vld [vmem:[%s7266_s1 + $0xf8] sm:$0xff]  ;;  %v60_v43 = vld [vmem:[%s7266_s1 + $0xe0] sm:$0xff] }
   0xb   :  { %3473 = vmatpush1.bf16.msra.mxu1 %v3472_v26  ;;  %3443 = vmatprep.subr.bf16.mxu0 %v3442_v27  ;;  %v3446_v40 = vpack.c.bf16 %v61_v37, %v57_v36  ;;  %v3478_v44 = vpack.c.bf16 %v63_v41, %v59_v38  ;;  %v58_v45 = vld [vmem:[%s7266_s1 + $0xd0] sm:$0xff]  ;;  %v65_v47 = vld [vmem:[%s7266_s1 + $0x108] sm:$0xff]  ;;  %v67_v49 = vld [vmem:[%s7266_s1 + $0x118] sm:$0xff]  ;;  %v3448_v51 = vpack.c.bf16 %v60_v43, %v56_v42 }
   0xc   :  { %3475 = vmatprep.subr.bf16.mxu1 %v3474_v31  ;;  %v62_v46 = vld [vmem:[%s7266_s1 + $0xf0] sm:$0xff]  ;;  %v69_v48 = vld [vmem:[%s7266_s1 + $0x128] sm:$0xff]  ;;  %v71_v50 = vld [vmem:[%s7266_s1 + $0x138] sm:$0xff] }
   0xd   :  { %v3480_v52 = vpack.c.bf16 %v62_v46, %v58_v45  ;;  %v3450_v53 = vpack.c.bf16 %v69_v48, %v65_v47  ;;  %v64_v54 = vld [vmem:[%s7266_s1 + $0x100] sm:$0xff]  ;;  %v66_v56 = vld [vmem:[%s7266_s1 + $0x110] sm:$0xff]  ;;  %v3482_v57 = vpack.c.bf16 %v71_v50, %v67_v49  ;;  %v73_v59 = vld [vmem:[%s7266_s1 + $0x148] sm:$0xff] }
   0xe   :  { %3445 = vmatpush1.bf16.msra.mxu0 %v3444_v35  ;;  %v68_v55 = vld [vmem:[%s7266_s1 + $0x120] sm:$0xff]  ;;  %v70_v58 = vld [vmem:[%s7266_s1 + $0x130] sm:$0xff]  ;;  %v77_v60 = vld [vmem:[%s7266_s1 + $0x168] sm:$0xff] }
   0xf   :  { %3477 = vmatpush1.bf16.msra.mxu1 %v3476_v39  ;;  %3447 = vmatprep.subr.bf16.mxu0 %v3446_v40  ;;  %v75_v61 = vld [vmem:[%s7266_s1 + $0x158] sm:$0xff]  ;;  %v3452_v63 = vpack.c.bf16 %v68_v55, %v64_v54  ;;  %v3484_v0 = vpack.c.bf16 %v70_v58, %v66_v56  ;;  %v3454_v1 = vpack.c.bf16 %v77_v60, %v73_v59  ;;  %v72_v2 = vld [vmem:[%s7266_s1 + $0x140] sm:$0xff]  ;;  %v74_v5 = vld [vmem:[%s7266_s1 + $0x150] sm:$0xff] }
  0x10   :  { %3479 = vmatprep.subr.bf16.mxu1 %v3478_v44  ;;  %v79_v62 = vld [vmem:[%s7266_s1 + $0x178] sm:$0xff]  ;;  %v76_v4 = vld [vmem:[%s7266_s1 + $0x160] sm:$0xff]  ;;  %v78_v7 = vld [vmem:[%s7266_s1 + $0x170] sm:$0xff] }
  0x11   :  { %v3486_v6 = vpack.c.bf16 %v79_v62, %v75_v61  ;;  %v81_v8 = vld [vmem:[%s7266_s1 + $0x188] sm:$0xff]  ;;  %v83_v10 = vld [vmem:[%s7266_s1 + $0x198] sm:$0xff]  ;;  %v3456_v12 = vpack.c.bf16 %v76_v4, %v72_v2  ;;  %v3488_v13 = vpack.c.bf16 %v78_v7, %v74_v5  ;;  %v80_v15 = vld [vmem:[%s7266_s1 + $0x180] sm:$0xff] }
  0x12   :  { %3449 = vmatpush1.bf16.msra.mxu0 %v3448_v51  ;;  %v85_v9 = vld [vmem:[%s7266_s1 + $0x1a8] sm:$0xff]  ;;  %v87_v11 = vld [vmem:[%s7266_s1 + $0x1b8] sm:$0xff]  ;;  %v84_v16 = vld [vmem:[%s7266_s1 + $0x1a0] sm:$0xff] }
  0x13   :  { %3481 = vmatpush1.bf16.msra.mxu1 %v3480_v52  ;;  %3451 = vmatprep.subr.bf16.mxu0 %v3450_v53  ;;  %v3458_v14 = vpack.c.bf16 %v85_v9, %v81_v8  ;;  %v82_v17 = vld [vmem:[%s7266_s1 + $0x190] sm:$0xff]  ;;  %v3490_v18 = vpack.c.bf16 %v87_v11, %v83_v10  ;;  %v89_v20 = vld [vmem:[%s7266_s1 + $0x1c8] sm:$0xff]  ;;  %v91_v22 = vld [vmem:[%s7266_s1 + $0x1d8] sm:$0xff]  ;;  %v3460_v24 = vpack.c.bf16 %v84_v16, %v80_v15 }
  0x14   :  { %3483 = vmatprep.subr.bf16.mxu1 %v3482_v57  ;;  %v86_v19 = vld [vmem:[%s7266_s1 + $0x1b0] sm:$0xff]  ;;  %v93_v21 = vld [vmem:[%s7266_s1 + $0x1e8] sm:$0xff]  ;;  %v95_v23 = vld [vmem:[%s7266_s1 + $0x1f8] sm:$0xff] }
  0x15   :  { %v3492_v25 = vpack.c.bf16 %v86_v19, %v82_v17  ;;  %v3462_v26 = vpack.c.bf16 %v93_v21, %v89_v20  ;;  %v88_v27 = vld [vmem:[%s7266_s1 + $0x1c0] sm:$0xff]  ;;  %v90_v29 = vld [vmem:[%s7266_s1 + $0x1d0] sm:$0xff]  ;;  %v3494_v30 = vpack.c.bf16 %v95_v23, %v91_v22  ;;  %v260_v32 = vld [vmem:[%s7267_s2 + $0x8] sm:$0xff] }
  0x16   :  { %3453 = vmatpush1.bf16.msra.mxu0 %v3452_v63  ;;  %v92_v28 = vld [vmem:[%s7266_s1 + $0x1e0] sm:$0xff]  ;;  %v94_v31 = vld [vmem:[%s7266_s1 + $0x1f0] sm:$0xff]  ;;  %v264_v33 = vld [vmem:[%s7267_s2 + $0x28] sm:$0xff] }
  0x17   :  { %3485 = vmatpush1.bf16.msra.mxu1 %v3484_v0  ;;  %3455 = vmatprep.subr.bf16.mxu0 %v3454_v1  ;;  %v262_v34 = vld [vmem:[%s7267_s2 + $0x18] sm:$0xff]  ;;  %v3464_v36 = vpack.c.bf16 %v92_v28, %v88_v27  ;;  %v3496_v37 = vpack.c.bf16 %v94_v31, %v90_v29  ;;  %v5475_v38 = vpack.c.bf16 %v264_v33, %v260_v32  ;;  %v259_v39 = vld [vmem:[%s7267_s2] sm:$0xff]  ;;  %v261_v41 = vld [vmem:[%s7267_s2 + $0x10] sm:$0xff] }
  0x18   :  { %3487 = vmatprep.subr.bf16.mxu1 %v3486_v6  ;;  %v266_v35 = vld [vmem:[%s7267_s2 + $0x38] sm:$0xff]  ;;  %v263_v40 = vld [vmem:[%s7267_s2 + $0x20] sm:$0xff]  ;;  %v265_v43 = vld [vmem:[%s7267_s2 + $0x30] sm:$0xff] }
  0x19   :  { %7425 = vst [vmem:[#allocation2_spill] sm:$0xff] %v5475_v38  ;;  %v5486_v42 = vpack.c.bf16 %v266_v35, %v262_v34  ;;  %v268_v44 = vld [vmem:[%s7267_s2 + $0x48] sm:$0xff]  ;;  %v270_v46 = vld [vmem:[%s7267_s2 + $0x58] sm:$0xff]  ;;  %v31_v48 = vld [vmem:[%s7268_s0] sm:$0xff]  ;;  %v5506_v49 = vpack.c.bf16 %v263_v40, %v259_v39  ;;  %v5509_v50 = vpack.c.bf16 %v265_v43, %v261_v41 }
  0x1a   :  { %3457 = vmatpush1.bf16.msra.mxu0 %v3456_v12  ;;  %v272_v45 = vld [vmem:[%s7267_s2 + $0x68] sm:$0xff]  ;;  %v274_v47 = vld [vmem:[%s7267_s2 + $0x78] sm:$0xff]  ;;  %v267_v52 = vld [vmem:[%s7267_s2 + $0x40] sm:$0xff] }
  0x1b   :  { %3489 = vmatpush1.bf16.msra.mxu1 %v3488_v13  ;;  %3459 = vmatprep.subr.bf16.mxu0 %v3458_v14  ;;  %7426 = vst [vmem:[#allocation3_spill] sm:$0xff] %v5486_v42  ;;  %v5511_v51 = vpack.c.bf16 %v272_v45, %v268_v44  ;;  %v271_v53 = vld [vmem:[%s7267_s2 + $0x60] sm:$0xff]  ;;  %v269_v54 = vld [vmem:[%s7267_s2 + $0x50] sm:$0xff]  ;;  %v5523_v55 = vpack.c.bf16 %v274_v47, %v270_v46  ;;  %v276_v57 = vld [vmem:[%s7267_s2 + $0x88] sm:$0xff] }
  0x1c   :  { %3491 = vmatprep.subr.bf16.mxu1 %v3490_v18  ;;  %v273_v56 = vld [vmem:[%s7267_s2 + $0x70] sm:$0xff]  ;;  %v280_v58 = vld [vmem:[%s7267_s2 + $0xa8] sm:$0xff]  ;;  %v278_v59 = vld [vmem:[%s7267_s2 + $0x98] sm:$0xff]  ;;  %v5541_v61 = vpack.c.bf16 %v271_v53, %v267_v52 }
  0x1d   :  { %v282_v60 = vld [vmem:[%s7267_s2 + $0xb8] sm:$0xff]  ;;  %v5545_v62 = vpack.c.bf16 %v273_v56, %v269_v54  ;;  %v5547_v63 = vpack.c.bf16 %v280_v58, %v276_v57  ;;  %v275_v0 = vld [vmem:[%s7267_s2 + $0x80] sm:$0xff]  ;;  %v277_v2 = vld [vmem:[%s7267_s2 + $0x90] sm:$0xff] }
  0x1e   :  { %3461 = vmatpush1.bf16.msra.mxu0 %v3460_v24  ;;  %v279_v1 = vld [vmem:[%s7267_s2 + $0xa0] sm:$0xff]  ;;  %v5559_v4 = vpack.c.bf16 %v282_v60, %v278_v59  ;;  %v281_v5 = vld [vmem:[%s7267_s2 + $0xb0] sm:$0xff]  ;;  %v284_v6 = vld [vmem:[%s7267_s2 + $0xc8] sm:$0xff] }
  0x1f   :  { %3493 = vmatpush1.bf16.msra.mxu1 %v3492_v25  ;;  %3463 = vmatprep.subr.bf16.mxu0 %v3462_v26  ;;  %v288_v7 = vld [vmem:[%s7267_s2 + $0xe8] sm:$0xff]  ;;  %v286_v8 = vld [vmem:[%s7267_s2 + $0xd8] sm:$0xff]  ;;  %v5579_v10 = vpack.c.bf16 %v279_v1, %v275_v0  ;;  %v5583_v11 = vpack.c.bf16 %v281_v5, %v277_v2  ;;  %v283_v13 = vld [vmem:[%s7267_s2 + $0xc0] sm:$0xff] }
  0x20   :  { %3495 = vmatprep.subr.bf16.mxu1 %v3494_v30  ;;  %v290_v9 = vld [vmem:[%s7267_s2 + $0xf8] sm:$0xff]  ;;  %v5585_v12 = vpack.c.bf16 %v288_v7, %v284_v6  ;;  %v287_v14 = vld [vmem:[%s7267_s2 + $0xe0] sm:$0xff]  ;;  %v285_v15 = vld [vmem:[%s7267_s2 + $0xd0] sm:$0xff] }
  0x21   :  { %v5597_v16 = vpack.c.bf16 %v290_v9, %v286_v8  ;;  %v289_v17 = vld [vmem:[%s7267_s2 + $0xf0] sm:$0xff]  ;;  %v292_v18 = vld [vmem:[%s7267_s2 + $0x108] sm:$0xff]  ;;  %v294_v20 = vld [vmem:[%s7267_s2 + $0x118] sm:$0xff]  ;;  %v5615_v22 = vpack.c.bf16 %v287_v14, %v283_v13 }
  0x22   :  { %3465 = vmatpush1.bf16.msra.mxu0 %v3464_v36  ;;  %v296_v19 = vld [vmem:[%s7267_s2 + $0x128] sm:$0xff]  ;;  %v298_v21 = vld [vmem:[%s7267_s2 + $0x138] sm:$0xff]  ;;  %v5619_v23 = vpack.c.bf16 %v289_v17, %v285_v15  ;;  %v291_v25 = vld [vmem:[%s7267_s2 + $0x100] sm:$0xff] }
  0x23   :  { %3497 = vmatpush1.bf16.msra.mxu1 %v3496_v37  ;;  %3499 = vmatprep.subr.bf16.mxu0 %v5475_v38  ;;  %v5621_v24 = vpack.c.bf16 %v296_v19, %v292_v18  ;;  %v295_v26 = vld [vmem:[%s7267_s2 + $0x120] sm:$0xff]  ;;  %v293_v27 = vld [vmem:[%s7267_s2 + $0x110] sm:$0xff]  ;;  %v5633_v28 = vpack.c.bf16 %v298_v21, %v294_v20  ;;  %v300_v30 = vld [vmem:[%s7267_s2 + $0x148] sm:$0xff] }
  0x24   :  { %3531 = vmatprep.subr.bf16.mxu1 %v5486_v42  ;;  %v297_v29 = vld [vmem:[%s7267_s2 + $0x130] sm:$0xff]  ;;  %v304_v31 = vld [vmem:[%s7267_s2 + $0x168] sm:$0xff]  ;;  %v302_v32 = vld [vmem:[%s7267_s2 + $0x158] sm:$0xff]  ;;  %v5651_v34 = vpack.c.bf16 %v295_v26, %v291_v25 }
  0x25   :  { %182 = vmatmul.mubr.f32.vlgmr.msra.gmra.mrb[0].mxu0 %v31_v48  ;;  %v306_v33 = vld [vmem:[%s7267_s2 + $0x178] sm:$0xff]  ;;  %v5655_v35 = vpack.c.bf16 %v297_v29, %v293_v27  ;;  %v5657_v36 = vpack.c.bf16 %v304_v31, %v300_v30  ;;  %v299_v37 = vld [vmem:[%s7267_s2 + $0x140] sm:$0xff]  ;;  %v301_v40 = vld [vmem:[%s7267_s2 + $0x150] sm:$0xff] }
  0x26   :  { %253 = vmatmul.mubr.f32.vlgmr.msra.gmra.mrb[0].mxu1 %v31_v48  ;;  %3501 = vmatpush1.bf16.msra.mxu0 %v5506_v49  ;;  %v303_v39 = vld [vmem:[%s7267_s2 + $0x160] sm:$0xff]  ;;  %v5669_v41 = vpack.c.bf16 %v306_v33, %v302_v32  ;;  %v305_v43 = vld [vmem:[%s7267_s2 + $0x170] sm:$0xff]  ;;  %v308_v44 = vld [vmem:[%s7267_s2 + $0x188] sm:$0xff] }
  0x27   :  { %3533 = vmatpush1.bf16.msra.mxu1 %v5509_v50  ;;  %3503 = vmatprep.subr.bf16.mxu0 %v5511_v51  ;;  %v312_v45 = vld [vmem:[%s7267_s2 + $0x1a8] sm:$0xff]  ;;  %v310_v46 = vld [vmem:[%s7267_s2 + $0x198] sm:$0xff]  ;;  %v5687_v48 = vpack.c.bf16 %v303_v39, %v299_v37  ;;  %v5691_v52 = vpack.c.bf16 %v305_v43, %v301_v40  ;;  %v307_v54 = vld [vmem:[%s7267_s2 + $0x180] sm:$0xff] }
  0x28   :  { %3535 = vmatprep.subr.bf16.mxu1 %v5523_v55  ;;  %387 = vmatprep.mubr.f32.mxu0 %v7275_v3  ;;  %v314_v47 = vld [vmem:[%s7267_s2 + $0x1b8] sm:$0xff]  ;;  %v5693_v53 = vpack.c.bf16 %v312_v45, %v308_v44  ;;  %v311_v56 = vld [vmem:[%s7267_s2 + $0x1a0] sm:$0xff]  ;;  %v309_v57 = vld [vmem:[%s7267_s2 + $0x190] sm:$0xff] }
  0x29   :  { %458 = vmatprep.mubr.f32.mxu1 %v7275_v3  ;;  %v5705_v58 = vpack.c.bf16 %v314_v47, %v310_v46  ;;  %v313_v59 = vld [vmem:[%s7267_s2 + $0x1b0] sm:$0xff]  ;;  %v316_v60 = vld [vmem:[%s7267_s2 + $0x1c8] sm:$0xff]  ;;  %v318_v1 = vld [vmem:[%s7267_s2 + $0x1d8] sm:$0xff]  ;;  %v5723_v5 = vpack.c.bf16 %v311_v56, %v307_v54 }
  0x2a   :  { %3505 = vmatpush1.bf16.msra.mxu0 %v5541_v61  ;;  %v320_v0 = vld [vmem:[%s7267_s2 + $0x1e8] sm:$0xff]  ;;  %v322_v2 = vld [vmem:[%s7267_s2 + $0x1f8] sm:$0xff]  ;;  %v5727_v6 = vpack.c.bf16 %v313_v59, %v309_v57  ;;  %v315_v8 = vld [vmem:[%s7267_s2 + $0x1c0] sm:$0xff] }
  0x2b   :  { %3537 = vmatpush1.bf16.msra.mxu1 %v5545_v62  ;;  %3507 = vmatprep.subr.bf16.mxu0 %v5547_v63  ;;  %v5729_v7 = vpack.c.bf16 %v320_v0, %v316_v60  ;;  %v319_v9 = vld [vmem:[%s7267_s2 + $0x1e0] sm:$0xff]  ;;  %v5738_v13 = vpack.c.bf16 %v322_v2, %v318_v1  ;;  %v317_v14 = vld [vmem:[%s7267_s2 + $0x1d0] sm:$0xff]  ;;  %v489_v19 = vld [vmem:[%s7269_s4 + $0x8] sm:$0xff] }
  0x2c   :  { %3539 = vmatprep.subr.bf16.mxu1 %v5559_v4  ;;  %v321_v15 = vld [vmem:[%s7267_s2 + $0x1f0] sm:$0xff]  ;;  %v5747_v17 = vpack.c.bf16 %v319_v9, %v315_v8  ;;  %v493_v20 = vld [vmem:[%s7269_s4 + $0x28] sm:$0xff]  ;;  %v491_v21 = vld [vmem:[%s7269_s4 + $0x18] sm:$0xff] }
  0x2d   :  { %v5751_v18 = vpack.c.bf16 %v321_v15, %v317_v14  ;;  %v5769_v25 = vpack.c.bf16 %v493_v20, %v489_v19  ;;  %v495_v26 = vld [vmem:[%s7269_s4 + $0x38] sm:$0xff]  ;;  %v488_v27 = vld [vmem:[%s7269_s4] sm:$0xff]  ;;  %v490_v32 = vld [vmem:[%s7269_s4 + $0x10] sm:$0xff] }
  0x2e   :  { %3509 = vmatpush1.bf16.msra.mxu0 %v5579_v10  ;;  %v492_v29 = vld [vmem:[%s7269_s4 + $0x20] sm:$0xff]  ;;  %v5780_v30 = vpack.c.bf16 %v495_v26, %v491_v21  ;;  %v494_v33 = vld [vmem:[%s7269_s4 + $0x30] sm:$0xff]  ;;  %v497_v37 = vld [vmem:[%s7269_s4 + $0x48] sm:$0xff] }
  0x2f   :  { %3541 = vmatpush1.bf16.msra.mxu1 %v5583_v11  ;;  %3511 = vmatprep.subr.bf16.mxu0 %v5585_v12  ;;  %v5782_v31 = vpack.c.bf16 %v492_v29, %v488_v27  ;;  %v5794_v39 = vpack.c.bf16 %v494_v33, %v490_v32  ;;  %v501_v40 = vld [vmem:[%s7269_s4 + $0x68] sm:$0xff]  ;;  %v499_v43 = vld [vmem:[%s7269_s4 + $0x58] sm:$0xff]  ;;  %v496_v47 = vld [vmem:[%s7269_s4 + $0x40] sm:$0xff] }
  0x30   :  { %3543 = vmatprep.subr.bf16.mxu1 %v5597_v16  ;;  %v503_v44 = vld [vmem:[%s7269_s4 + $0x78] sm:$0xff]  ;;  %v5807_v45 = vpack.c.bf16 %v501_v40, %v497_v37  ;;  %v500_v54 = vld [vmem:[%s7269_s4 + $0x60] sm:$0xff]  ;;  %v498_v56 = vld [vmem:[%s7269_s4 + $0x50] sm:$0xff] }
  0x31   :  { %v5809_v46 = vpack.c.bf16 %v503_v44, %v499_v43  ;;  %v5821_v57 = vpack.c.bf16 %v500_v54, %v496_v47  ;;  %v502_v59 = vld [vmem:[%s7269_s4 + $0x70] sm:$0xff]  ;;  %v505_v60 = vld [vmem:[%s7269_s4 + $0x88] sm:$0xff]  ;;  %v507_v8 = vld [vmem:[%s7269_s4 + $0x98] sm:$0xff] }
  0x32   :  { %3513 = vmatpush1.bf16.msra.mxu0 %v5615_v22  ;;  %v509_v0 = vld [vmem:[%s7269_s4 + $0xa8] sm:$0xff]  ;;  %v5834_v1 = vpack.c.bf16 %v502_v59, %v498_v56  ;;  %v511_v9 = vld [vmem:[%s7269_s4 + $0xb8] sm:$0xff]  ;;  %v504_v14 = vld [vmem:[%s7269_s4 + $0x80] sm:$0xff] }
  0x33   :  { %3545 = vmatpush1.bf16.msra.mxu1 %v5619_v23  ;;  %3515 = vmatprep.subr.bf16.mxu0 %v5621_v24  ;;  %7427 = vst [vmem:[#allocation4_spill] sm:$0xff] %v5809_v46  ;;  %7428 = vst [vmem:[#allocation5_spill] sm:$0xff] %v5821_v57  ;;  %v5836_v2 = vpack.c.bf16 %v509_v0, %v505_v60  ;;  %v5847_v15 = vpack.c.bf16 %v511_v9, %v507_v8  ;;  %v508_v19 = vld [vmem:[%s7269_s4 + $0xa0] sm:$0xff]  ;;  %v506_v20 = vld [vmem:[%s7269_s4 + $0x90] sm:$0xff] }
  0x34   :  { %3547 = vmatprep.subr.bf16.mxu1 %v5633_v28  ;;  %7429 = vst [vmem:[#allocation6_spill] sm:$0xff] %v5834_v1  ;;  %v510_v21 = vld [vmem:[%s7269_s4 + $0xb0] sm:$0xff]  ;;  %v5859_v26 = vpack.c.bf16 %v508_v19, %v504_v14  ;;  %v513_v27 = vld [vmem:[%s7269_s4 + $0xc8] sm:$0xff]  ;;  %v515_v32 = vld [vmem:[%s7269_s4 + $0xd8] sm:$0xff] }
  0x35   :  { %7430 = vst [vmem:[#allocation7_spill] sm:$0xff] %v5836_v2  ;;  %7431 = vst [vmem:[#allocation8_spill] sm:$0xff] %v5847_v15  ;;  %v517_v29 = vld [vmem:[%s7269_s4 + $0xe8] sm:$0xff]  ;;  %v5872_v33 = vpack.c.bf16 %v510_v21, %v506_v20  ;;  %v519_v40 = vld [vmem:[%s7269_s4 + $0xf8] sm:$0xff] }
  0x36   :  { %3517 = vmatpush1.bf16.msra.mxu0 %v5651_v34  ;;  %7432 = vst [vmem:[#allocation9_spill] sm:$0xff] %v5859_v26  ;;  %v5874_v37 = vpack.c.bf16 %v517_v29, %v513_v27  ;;  %v512_v43 = vld [vmem:[%s7269_s4 + $0xc0] sm:$0xff]  ;;  %v5886_v47 = vpack.c.bf16 %v519_v40, %v515_v32  ;;  %v514_v54 = vld [vmem:[%s7269_s4 + $0xd0] sm:$0xff]  ;;  %v521_v59 = vld [vmem:[%s7269_s4 + $0x108] sm:$0xff] }
  0x37   :  { %3549 = vmatpush1.bf16.msra.mxu1 %v5655_v35  ;;  %3519 = vmatprep.subr.bf16.mxu0 %v5657_v36  ;;  %7433 = vst [vmem:[#allocation10_spill] sm:$0xff] %v5872_v33  ;;  %v516_v44 = vld [vmem:[%s7269_s4 + $0xe0] sm:$0xff]  ;;  %v518_v56 = vld [vmem:[%s7269_s4 + $0xf0] sm:$0xff]  ;;  %v525_v60 = vld [vmem:[%s7269_s4 + $0x128] sm:$0xff] }
  0x38   :  { %3551 = vmatprep.subr.bf16.mxu1 %v5669_v41  ;;  %7434 = vst [vmem:[#allocation11_spill] sm:$0xff] %v5874_v37  ;;  %7435 = vst [vmem:[#allocation12_spill] sm:$0xff] %v5886_v47  ;;  %v523_v0 = vld [vmem:[%s7269_s4 + $0x118] sm:$0xff]  ;;  %v5907_v9 = vpack.c.bf16 %v516_v44, %v512_v43  ;;  %v5911_v14 = vpack.c.bf16 %v518_v56, %v514_v54  ;;  %v5913_v19 = vpack.c.bf16 %v525_v60, %v521_v59  ;;  %v520_v20 = vld [vmem:[%s7269_s4 + $0x100] sm:$0xff] }
  0x39   :  { %v527_v8 = vld [vmem:[%s7269_s4 + $0x138] sm:$0xff]  ;;  %v524_v21 = vld [vmem:[%s7269_s4 + $0x120] sm:$0xff]  ;;  %v522_v27 = vld [vmem:[%s7269_s4 + $0x110] sm:$0xff] }
  0x3a   :  { %3521 = vmatpush1.bf16.msra.mxu0 %v5687_v48  ;;  %7436 = vst [vmem:[#allocation13_spill] sm:$0xff] %v5907_v9  ;;  %7437 = vst [vmem:[#allocation14_spill] sm:$0xff] %v5911_v14  ;;  %v5925_v29 = vpack.c.bf16 %v527_v8, %v523_v0  ;;  %v526_v32 = vld [vmem:[%s7269_s4 + $0x130] sm:$0xff]  ;;  %v529_v40 = vld [vmem:[%s7269_s4 + $0x148] sm:$0xff]  ;;  %v5943_v56 = vpack.c.bf16 %v524_v21, %v520_v20 }
  0x3b   :  { %3553 = vmatpush1.bf16.msra.mxu1 %v5691_v52  ;;  %3523 = vmatprep.subr.bf16.mxu0 %v5693_v53  ;;  %7438 = vst [vmem:[#allocation15_spill] sm:$0xff] %v5913_v19  ;;  %v533_v43 = vld [vmem:[%s7269_s4 + $0x168] sm:$0xff]  ;;  %v531_v44 = vld [vmem:[%s7269_s4 + $0x158] sm:$0xff]  ;;  %v5947_v59 = vpack.c.bf16 %v526_v32, %v522_v27  ;;  %v528_v0 = vld [vmem:[%s7269_s4 + $0x140] sm:$0xff] }
  0x3c   :  { %3555 = vmatprep.subr.bf16.mxu1 %v5705_v58  ;;  %7439 = vst [vmem:[#allocation16_spill] sm:$0xff] %v5925_v29  ;;  %v535_v54 = vld [vmem:[%s7269_s4 + $0x178] sm:$0xff]  ;;  %7440 = vst [vmem:[#allocation17_spill] sm:$0xff] %v5943_v56  ;;  %v5949_v60 = vpack.c.bf16 %v533_v43, %v529_v40  ;;  %v532_v8 = vld [vmem:[%s7269_s4 + $0x160] sm:$0xff] }
  0x3d   :  { %7441 = vst [vmem:[#allocation18_spill] sm:$0xff] %v5947_v59  ;;  %v530_v20 = vld [vmem:[%s7269_s4 + $0x150] sm:$0xff]  ;;  %v5961_v21 = vpack.c.bf16 %v535_v54, %v531_v44  ;;  %v537_v32 = vld [vmem:[%s7269_s4 + $0x188] sm:$0xff]  ;;  %v539_v43 = vld [vmem:[%s7269_s4 + $0x198] sm:$0xff]  ;;  %v5979_v54 = vpack.c.bf16 %v532_v8, %v528_v0 }
  0x3e   :  { %3525 = vmatpush1.bf16.msra.mxu0 %v5723_v5  ;;  %7442 = vst [vmem:[#allocation19_spill] sm:$0xff] %v5949_v60  ;;  %v534_v27 = vld [vmem:[%s7269_s4 + $0x170] sm:$0xff]  ;;  %v541_v40 = vld [vmem:[%s7269_s4 + $0x1a8] sm:$0xff]  ;;  %v543_v44 = vld [vmem:[%s7269_s4 + $0x1b8] sm:$0xff] }
  0x3f   :  { %3557 = vmatpush1.bf16.msra.mxu1 %v5727_v6  ;;  %3527 = vmatprep.subr.bf16.mxu0 %v5729_v7  ;;  %7443 = vst [vmem:[#allocation20_spill] sm:$0xff] %v5961_v21  ;;  %7444 = vst [vmem:[#allocation21_spill] sm:$0xff] %v5979_v54  ;;  %v5994_v0 = vpack.c.bf16 %v543_v44, %v539_v43  ;;  %v538_v8 = vld [vmem:[%s7269_s4 + $0x190] sm:$0xff]  ;;  %v549_v43 = vld [vmem:[%s7269_s4 + $0x1e8] sm:$0xff] }
  0x40   :  { %3559 = vmatprep.subr.bf16.mxu1 %v5738_v13  ;;  %v551_v44 = vld [vmem:[%s7269_s4 + $0x1f8] sm:$0xff] }
  0x41   :  { %7447 = vst [vmem:[#allocation24_spill] sm:$0xff] %v5994_v0 }
  0x42   :  { %3529 = vmatpush1.bf16.msra.mxu0 %v5747_v17 }
  0x43   :  { %3561 = vmatpush1.bf16.msra.mxu1 %v5751_v18  ;;  %3563 = vmatprep.subr.bf16.mxu0 %v5769_v25 }
  0x44   :  { %3627 = vmatprep.subr.bf16.mxu1 %v5780_v30 }
  0x45   :  { %388 = vmatmul.mubr.f32.vlgmr.msra.gmra.mrb[2].mxu0 %v7275_v3 }
  0x46   :  { %459 = vmatmul.mubr.f32.vlgmr.msra.gmra.mrb[2].mxu1 %v7275_v3  ;;  %701 = vmatprep.mubr.f32.mxu0 %v7275_v3 }
  0x47   :  { %772 = vmatprep.mubr.f32.mxu1 %v7275_v3  ;;  %3565 = vmatpush1.bf16.msra.mxu0 %v5782_v31  ;;  %v5983_v3 = vpack.c.bf16 %v534_v27, %v530_v20  ;;  %v542_v20 = vld [vmem:[%s7269_s4 + $0x1b0] sm:$0xff] }
  0x48   :  { %3629 = vmatpush1.bf16.msra.mxu1 %v5794_v39  ;;  %3567 = vmatprep.subr.bf16.mxu0 %v5807_v45 }
  0x49   :  { %3631 = vmatprep.subr.bf16.mxu1 %v5809_v46  ;;  %7445 = vst [vmem:[#allocation22_spill] sm:$0xff] %v5983_v3 }
  0x4b   :  { %3569 = vmatpush1.bf16.msra.mxu0 %v5821_v57 }
  0x4c   :  { %3633 = vmatpush1.bf16.msra.mxu1 %v5834_v1  ;;  %3571 = vmatprep.subr.bf16.mxu0 %v5836_v2 }
  0x4d   :  { %3635 = vmatprep.subr.bf16.mxu1 %v5847_v15 }
  0x4f   :  { %3573 = vmatpush1.bf16.msra.mxu0 %v5859_v26 }
  0x50   :  { %3637 = vmatpush1.bf16.msra.mxu1 %v5872_v33  ;;  %3575 = vmatprep.subr.bf16.mxu0 %v5874_v37 }
  0x51   :  { %3639 = vmatprep.subr.bf16.mxu1 %v5886_v47 }
  0x53   :  { %3577 = vmatpush1.bf16.msra.mxu0 %v5907_v9 }
  0x54   :  { %3641 = vmatpush1.bf16.msra.mxu1 %v5911_v14  ;;  %3579 = vmatprep.subr.bf16.mxu0 %v5913_v19  ;;  %v536_v19 = vld [vmem:[%s7269_s4 + $0x180] sm:$0xff] }
  0x55   :  { %3643 = vmatprep.subr.bf16.mxu1 %v5925_v29  ;;  %v5985_v29 = vpack.c.bf16 %v541_v40, %v537_v32  ;;  %v540_v14 = vld [vmem:[%s7269_s4 + $0x1a0] sm:$0xff]  ;;  %v6007_v32 = vpack.c.bf16 %v542_v20, %v538_v8  ;;  %v545_v40 = vld [vmem:[%s7269_s4 + $0x1c8] sm:$0xff] }
  0x56   :  { %v6003_v27 = vpack.c.bf16 %v540_v14, %v536_v19  ;;  %v547_v14 = vld [vmem:[%s7269_s4 + $0x1d8] sm:$0xff]  ;;  %v6021_v19 = vpack.c.bf16 %v549_v43, %v545_v40  ;;  %v544_v8 = vld [vmem:[%s7269_s4 + $0x1c0] sm:$0xff]  ;;  %v546_v40 = vld [vmem:[%s7269_s4 + $0x1d0] sm:$0xff] }
  0x57   :  { %3581 = vmatpush1.bf16.msra.mxu0 %v5943_v56  ;;  %7446 = vst [vmem:[#allocation23_spill] sm:$0xff] %v5985_v29  ;;  %7449 = vst [vmem:[#allocation26_spill] sm:$0xff] %v6007_v32  ;;  %v548_v20 = vld [vmem:[%s7269_s4 + $0x1e0] sm:$0xff]  ;;  %v550_v43 = vld [vmem:[%s7269_s4 + $0x1f0] sm:$0xff] }
  0x58   :  { %3645 = vmatpush1.bf16.msra.mxu1 %v5947_v59  ;;  %3583 = vmatprep.subr.bf16.mxu0 %v5949_v60  ;;  %7448 = vst [vmem:[#allocation25_spill] sm:$0xff] %v6003_v27  ;;  %7450 = vst [vmem:[#allocation27_spill] sm:$0xff] %v6021_v19 }
  0x59   :  { %3647 = vmatprep.subr.bf16.mxu1 %v5961_v21 }
  0x5b   :  { %3585 = vmatpush1.bf16.msra.mxu0 %v5979_v54 }
  0x5c   :  { %3649 = vmatpush1.bf16.msra.mxu1 %v5983_v3  ;;  %3587 = vmatprep.subr.bf16.mxu0 %v5985_v29  ;;  %v97_v29 = vlaneseq }
  0x5d   :  { %3651 = vmatprep.subr.bf16.mxu1 %v5994_v0  ;;  %v6034_v0 = vpack.c.bf16 %v548_v20, %v544_v8  ;;  %v555_v8 = vld [vmem:[%s7269_s4 + $0x218] sm:$0xff] }
  0x5e   :  { %v6338_v3 = vshrl.u32 %v97_v29, 7 }
  0x5f   :  { %3589 = vmatpush1.bf16.msra.mxu0 %v6003_v27  ;;  %v6032_v27 = vpack.c.bf16 %v551_v44, %v547_v14  ;;  %7452 = vst [vmem:[#allocation29_spill] sm:$0xff] %v6034_v0  ;;  %v553_v14 = vld [vmem:[%s7269_s4 + $0x208] sm:$0xff] }
  0x60   :  { %3653 = vmatpush1.bf16.msra.mxu1 %v6007_v32  ;;  %3591 = vmatprep.subr.bf16.mxu0 %v6021_v19  ;;  %v6043_v32 = vpack.c.bf16 %v550_v43, %v546_v40  ;;  %v557_v44 = vld [vmem:[%s7269_s4 + $0x228] sm:$0xff]  ;;  %v559_v40 = vld [vmem:[%s7269_s4 + $0x238] sm:$0xff]  ;;  %v552_v43 = vld [vmem:[%s7269_s4 + $0x200] sm:$0xff]  ;;  %7486 = vst [vmem:[#allocation63_spill] sm:$0xff] %v6338_v3 }
  0x61   :  { %7451 = vst [vmem:[#allocation28_spill] sm:$0xff] %v6032_v27  ;;  %3655 = vmatprep.subr.bf16.mxu1 %v6032_v27  ;;  %v6057_v20 = vpack.c.bf16 %v557_v44, %v553_v14  ;;  %v6068_v27 = vpack.c.bf16 %v559_v40, %v555_v8  ;;  %v554_v14 = vld [vmem:[%s7269_s4 + $0x210] sm:$0xff]  ;;  %v565_v8 = vld [vmem:[%s7269_s4 + $0x268] sm:$0xff]  ;;  %v563_v40 = vld [vmem:[%s7269_s4 + $0x258] sm:$0xff] }
  0x62   :  { %7453 = vst [vmem:[#allocation30_spill] sm:$0xff] %v6043_v32  ;;  %v558_v44 = vld [vmem:[%s7269_s4 + $0x230] sm:$0xff] }
  0x63   :  { %3593 = vmatpush1.bf16.msra.mxu0 %v6034_v0  ;;  %7454 = vst [vmem:[#allocation31_spill] sm:$0xff] %v6057_v20  ;;  %v556_v0 = vld [vmem:[%s7269_s4 + $0x220] sm:$0xff]  ;;  %7455 = vst [vmem:[#allocation32_spill] sm:$0xff] %v6068_v27 }
  0x64   :  { %3657 = vmatpush1.bf16.msra.mxu1 %v6043_v32  ;;  %v6070_v19 = vpack.c.bf16 %v556_v0, %v552_v43  ;;  %3595 = vmatprep.subr.bf16.mxu0 %v6057_v20  ;;  %v6079_v32 = vpack.c.bf16 %v558_v44, %v554_v14  ;;  %v561_v0 = vld [vmem:[%s7269_s4 + $0x248] sm:$0xff]  ;;  %v567_v14 = vld [vmem:[%s7269_s4 + $0x278] sm:$0xff]  ;;  %v560_v44 = vld [vmem:[%s7269_s4 + $0x240] sm:$0xff] }
  0x65   :  { %3659 = vmatprep.subr.bf16.mxu1 %v6068_v27  ;;  %v6093_v43 = vpack.c.bf16 %v565_v8, %v561_v0  ;;  %v6104_v27 = vpack.c.bf16 %v567_v14, %v563_v40  ;;  %v562_v0 = vld [vmem:[%s7269_s4 + $0x250] sm:$0xff]  ;;  %v573_v40 = vld [vmem:[%s7269_s4 + $0x2a8] sm:$0xff]  ;;  %v571_v14 = vld [vmem:[%s7269_s4 + $0x298] sm:$0xff] }
  0x66   :  { %7456 = vst [vmem:[#allocation33_spill] sm:$0xff] %v6070_v19  ;;  %7457 = vst [vmem:[#allocation34_spill] sm:$0xff] %v6079_v32  ;;  %v566_v8 = vld [vmem:[%s7269_s4 + $0x270] sm:$0xff] }
  0x67   :  { %3597 = vmatpush1.bf16.msra.mxu0 %v6070_v19  ;;  %7458 = vst [vmem:[#allocation35_spill] sm:$0xff] %v6093_v43  ;;  %v564_v19 = vld [vmem:[%s7269_s4 + $0x260] sm:$0xff]  ;;  %7459 = vst [vmem:[#allocation36_spill] sm:$0xff] %v6104_v27 }
  0x68   :  { %3661 = vmatpush1.bf16.msra.mxu1 %v6079_v32  ;;  %v6106_v20 = vpack.c.bf16 %v564_v19, %v560_v44  ;;  %3599 = vmatprep.subr.bf16.mxu0 %v6093_v43  ;;  %v6115_v32 = vpack.c.bf16 %v566_v8, %v562_v0  ;;  %v569_v19 = vld [vmem:[%s7269_s4 + $0x288] sm:$0xff]  ;;  %v575_v0 = vld [vmem:[%s7269_s4 + $0x2b8] sm:$0xff]  ;;  %v568_v8 = vld [vmem:[%s7269_s4 + $0x280] sm:$0xff] }
  0x69   :  { %3663 = vmatprep.subr.bf16.mxu1 %v6104_v27  ;;  %v6129_v44 = vpack.c.bf16 %v573_v40, %v569_v19  ;;  %v6140_v27 = vpack.c.bf16 %v575_v0, %v571_v14  ;;  %v570_v19 = vld [vmem:[%s7269_s4 + $0x290] sm:$0xff]  ;;  %v581_v14 = vld [vmem:[%s7269_s4 + $0x2e8] sm:$0xff]  ;;  %v579_v0 = vld [vmem:[%s7269_s4 + $0x2d8] sm:$0xff] }
  0x6a   :  { %7460 = vst [vmem:[#allocation37_spill] sm:$0xff] %v6106_v20  ;;  %7461 = vst [vmem:[#allocation38_spill] sm:$0xff] %v6115_v32  ;;  %v574_v40 = vld [vmem:[%s7269_s4 + $0x2b0] sm:$0xff] }
  0x6b   :  { %3601 = vmatpush1.bf16.msra.mxu0 %v6106_v20  ;;  %7462 = vst [vmem:[#allocation39_spill] sm:$0xff] %v6129_v44  ;;  %v572_v20 = vld [vmem:[%s7269_s4 + $0x2a0] sm:$0xff]  ;;  %7463 = vst [vmem:[#allocation40_spill] sm:$0xff] %v6140_v27 }
  0x6c   :  { %3665 = vmatpush1.bf16.msra.mxu1 %v6115_v32  ;;  %v6142_v43 = vpack.c.bf16 %v572_v20, %v568_v8  ;;  %3603 = vmatprep.subr.bf16.mxu0 %v6129_v44  ;;  %v6151_v32 = vpack.c.bf16 %v574_v40, %v570_v19  ;;  %v577_v20 = vld [vmem:[%s7269_s4 + $0x2c8] sm:$0xff]  ;;  %v583_v19 = vld [vmem:[%s7269_s4 + $0x2f8] sm:$0xff]  ;;  %v576_v40 = vld [vmem:[%s7269_s4 + $0x2c0] sm:$0xff] }
  0x6d   :  { %3667 = vmatprep.subr.bf16.mxu1 %v6140_v27  ;;  %v6165_v8 = vpack.c.bf16 %v581_v14, %v577_v20  ;;  %v6176_v27 = vpack.c.bf16 %v583_v19, %v579_v0  ;;  %v578_v20 = vld [vmem:[%s7269_s4 + $0x2d0] sm:$0xff]  ;;  %v589_v0 = vld [vmem:[%s7269_s4 + $0x328] sm:$0xff]  ;;  %v587_v19 = vld [vmem:[%s7269_s4 + $0x318] sm:$0xff] }
  0x6e   :  { %7464 = vst [vmem:[#allocation41_spill] sm:$0xff] %v6142_v43  ;;  %7465 = vst [vmem:[#allocation42_spill] sm:$0xff] %v6151_v32  ;;  %v582_v14 = vld [vmem:[%s7269_s4 + $0x2f0] sm:$0xff] }
  0x6f   :  { %3605 = vmatpush1.bf16.msra.mxu0 %v6142_v43  ;;  %7466 = vst [vmem:[#allocation43_spill] sm:$0xff] %v6165_v8  ;;  %v580_v43 = vld [vmem:[%s7269_s4 + $0x2e0] sm:$0xff]  ;;  %7467 = vst [vmem:[#allocation44_spill] sm:$0xff] %v6176_v27 }
  0x70   :  { %3669 = vmatpush1.bf16.msra.mxu1 %v6151_v32  ;;  %v6178_v44 = vpack.c.bf16 %v580_v43, %v576_v40  ;;  %3607 = vmatprep.subr.bf16.mxu0 %v6165_v8  ;;  %v6187_v32 = vpack.c.bf16 %v582_v14, %v578_v20  ;;  %v585_v43 = vld [vmem:[%s7269_s4 + $0x308] sm:$0xff]  ;;  %v591_v20 = vld [vmem:[%s7269_s4 + $0x338] sm:$0xff]  ;;  %v584_v14 = vld [vmem:[%s7269_s4 + $0x300] sm:$0xff] }
  0x71   :  { %3671 = vmatprep.subr.bf16.mxu1 %v6176_v27  ;;  %v6201_v40 = vpack.c.bf16 %v589_v0, %v585_v43  ;;  %v6212_v27 = vpack.c.bf16 %v591_v20, %v587_v19  ;;  %v586_v43 = vld [vmem:[%s7269_s4 + $0x310] sm:$0xff]  ;;  %v597_v19 = vld [vmem:[%s7269_s4 + $0x368] sm:$0xff]  ;;  %v595_v20 = vld [vmem:[%s7269_s4 + $0x358] sm:$0xff] }
  0x72   :  { %7468 = vst [vmem:[#allocation45_spill] sm:$0xff] %v6178_v44  ;;  %7469 = vst [vmem:[#allocation46_spill] sm:$0xff] %v6187_v32  ;;  %v590_v0 = vld [vmem:[%s7269_s4 + $0x330] sm:$0xff] }
  0x73   :  { %3609 = vmatpush1.bf16.msra.mxu0 %v6178_v44  ;;  %7470 = vst [vmem:[#allocation47_spill] sm:$0xff] %v6201_v40  ;;  %v588_v44 = vld [vmem:[%s7269_s4 + $0x320] sm:$0xff]  ;;  %7471 = vst [vmem:[#allocation48_spill] sm:$0xff] %v6212_v27 }
  0x74   :  { %3673 = vmatpush1.bf16.msra.mxu1 %v6187_v32  ;;  %v6214_v8 = vpack.c.bf16 %v588_v44, %v584_v14  ;;  %3611 = vmatprep.subr.bf16.mxu0 %v6201_v40  ;;  %v6223_v32 = vpack.c.bf16 %v590_v0, %v586_v43  ;;  %v593_v44 = vld [vmem:[%s7269_s4 + $0x348] sm:$0xff]  ;;  %v599_v43 = vld [vmem:[%s7269_s4 + $0x378] sm:$0xff]  ;;  %v592_v0 = vld [vmem:[%s7269_s4 + $0x340] sm:$0xff] }
  0x75   :  { %3675 = vmatprep.subr.bf16.mxu1 %v6212_v27  ;;  %v6237_v14 = vpack.c.bf16 %v597_v19, %v593_v44  ;;  %v6248_v27 = vpack.c.bf16 %v599_v43, %v595_v20  ;;  %v594_v44 = vld [vmem:[%s7269_s4 + $0x350] sm:$0xff]  ;;  %v605_v20 = vld [vmem:[%s7269_s4 + $0x3a8] sm:$0xff]  ;;  %v603_v43 = vld [vmem:[%s7269_s4 + $0x398] sm:$0xff] }
  0x76   :  { %7472 = vst [vmem:[#allocation49_spill] sm:$0xff] %v6214_v8  ;;  %7473 = vst [vmem:[#allocation50_spill] sm:$0xff] %v6223_v32  ;;  %v598_v19 = vld [vmem:[%s7269_s4 + $0x370] sm:$0xff] }
  0x77   :  { %3613 = vmatpush1.bf16.msra.mxu0 %v6214_v8  ;;  %7474 = vst [vmem:[#allocation51_spill] sm:$0xff] %v6237_v14  ;;  %v596_v8 = vld [vmem:[%s7269_s4 + $0x360] sm:$0xff]  ;;  %7475 = vst [vmem:[#allocation52_spill] sm:$0xff] %v6248_v27 }
  0x78   :  { %3677 = vmatpush1.bf16.msra.mxu1 %v6223_v32  ;;  %v6250_v40 = vpack.c.bf16 %v596_v8, %v592_v0  ;;  %3615 = vmatprep.subr.bf16.mxu0 %v6237_v14  ;;  %v6259_v32 = vpack.c.bf16 %v598_v19, %v594_v44  ;;  %v601_v8 = vld [vmem:[%s7269_s4 + $0x388] sm:$0xff]  ;;  %v607_v44 = vld [vmem:[%s7269_s4 + $0x3b8] sm:$0xff]  ;;  %v600_v19 = vld [vmem:[%s7269_s4 + $0x380] sm:$0xff] }
  0x79   :  { %3679 = vmatprep.subr.bf16.mxu1 %v6248_v27  ;;  %v6273_v0 = vpack.c.bf16 %v605_v20, %v601_v8  ;;  %v6284_v27 = vpack.c.bf16 %v607_v44, %v603_v43  ;;  %v602_v8 = vld [vmem:[%s7269_s4 + $0x390] sm:$0xff]  ;;  %v613_v43 = vld [vmem:[%s7269_s4 + $0x3e8] sm:$0xff]  ;;  %v611_v44 = vld [vmem:[%s7269_s4 + $0x3d8] sm:$0xff] }
  0x7a   :  { %7476 = vst [vmem:[#allocation53_spill] sm:$0xff] %v6250_v40  ;;  %7477 = vst [vmem:[#allocation54_spill] sm:$0xff] %v6259_v32  ;;  %v606_v20 = vld [vmem:[%s7269_s4 + $0x3b0] sm:$0xff] }
  0x7b   :  { %3617 = vmatpush1.bf16.msra.mxu0 %v6250_v40  ;;  %7478 = vst [vmem:[#allocation55_spill] sm:$0xff] %v6273_v0  ;;  %v604_v40 = vld [vmem:[%s7269_s4 + $0x3a0] sm:$0xff]  ;;  %7479 = vst [vmem:[#allocation56_spill] sm:$0xff] %v6284_v27 }
  0x7c   :  { %3681 = vmatpush1.bf16.msra.mxu1 %v6259_v32  ;;  %v6286_v14 = vpack.c.bf16 %v604_v40, %v600_v19  ;;  %3619 = vmatprep.subr.bf16.mxu0 %v6273_v0  ;;  %v6295_v32 = vpack.c.bf16 %v606_v20, %v602_v8  ;;  %v609_v40 = vld [vmem:[%s7269_s4 + $0x3c8] sm:$0xff]  ;;  %v615_v8 = vld [vmem:[%s7269_s4 + $0x3f8] sm:$0xff]  ;;  %v608_v20 = vld [vmem:[%s7269_s4 + $0x3c0] sm:$0xff] }
  0x7d   :  { %3683 = vmatprep.subr.bf16.mxu1 %v6284_v27  ;;  %v6309_v19 = vpack.c.bf16 %v613_v43, %v609_v40  ;;  %v6320_v27 = vpack.c.bf16 %v615_v8, %v611_v44  ;;  %v610_v40 = vld [vmem:[%s7269_s4 + $0x3d0] sm:$0xff] }
  0x7e   :  { %7480 = vst [vmem:[#allocation57_spill] sm:$0xff] %v6286_v14  ;;  %7481 = vst [vmem:[#allocation58_spill] sm:$0xff] %v6295_v32  ;;  %v614_v43 = vld [vmem:[%s7269_s4 + $0x3f0] sm:$0xff] }
  0x7f   :  { %3621 = vmatpush1.bf16.msra.mxu0 %v6286_v14  ;;  %7482 = vst [vmem:[#allocation59_spill] sm:$0xff] %v6309_v19  ;;  %v612_v14 = vld [vmem:[%s7269_s4 + $0x3e0] sm:$0xff]  ;;  %7483 = vst [vmem:[#allocation60_spill] sm:$0xff] %v6320_v27 }
  0x80   :  { %3685 = vmatpush1.bf16.msra.mxu1 %v6295_v32  ;;  %v6322_v0 = vpack.c.bf16 %v612_v14, %v608_v20  ;;  %3623 = vmatprep.subr.bf16.mxu0 %v6309_v19  ;;  %v6331_v32 = vpack.c.bf16 %v614_v43, %v610_v40  ;;  %v7379_v40 = vsub.s32 0, %v6338_v3  ;;  %v29_v43 = vld [vmem:[%s7270_s3] sm:$0xf]  ;;  %v7392_v19 = vsub.s32 3, %v6338_v3 }
  0x81   :  { %3687 = vmatprep.subr.bf16.mxu1 %v6320_v27 }
  0x82   :  { %7484 = vst [vmem:[#allocation61_spill] sm:$0xff] %v6322_v0  ;;  %7485 = vst [vmem:[#allocation62_spill] sm:$0xff] %v6331_v32 }
  0x83   :  { %3625 = vmatpush1.bf16.msra.mxu0 %v6322_v0  ;;  %v7384_v0 = vsub.s32 1, %v6338_v3 }
  0x84   :  { %3689 = vmatpush1.bf16.msra.mxu1 %v6331_v32  ;;  %3691 = vmatprep.subr.bf16.mxu0 %v5475_v38  ;;  %v100_v38 = vrot.slane %v29_v43, %v7379_v40 }
  0x85   :  { %3723 = vmatprep.subr.bf16.mxu1 %v5486_v42  ;;  %v7385_v42 = vsub.s32 2, %v6338_v3  ;;  %v104_v32 = vrot.slane %v29_v43, %v7384_v0 }
  0x87   :  { %v108_v29 = vrot.slane %v29_v43, %v7385_v42 }
  0xf8   :  { %v183_v14 = vpop.f32.mrb[0].mxu0 }
  0xf9   :  { %v185_v44 = vpop.f32.mrb[1].mxu0  ;;  %v254_v8 = vpop.f32.mrb[0].mxu1  ;;  %v6350_v27 = vadd.f32 %v183_v14, %v100_v38  ;;  %v112_v38 = vrot.slane %v29_v43, %v7392_v19  ;;  %v7507_v19 = vld [vmem:[#allocation28_spill] sm:$0xff] }
  0xfa   :  { %v256_v20 = vpop.f32.mrb[1].mxu1  ;;  %v6355_v54 = vadd.f32 %v185_v44, %v104_v32  ;;  %v6359_v47 = vadd.f32 %v254_v8, %v108_v29 }
  0xfb   :  { %7487 = vst [vmem:[#allocation64_spill] sm:$0xff] %v6350_v27  ;;  %v6364_v32 = vadd.f32 %v256_v20, %v112_v38  ;;  %v7493_v38 = vld [vmem:[#allocation14_spill] sm:$0xff] }
  0xfc   :  { %7488 = vst [vmem:[#allocation65_spill] sm:$0xff] %v6355_v54  ;;  %7489 = vst [vmem:[#allocation66_spill] sm:$0xff] %v6359_v47 }
 0x118   :  { %v389_v21 = vpop.f32.mrb[2].mxu0 }
 0x119   :  { %v465_v60 = vadd.f32 %v389_v21, %v6350_v27  ;;  %v460_v59 = vpop.f32.mrb[2].mxu1  ;;  %v391_v56 = vpop.f32.mrb[3].mxu0 }
 0x11a   :  { %v466_v40 = vadd.f32 %v391_v56, %v6355_v54  ;;  %v462_v9 = vpop.f32.mrb[3].mxu1  ;;  %v467_v42 = vadd.f32 %v460_v59, %v6359_v47 }
 0x11b   :  { %v469_v14 = vmul.f32 0.5, %v465_v60  ;;  %v468_v21 = vadd.f32 %v462_v9, %v6364_v32 }
 0x11c   :  { %v470_v0 = vmul.f32 0.5, %v466_v40 }
 0x11d   :  { %5061 = vtanh.f32 %v469_v14  ;;  %v471_v44 = vmul.f32 0.5, %v468_v21  ;;  %v7494_v21 = vld [vmem:[#allocation15_spill] sm:$0xff] }
 0x11e   :  { %5063 = vtanh.f32 %v470_v0 }
 0x11f   :  { %5065 = vtanh.f32 %v467_v42 }
 0x120   :  { %5067 = vtanh.f32 %v471_v44  ;;  %v7495_v44 = vld [vmem:[#allocation16_spill] sm:$0xff] }
 0x127   :  { %v5062_v27 = vpop.eup %5061 }
 0x128   :  { %v5064_v56 = vpop.eup %5063  ;;  %v476_v54 = vmul.f32 0.5, %v5062_v27  ;;  %v7492_v27 = vld [vmem:[#allocation13_spill] sm:$0xff] }
 0x129   :  { %v477_v8 = vmul.f32 0.5, %v5064_v56  ;;  %v5066_v3 = vpop.eup %5065  ;;  %v7496_v56 = vld [vmem:[#allocation17_spill] sm:$0xff] }
 0x12a   :  { %v479_v29 = vadd.f32 0.5, %v476_v54  ;;  %v5068_v59 = vpop.eup %5067  ;;  %v7491_v54 = vld [vmem:[#allocation12_spill] sm:$0xff] }
 0x12b   :  { %v480_v43 = vadd.f32 0.5, %v477_v8  ;;  %v478_v0 = vmul.f32 0.5, %v5068_v59  ;;  %v7497_v8 = vld [vmem:[#allocation18_spill] sm:$0xff]  ;;  %v7502_v59 = vld [vmem:[#allocation23_spill] sm:$0xff] }
 0x12c   :  { %v484_v60 = vmul.f32 %v5066_v3, %v479_v29  ;;  %v7490_v3 = vmov 0.0   ;;  %v7498_v29 = vld [vmem:[#allocation19_spill] sm:$0xff] }
 0x12d   :  { %v483_v40 = vmul.f32 0.0, %v480_v43  ;;  %v482_v42 = vadd.f32 0.5, %v478_v0  ;;  %v7499_v43 = vld [vmem:[#allocation20_spill] sm:$0xff] }
 0x12e   :  { %v7503_v0 = vld [vmem:[#allocation24_spill] sm:$0xff] }
 0x12f   :  { %v6367_v14 = vadd.f32 %v484_v60, %v483_v40  ;;  %v7500_v60 = vld [vmem:[#allocation21_spill] sm:$0xff]  ;;  %v7501_v40 = vld [vmem:[#allocation22_spill] sm:$0xff] }
 0x131   :  { %5069 = vtanh.f32 %v6367_v14 }
 0x13b   :  { %v5070_v20 = vpop.eup %5069 }
 0x13c   :  { %v487_v9 = vmul.f32 %v5070_v20, %v482_v42  ;;  %v7504_v42 = vld [vmem:[#allocation25_spill] sm:$0xff]  ;;  %v7505_v20 = vld [vmem:[#allocation26_spill] sm:$0xff] }
 0x13e   :  { %702 = vmatmul.mubr.f32.vlgmr.msra.gmra.mrb[4].mxu0 %v487_v9  ;;  %773 = vmatmul.mubr.f32.vlgmr.msra.gmra.mrb[4].mxu1 %v487_v9 }
 0x13f   :  { %3693 = vmatpush1.bf16.msra.mxu0 %v5506_v49  ;;  %3725 = vmatpush1.bf16.msra.mxu1 %v5509_v50 }
 0x140   :  { %3695 = vmatprep.subr.bf16.mxu0 %v5511_v51  ;;  %3727 = vmatprep.subr.bf16.mxu1 %v5523_v55 }
 0x141   :  { %862 = vmatprep.mubr.f32.mxu0 %v7490_v3  ;;  %933 = vmatprep.mubr.f32.mxu1 %v7490_v3 }
 0x143   :  { %3697 = vmatpush1.bf16.msra.mxu0 %v5541_v61  ;;  %3729 = vmatpush1.bf16.msra.mxu1 %v5545_v62 }
 0x144   :  { %3699 = vmatprep.subr.bf16.mxu0 %v5547_v63  ;;  %3731 = vmatprep.subr.bf16.mxu1 %v5559_v4 }
 0x147   :  { %3701 = vmatpush1.bf16.msra.mxu0 %v5579_v10  ;;  %3733 = vmatpush1.bf16.msra.mxu1 %v5583_v11 }
 0x148   :  { %3703 = vmatprep.subr.bf16.mxu0 %v5585_v12  ;;  %3735 = vmatprep.subr.bf16.mxu1 %v5597_v16 }
 0x14b   :  { %3705 = vmatpush1.bf16.msra.mxu0 %v5615_v22  ;;  %3737 = vmatpush1.bf16.msra.mxu1 %v5619_v23 }
 0x14c   :  { %3707 = vmatprep.subr.bf16.mxu0 %v5621_v24  ;;  %3739 = vmatprep.subr.bf16.mxu1 %v5633_v28 }
 0x14f   :  { %3709 = vmatpush1.bf16.msra.mxu0 %v5651_v34  ;;  %3741 = vmatpush1.bf16.msra.mxu1 %v5655_v35 }
 0x150   :  { %3711 = vmatprep.subr.bf16.mxu0 %v5657_v36  ;;  %3743 = vmatprep.subr.bf16.mxu1 %v5669_v41 }
 0x153   :  { %3713 = vmatpush1.bf16.msra.mxu0 %v5687_v48  ;;  %3745 = vmatpush1.bf16.msra.mxu1 %v5691_v52 }
 0x154   :  { %3715 = vmatprep.subr.bf16.mxu0 %v5693_v53  ;;  %3747 = vmatprep.subr.bf16.mxu1 %v5705_v58 }
 0x157   :  { %3717 = vmatpush1.bf16.msra.mxu0 %v5723_v5  ;;  %3749 = vmatpush1.bf16.msra.mxu1 %v5727_v6 }
 0x158   :  { %3719 = vmatprep.subr.bf16.mxu0 %v5729_v7  ;;  %3751 = vmatprep.subr.bf16.mxu1 %v5738_v13 }
 0x15b   :  { %3721 = vmatpush1.bf16.msra.mxu0 %v5747_v17  ;;  %3753 = vmatpush1.bf16.msra.mxu1 %v5751_v18 }
 0x15c   :  { %3755 = vmatprep.subr.bf16.mxu0 %v5769_v25  ;;  %3819 = vmatprep.subr.bf16.mxu1 %v5780_v30 }
 0x15e   :  { %863 = vmatmul.mubr.f32.vlgmr.msra.gmra.mrb[6].mxu0 %v487_v9  ;;  %934 = vmatmul.mubr.f32.vlgmr.msra.gmra.mrb[6].mxu1 %v487_v9  ;;  %v7506_v9 = vld [vmem:[#allocation27_spill] sm:$0xff] }
 0x15f   :  { %3757 = vmatpush1.bf16.msra.mxu0 %v5782_v31  ;;  %3821 = vmatpush1.bf16.msra.mxu1 %v5794_v39 }
 0x160   :  { %3759 = vmatprep.subr.bf16.mxu0 %v5807_v45  ;;  %3823 = vmatprep.subr.bf16.mxu1 %v5809_v46 }
 0x163   :  { %3761 = vmatpush1.bf16.msra.mxu0 %v5821_v57  ;;  %3825 = vmatpush1.bf16.msra.mxu1 %v5834_v1 }
 0x164   :  { %3763 = vmatprep.subr.bf16.mxu0 %v5836_v2  ;;  %3827 = vmatprep.subr.bf16.mxu1 %v5847_v15 }
 0x167   :  { %3765 = vmatpush1.bf16.msra.mxu0 %v5859_v26  ;;  %3829 = vmatpush1.bf16.msra.mxu1 %v5872_v33 }
 0x168   :  { %3767 = vmatprep.subr.bf16.mxu0 %v5874_v37  ;;  %3831 = vmatprep.subr.bf16.mxu1 %v7491_v54 }
 0x16b   :  { %3769 = vmatpush1.bf16.msra.mxu0 %v7492_v27  ;;  %3833 = vmatpush1.bf16.msra.mxu1 %v7493_v38 }
 0x16c   :  { %3771 = vmatprep.subr.bf16.mxu0 %v7494_v21  ;;  %3835 = vmatprep.subr.bf16.mxu1 %v7495_v44 }
 0x16f   :  { %3773 = vmatpush1.bf16.msra.mxu0 %v7496_v56  ;;  %3837 = vmatpush1.bf16.msra.mxu1 %v7497_v8  ;;  %v7508_v8 = vld [vmem:[#allocation29_spill] sm:$0xff] }
 0x170   :  { %3775 = vmatprep.subr.bf16.mxu0 %v7498_v29  ;;  %3839 = vmatprep.subr.bf16.mxu1 %v7499_v43  ;;  %v7509_v29 = vld [vmem:[#allocation30_spill] sm:$0xff]  ;;  %v7510_v43 = vld [vmem:[#allocation31_spill] sm:$0xff] }
 0x173   :  { %3777 = vmatpush1.bf16.msra.mxu0 %v7500_v60  ;;  %3841 = vmatpush1.bf16.msra.mxu1 %v7501_v40  ;;  %v7511_v60 = vld [vmem:[#allocation32_spill] sm:$0xff]  ;;  %v7512_v40 = vld [vmem:[#allocation33_spill] sm:$0xff] }
 0x174   :  { %3779 = vmatprep.subr.bf16.mxu0 %v7502_v59  ;;  %3843 = vmatprep.subr.bf16.mxu1 %v7503_v0  ;;  %v7513_v59 = vld [vmem:[#allocation34_spill] sm:$0xff]  ;;  %v7514_v0 = vld [vmem:[#allocation35_spill] sm:$0xff] }
 0x177   :  { %3781 = vmatpush1.bf16.msra.mxu0 %v7504_v42  ;;  %3845 = vmatpush1.bf16.msra.mxu1 %v7505_v20  ;;  %v7515_v42 = vld [vmem:[#allocation36_spill] sm:$0xff]  ;;  %v7516_v20 = vld [vmem:[#allocation37_spill] sm:$0xff] }
 0x178   :  { %3783 = vmatprep.subr.bf16.mxu0 %v7506_v9  ;;  %3847 = vmatprep.subr.bf16.mxu1 %v7507_v19  ;;  %v7517_v9 = vld [vmem:[#allocation38_spill] sm:$0xff]  ;;  %v7518_v19 = vld [vmem:[#allocation39_spill] sm:$0xff] }
 0x17b   :  { %3785 = vmatpush1.bf16.msra.mxu0 %v7508_v8  ;;  %3849 = vmatpush1.bf16.msra.mxu1 %v7509_v29  ;;  %v7519_v8 = vld [vmem:[#allocation40_spill] sm:$0xff]  ;;  %v7520_v29 = vld [vmem:[#allocation41_spill] sm:$0xff] }
 0x17c   :  { %3787 = vmatprep.subr.bf16.mxu0 %v7510_v43  ;;  %3851 = vmatprep.subr.bf16.mxu1 %v7511_v60  ;;  %v7521_v43 = vld [vmem:[#allocation42_spill] sm:$0xff]  ;;  %v7522_v60 = vld [vmem:[#allocation43_spill] sm:$0xff] }
 0x17f   :  { %3789 = vmatpush1.bf16.msra.mxu0 %v7512_v40  ;;  %3853 = vmatpush1.bf16.msra.mxu1 %v7513_v59  ;;  %v7523_v40 = vld [vmem:[#allocation44_spill] sm:$0xff]  ;;  %v7524_v59 = vld [vmem:[#allocation45_spill] sm:$0xff] }
 0x180   :  { %3791 = vmatprep.subr.bf16.mxu0 %v7514_v0  ;;  %3855 = vmatprep.subr.bf16.mxu1 %v7515_v42  ;;  %v7525_v0 = vld [vmem:[#allocation46_spill] sm:$0xff]  ;;  %v7526_v42 = vld [vmem:[#allocation47_spill] sm:$0xff] }
 0x183   :  { %3793 = vmatpush1.bf16.msra.mxu0 %v7516_v20  ;;  %3857 = vmatpush1.bf16.msra.mxu1 %v7517_v9  ;;  %v7527_v20 = vld [vmem:[#allocation48_spill] sm:$0xff]  ;;  %v7528_v9 = vld [vmem:[#allocation49_spill] sm:$0xff] }
 0x184   :  { %3795 = vmatprep.subr.bf16.mxu0 %v7518_v19  ;;  %3859 = vmatprep.subr.bf16.mxu1 %v7519_v8  ;;  %v7529_v19 = vld [vmem:[#allocation50_spill] sm:$0xff]  ;;  %v7530_v8 = vld [vmem:[#allocation51_spill] sm:$0xff] }
 0x187   :  { %3797 = vmatpush1.bf16.msra.mxu0 %v7520_v29  ;;  %3861 = vmatpush1.bf16.msra.mxu1 %v7521_v43  ;;  %v7531_v29 = vld [vmem:[#allocation52_spill] sm:$0xff]  ;;  %v7532_v43 = vld [vmem:[#allocation53_spill] sm:$0xff] }
 0x188   :  { %3799 = vmatprep.subr.bf16.mxu0 %v7522_v60  ;;  %3863 = vmatprep.subr.bf16.mxu1 %v7523_v40  ;;  %v7533_v60 = vld [vmem:[#allocation54_spill] sm:$0xff]  ;;  %v7534_v40 = vld [vmem:[#allocation55_spill] sm:$0xff] }
 0x18b   :  { %3801 = vmatpush1.bf16.msra.mxu0 %v7524_v59  ;;  %3865 = vmatpush1.bf16.msra.mxu1 %v7525_v0  ;;  %v7535_v59 = vld [vmem:[#allocation56_spill] sm:$0xff]  ;;  %v7536_v0 = vld [vmem:[#allocation57_spill] sm:$0xff] }
 0x18c   :  { %3803 = vmatprep.subr.bf16.mxu0 %v7526_v42  ;;  %3867 = vmatprep.subr.bf16.mxu1 %v7527_v20  ;;  %v7537_v42 = vld [vmem:[#allocation58_spill] sm:$0xff]  ;;  %v7538_v20 = vld [vmem:[#allocation59_spill] sm:$0xff] }
 0x18f   :  { %3805 = vmatpush1.bf16.msra.mxu0 %v7528_v9  ;;  %3869 = vmatpush1.bf16.msra.mxu1 %v7529_v19  ;;  %v7539_v9 = vld [vmem:[#allocation60_spill] sm:$0xff]  ;;  %v7540_v19 = vld [vmem:[#allocation61_spill] sm:$0xff] }
 0x190   :  { %3807 = vmatprep.subr.bf16.mxu0 %v7530_v8  ;;  %3871 = vmatprep.subr.bf16.mxu1 %v7531_v29  ;;  %v7541_v8 = vld [vmem:[#allocation62_spill] sm:$0xff] }
 0x191   :  { %v7542_v29 = vld [vmem:[#allocation2_spill] sm:$0xff] }
 0x193   :  { %3809 = vmatpush1.bf16.msra.mxu0 %v7532_v43  ;;  %3873 = vmatpush1.bf16.msra.mxu1 %v7533_v60  ;;  %v7543_v43 = vld [vmem:[#allocation3_spill] sm:$0xff] }
 0x194   :  { %3811 = vmatprep.subr.bf16.mxu0 %v7534_v40  ;;  %3875 = vmatprep.subr.bf16.mxu1 %v7535_v59  ;;  %v30_v59 = vld [vmem:[%s7271_s5] sm:$0xf]  ;;  %v7544_v40 = vld [vmem:[#allocation63_spill] sm:$0xff] }
 0x197   :  { %3813 = vmatpush1.bf16.msra.mxu0 %v7536_v0  ;;  %3877 = vmatpush1.bf16.msra.mxu1 %v7537_v42  ;;  %v7545_v0 = vsub.s32 0, %v7544_v40 }
 0x198   :  { %3815 = vmatprep.subr.bf16.mxu0 %v7538_v20  ;;  %3879 = vmatprep.subr.bf16.mxu1 %v7539_v9  ;;  %v7547_v20 = vsub.s32 1, %v7544_v40 }
 0x199   :  { %v6473_v60 = vrot.slane %v30_v59, %v7545_v0  ;;  %v7551_v0 = vsub.s32 3, %v7544_v40 }
 0x19a   :  { %v6477_v42 = vrot.slane %v30_v59, %v7547_v20 }
 0x19b   :  { %3817 = vmatpush1.bf16.msra.mxu0 %v7540_v19  ;;  %3881 = vmatpush1.bf16.msra.mxu1 %v7541_v8  ;;  %7546 = vst [vmem:[#allocation63_spill] sm:$0xff] %v6473_v60  ;;  %v7549_v8 = vsub.s32 2, %v7544_v40  ;;  %v6487_v54 = vrot.slane %v30_v59, %v7551_v0 }
 0x19c   :  { %3883 = vmatprep.subr.bf16.mxu0 %v7542_v29  ;;  %3915 = vmatprep.subr.bf16.mxu1 %v7543_v43  ;;  %7548 = vst [vmem:[#allocation67_spill] sm:$0xff] %v6477_v42 }
 0x19d   :  { %v6481_v56 = vrot.slane %v30_v59, %v7549_v8  ;;  %7552 = vst [vmem:[#allocation69_spill] sm:$0xff] %v6487_v54 }
 0x19f   :  { %7550 = vst [vmem:[#allocation68_spill] sm:$0xff] %v6481_v56 }
 0x211   :  { %v703_v9 = vpop.f32.mrb[4].mxu0  ;;  %v774_v19 = vpop.f32.mrb[4].mxu1 }
 0x212   :  { %v704_v43 = vadd.f32 %v703_v9, %v6473_v60  ;;  %v705_v29 = vpop.f32.mrb[5].mxu0  ;;  %v776_v44 = vpop.f32.mrb[5].mxu1  ;;  %v775_v20 = vadd.f32 %v774_v19, %v6481_v56 }
 0x213   :  { %v706_v21 = vadd.f32 %v705_v29, %v6477_v42  ;;  %v777_v8 = vadd.f32 %v776_v44, %v6487_v54 }
 0x214   :  { %v779_v38 = vmul.f32 0.5, %v704_v43 }
 0x215   :  { %v780_v27 = vmul.f32 0.5, %v706_v21  ;;  %v781_v37 = vmul.f32 0.5, %v777_v8 }
 0x216   :  { %5071 = vtanh.f32 %v779_v38 }
 0x217   :  { %5073 = vtanh.f32 %v780_v27 }
 0x218   :  { %5075 = vtanh.f32 %v775_v20 }
 0x219   :  { %5077 = vtanh.f32 %v781_v37 }
 0x220   :  { %v5072_v33 = vpop.eup %5071 }
 0x221   :  { %v5074_v9 = vpop.eup %5073  ;;  %v786_v60 = vmul.f32 0.5, %v5072_v33 }
 0x222   :  { %v787_v26 = vmul.f32 0.5, %v5074_v9  ;;  %v5076_v43 = vpop.eup %5075 }
 0x223   :  { %v789_v29 = vadd.f32 0.5, %v786_v60  ;;  %v5078_v19 = vpop.eup %5077  ;;  %v7553_v60 = vld [vmem:[#allocation64_spill] sm:$0xff] }
 0x224   :  { %v790_v21 = vadd.f32 0.5, %v787_v26  ;;  %v788_v27 = vmul.f32 0.5, %v5078_v19  ;;  %v7554_v26 = vld [vmem:[#allocation65_spill] sm:$0xff] }
 0x225   :  { %v794_v42 = vmul.f32 %v5076_v43, %v789_v29 }
 0x226   :  { %v793_v40 = vmul.f32 0.0, %v790_v21  ;;  %v792_v33 = vadd.f32 0.5, %v788_v27 }
 0x228   :  { %v6491_v59 = vadd.f32 %v794_v42, %v793_v40 }
 0x22a   :  { %5079 = vtanh.f32 %v6491_v59 }
 0x231   :  { %v864_v38 = vpop.f32.mrb[6].mxu0  ;;  %v935_v0 = vpop.f32.mrb[6].mxu1 }
 0x232   :  { %v944_v44 = vrot.slane %v864_v38, 7  ;;  %v946_v20 = vrot.slane %v935_v0, 7  ;;  %v866_v8 = vpop.f32.mrb[7].mxu0  ;;  %v937_v54 = vpop.f32.mrb[7].mxu1 }
 0x233   :  { %v945_v9 = vrot.slane %v866_v8, 7  ;;  %v947_v40 = vrot.slane %v937_v54, 7 }
 0x234   :  { %v5080_v37 = vpop.eup %5079  ;;  %v952_v56 = vadd.f32 %v944_v44, %v7553_v60  ;;  %v954_v21 = vadd.f32 %v946_v20, %v6359_v47 }
 0x235   :  { %v953_v29 = vadd.f32 %v945_v9, %v7554_v26  ;;  %v6496_v43 = vmul.f32 %v5080_v37, %v792_v33  ;;  %v955_v8 = vadd.f32 %v947_v40, %v6364_v32 }
 0x236   :  { %v960_v42 = vrot.slane %v952_v56, 1  ;;  %v962_v27 = vrot.slane %v954_v21, 1 }
 0x237   :  { %7555 = vst [vmem:[#allocation64_spill] sm:$0xff] %v6496_v43  ;;  %v961_v19 = vrot.slane %v953_v29, 1  ;;  %1051 = vmatprep.mubr.f32.mxu0 %v6496_v43  ;;  %1122 = vmatprep.mubr.f32.mxu1 %v6496_v43  ;;  %v963_v44 = vrot.slane %v955_v8, 1  ;;  %v7559_v8 = vld [vmem:[#allocation12_spill] sm:$0xff]  ;;  %v7574_v43 = vld [vmem:[#allocation27_spill] sm:$0xff] }
 0x238   :  { %v968_v38 = vmul.f32 0.5, %v960_v42 }
 0x239   :  { %v969_v0 = vmul.f32 0.5, %v961_v19  ;;  %v970_v33 = vmul.f32 0.5, %v963_v44  ;;  %v7560_v44 = vld [vmem:[#allocation13_spill] sm:$0xff] }
 0x23a   :  { %5081 = vtanh.f32 %v968_v38 }
 0x23b   :  { %5083 = vtanh.f32 %v969_v0 }
 0x23c   :  { %5085 = vtanh.f32 %v962_v27 }
 0x23d   :  { %5087 = vtanh.f32 %v970_v33  ;;  %v7561_v33 = vld [vmem:[#allocation14_spill] sm:$0xff] }
 0x244   :  { %v5082_v9 = vpop.eup %5081 }
 0x245   :  { %v5084_v56 = vpop.eup %5083  ;;  %v975_v37 = vmul.f32 0.5, %v5082_v9  ;;  %v7562_v9 = vld [vmem:[#allocation15_spill] sm:$0xff] }
 0x246   :  { %v976_v20 = vmul.f32 0.5, %v5084_v56  ;;  %v5086_v29 = vpop.eup %5085  ;;  %v7563_v56 = vld [vmem:[#allocation16_spill] sm:$0xff] }
 0x247   :  { %v978_v54 = vadd.f32 0.5, %v975_v37  ;;  %v5088_v21 = vpop.eup %5087  ;;  %v7564_v37 = vld [vmem:[#allocation17_spill] sm:$0xff] }
 0x248   :  { %v979_v47 = vadd.f32 0.5, %v976_v20  ;;  %v977_v40 = vmul.f32 0.5, %v5088_v21  ;;  %v7565_v20 = vld [vmem:[#allocation18_spill] sm:$0xff] }
 0x249   :  { %v983_v26 = vmul.f32 %v5086_v29, %v978_v54  ;;  %v7566_v54 = vld [vmem:[#allocation19_spill] sm:$0xff]  ;;  %v7567_v29 = vld [vmem:[#allocation20_spill] sm:$0xff]  ;;  %v7569_v21 = vld [vmem:[#allocation22_spill] sm:$0xff] }
 0x24a   :  { %v982_v42 = vmul.f32 %v979_v47, %v6367_v14  ;;  %v981_v38 = vadd.f32 0.5, %v977_v40  ;;  %v7556_v47 = vld [vmem:[#allocation9_spill] sm:$0xff]  ;;  %v7557_v14 = vld [vmem:[#allocation10_spill] sm:$0xff]  ;;  %v7570_v40 = vld [vmem:[#allocation23_spill] sm:$0xff] }
 0x24c   :  { %v6503_v19 = vadd.f32 %v983_v26, %v982_v42  ;;  %v7558_v26 = vld [vmem:[#allocation11_spill] sm:$0xff]  ;;  %v7568_v42 = vld [vmem:[#allocation21_spill] sm:$0xff] }
 0x24e   :  { %5089 = vtanh.f32 %v6503_v19 }
 0x258   :  { %v5090_v0 = vpop.eup %5089 }
 0x259   :  { %v986_v27 = vmul.f32 %v5090_v0, %v981_v38  ;;  %v7571_v38 = vld [vmem:[#allocation24_spill] sm:$0xff]  ;;  %v7572_v0 = vld [vmem:[#allocation25_spill] sm:$0xff] }
 0x25b   :  { %1052 = vmatmul.mubr.f32.vlgmr.msra.gmra.mrb[8].mxu0 %v986_v27  ;;  %1123 = vmatmul.mubr.f32.vlgmr.msra.gmra.mrb[8].mxu1 %v986_v27 }
 0x25c   :  { %3885 = vmatpush1.bf16.msra.mxu0 %v5506_v49  ;;  %3917 = vmatpush1.bf16.msra.mxu1 %v5509_v50 }
 0x25d   :  { %3887 = vmatprep.subr.bf16.mxu0 %v5511_v51  ;;  %3919 = vmatprep.subr.bf16.mxu1 %v5523_v55 }
 0x25e   :  { %1212 = vmatprep.mubr.f32.mxu0 %v7490_v3  ;;  %1283 = vmatprep.mubr.f32.mxu1 %v7490_v3 }
 0x260   :  { %3889 = vmatpush1.bf16.msra.mxu0 %v5541_v61  ;;  %3921 = vmatpush1.bf16.msra.mxu1 %v5545_v62 }
 0x261   :  { %3891 = vmatprep.subr.bf16.mxu0 %v5547_v63  ;;  %3923 = vmatprep.subr.bf16.mxu1 %v5559_v4 }
 0x264   :  { %3893 = vmatpush1.bf16.msra.mxu0 %v5579_v10  ;;  %3925 = vmatpush1.bf16.msra.mxu1 %v5583_v11 }
 0x265   :  { %3895 = vmatprep.subr.bf16.mxu0 %v5585_v12  ;;  %3927 = vmatprep.subr.bf16.mxu1 %v5597_v16 }
 0x268   :  { %3897 = vmatpush1.bf16.msra.mxu0 %v5615_v22  ;;  %3929 = vmatpush1.bf16.msra.mxu1 %v5619_v23 }
 0x269   :  { %3899 = vmatprep.subr.bf16.mxu0 %v5621_v24  ;;  %3931 = vmatprep.subr.bf16.mxu1 %v5633_v28 }
 0x26c   :  { %3901 = vmatpush1.bf16.msra.mxu0 %v5651_v34  ;;  %3933 = vmatpush1.bf16.msra.mxu1 %v5655_v35 }
 0x26d   :  { %3903 = vmatprep.subr.bf16.mxu0 %v5657_v36  ;;  %3935 = vmatprep.subr.bf16.mxu1 %v5669_v41 }
 0x270   :  { %3905 = vmatpush1.bf16.msra.mxu0 %v5687_v48  ;;  %3937 = vmatpush1.bf16.msra.mxu1 %v5691_v52 }
 0x271   :  { %3907 = vmatprep.subr.bf16.mxu0 %v5693_v53  ;;  %3939 = vmatprep.subr.bf16.mxu1 %v5705_v58 }
 0x274   :  { %3909 = vmatpush1.bf16.msra.mxu0 %v5723_v5  ;;  %3941 = vmatpush1.bf16.msra.mxu1 %v5727_v6 }
 0x275   :  { %3911 = vmatprep.subr.bf16.mxu0 %v5729_v7  ;;  %3943 = vmatprep.subr.bf16.mxu1 %v5738_v13 }
 0x278   :  { %3913 = vmatpush1.bf16.msra.mxu0 %v5747_v17  ;;  %3945 = vmatpush1.bf16.msra.mxu1 %v5751_v18 }
 0x279   :  { %3947 = vmatprep.subr.bf16.mxu0 %v5769_v25  ;;  %4011 = vmatprep.subr.bf16.mxu1 %v5780_v30 }
 0x27b   :  { %1213 = vmatmul.mubr.f32.vlgmr.msra.gmra.mrb[10].mxu0 %v986_v27  ;;  %1284 = vmatmul.mubr.f32.vlgmr.msra.gmra.mrb[10].mxu1 %v986_v27  ;;  %v7573_v27 = vld [vmem:[#allocation26_spill] sm:$0xff] }
 0x27c   :  { %3949 = vmatpush1.bf16.msra.mxu0 %v5782_v31  ;;  %4013 = vmatpush1.bf16.msra.mxu1 %v5794_v39 }
 0x27d   :  { %3951 = vmatprep.subr.bf16.mxu0 %v5807_v45  ;;  %4015 = vmatprep.subr.bf16.mxu1 %v5809_v46 }
 0x280   :  { %3953 = vmatpush1.bf16.msra.mxu0 %v5821_v57  ;;  %4017 = vmatpush1.bf16.msra.mxu1 %v5834_v1 }
 0x281   :  { %3955 = vmatprep.subr.bf16.mxu0 %v5836_v2  ;;  %4019 = vmatprep.subr.bf16.mxu1 %v5847_v15 }
 0x284   :  { %3957 = vmatpush1.bf16.msra.mxu0 %v7556_v47  ;;  %4021 = vmatpush1.bf16.msra.mxu1 %v7557_v14 }
 0x285   :  { %3959 = vmatprep.subr.bf16.mxu0 %v7558_v26  ;;  %4023 = vmatprep.subr.bf16.mxu1 %v7559_v8 }
 0x288   :  { %3961 = vmatpush1.bf16.msra.mxu0 %v7560_v44  ;;  %4025 = vmatpush1.bf16.msra.mxu1 %v7561_v33  ;;  %v7613_v33 = vld [vmem:[#allocation67_spill] sm:$0xff] }
 0x289   :  { %3963 = vmatprep.subr.bf16.mxu0 %v7562_v9  ;;  %4027 = vmatprep.subr.bf16.mxu1 %v7563_v56  ;;  %v7612_v56 = vld [vmem:[#allocation63_spill] sm:$0xff] }
 0x28c   :  { %3965 = vmatpush1.bf16.msra.mxu0 %v7564_v37  ;;  %4029 = vmatpush1.bf16.msra.mxu1 %v7565_v20  ;;  %v7575_v37 = vld [vmem:[#allocation28_spill] sm:$0xff]  ;;  %v7576_v20 = vld [vmem:[#allocation29_spill] sm:$0xff] }
 0x28d   :  { %3967 = vmatprep.subr.bf16.mxu0 %v7566_v54  ;;  %4031 = vmatprep.subr.bf16.mxu1 %v7567_v29  ;;  %v7577_v54 = vld [vmem:[#allocation30_spill] sm:$0xff]  ;;  %v7578_v29 = vld [vmem:[#allocation31_spill] sm:$0xff] }
 0x290   :  { %3969 = vmatpush1.bf16.msra.mxu0 %v7568_v42  ;;  %4033 = vmatpush1.bf16.msra.mxu1 %v7569_v21  ;;  %v7579_v42 = vld [vmem:[#allocation32_spill] sm:$0xff]  ;;  %v7580_v21 = vld [vmem:[#allocation33_spill] sm:$0xff] }
 0x291   :  { %3971 = vmatprep.subr.bf16.mxu0 %v7570_v40  ;;  %4035 = vmatprep.subr.bf16.mxu1 %v7571_v38  ;;  %v7581_v40 = vld [vmem:[#allocation34_spill] sm:$0xff]  ;;  %v7582_v38 = vld [vmem:[#allocation35_spill] sm:$0xff] }
 0x294   :  { %3973 = vmatpush1.bf16.msra.mxu0 %v7572_v0  ;;  %4037 = vmatpush1.bf16.msra.mxu1 %v7573_v27  ;;  %v7583_v0 = vld [vmem:[#allocation36_spill] sm:$0xff]  ;;  %v7584_v27 = vld [vmem:[#allocation37_spill] sm:$0xff] }
 0x295   :  { %3975 = vmatprep.subr.bf16.mxu0 %v7574_v43  ;;  %4039 = vmatprep.subr.bf16.mxu1 %v7575_v37  ;;  %v7585_v43 = vld [vmem:[#allocation38_spill] sm:$0xff]  ;;  %v7586_v37 = vld [vmem:[#allocation39_spill] sm:$0xff] }
 0x298   :  { %3977 = vmatpush1.bf16.msra.mxu0 %v7576_v20  ;;  %4041 = vmatpush1.bf16.msra.mxu1 %v7577_v54  ;;  %v7587_v20 = vld [vmem:[#allocation40_spill] sm:$0xff]  ;;  %v7588_v54 = vld [vmem:[#allocation41_spill] sm:$0xff] }
 0x299   :  { %3979 = vmatprep.subr.bf16.mxu0 %v7578_v29  ;;  %4043 = vmatprep.subr.bf16.mxu1 %v7579_v42  ;;  %v7589_v29 = vld [vmem:[#allocation42_spill] sm:$0xff]  ;;  %v7590_v42 = vld [vmem:[#allocation43_spill] sm:$0xff] }
 0x29c   :  { %3981 = vmatpush1.bf16.msra.mxu0 %v7580_v21  ;;  %4045 = vmatpush1.bf16.msra.mxu1 %v7581_v40  ;;  %v7591_v21 = vld [vmem:[#allocation44_spill] sm:$0xff]  ;;  %v7592_v40 = vld [vmem:[#allocation45_spill] sm:$0xff] }
 0x29d   :  { %3983 = vmatprep.subr.bf16.mxu0 %v7582_v38  ;;  %4047 = vmatprep.subr.bf16.mxu1 %v7583_v0  ;;  %v7593_v38 = vld [vmem:[#allocation46_spill] sm:$0xff]  ;;  %v7594_v0 = vld [vmem:[#allocation47_spill] sm:$0xff] }
 0x2a0   :  { %3985 = vmatpush1.bf16.msra.mxu0 %v7584_v27  ;;  %4049 = vmatpush1.bf16.msra.mxu1 %v7585_v43  ;;  %v7595_v27 = vld [vmem:[#allocation48_spill] sm:$0xff]  ;;  %v7596_v43 = vld [vmem:[#allocation49_spill] sm:$0xff] }
 0x2a1   :  { %3987 = vmatprep.subr.bf16.mxu0 %v7586_v37  ;;  %4051 = vmatprep.subr.bf16.mxu1 %v7587_v20  ;;  %v7597_v37 = vld [vmem:[#allocation50_spill] sm:$0xff]  ;;  %v7598_v20 = vld [vmem:[#allocation51_spill] sm:$0xff] }
 0x2a4   :  { %3989 = vmatpush1.bf16.msra.mxu0 %v7588_v54  ;;  %4053 = vmatpush1.bf16.msra.mxu1 %v7589_v29  ;;  %v7599_v54 = vld [vmem:[#allocation52_spill] sm:$0xff]  ;;  %v7600_v29 = vld [vmem:[#allocation53_spill] sm:$0xff] }
 0x2a5   :  { %3991 = vmatprep.subr.bf16.mxu0 %v7590_v42  ;;  %4055 = vmatprep.subr.bf16.mxu1 %v7591_v21  ;;  %v7601_v42 = vld [vmem:[#allocation54_spill] sm:$0xff]  ;;  %v7602_v21 = vld [vmem:[#allocation55_spill] sm:$0xff] }
 0x2a8   :  { %3993 = vmatpush1.bf16.msra.mxu0 %v7592_v40  ;;  %4057 = vmatpush1.bf16.msra.mxu1 %v7593_v38  ;;  %v7603_v40 = vld [vmem:[#allocation56_spill] sm:$0xff]  ;;  %v7604_v38 = vld [vmem:[#allocation57_spill] sm:$0xff] }
 0x2a9   :  { %3995 = vmatprep.subr.bf16.mxu0 %v7594_v0  ;;  %4059 = vmatprep.subr.bf16.mxu1 %v7595_v27  ;;  %v7605_v0 = vld [vmem:[#allocation58_spill] sm:$0xff]  ;;  %v7606_v27 = vld [vmem:[#allocation59_spill] sm:$0xff] }
 0x2ac   :  { %3997 = vmatpush1.bf16.msra.mxu0 %v7596_v43  ;;  %4061 = vmatpush1.bf16.msra.mxu1 %v7597_v37  ;;  %v7607_v43 = vld [vmem:[#allocation60_spill] sm:$0xff]  ;;  %v7608_v37 = vld [vmem:[#allocation61_spill] sm:$0xff] }
 0x2ad   :  { %3999 = vmatprep.subr.bf16.mxu0 %v7598_v20  ;;  %4063 = vmatprep.subr.bf16.mxu1 %v7599_v54  ;;  %v7609_v20 = vld [vmem:[#allocation62_spill] sm:$0xff] }
 0x2ae   :  { %v7610_v54 = vld [vmem:[#allocation2_spill] sm:$0xff] }
 0x2b0   :  { %4001 = vmatpush1.bf16.msra.mxu0 %v7600_v29  ;;  %4065 = vmatpush1.bf16.msra.mxu1 %v7601_v42  ;;  %v7611_v29 = vld [vmem:[#allocation3_spill] sm:$0xff] }
 0x2b1   :  { %4003 = vmatprep.subr.bf16.mxu0 %v7602_v21  ;;  %4067 = vmatprep.subr.bf16.mxu1 %v7603_v40 }
 0x2b4   :  { %4005 = vmatpush1.bf16.msra.mxu0 %v7604_v38  ;;  %4069 = vmatpush1.bf16.msra.mxu1 %v7605_v0 }
 0x2b5   :  { %4007 = vmatprep.subr.bf16.mxu0 %v7606_v27  ;;  %4071 = vmatprep.subr.bf16.mxu1 %v7607_v43  ;;  %v7614_v43 = vld [vmem:[#allocation68_spill] sm:$0xff] }
 0x2b8   :  { %4009 = vmatpush1.bf16.msra.mxu0 %v7608_v37  ;;  %4073 = vmatpush1.bf16.msra.mxu1 %v7609_v20  ;;  %v7615_v20 = vld [vmem:[#allocation69_spill] sm:$0xff] }
 0x2b9   :  { %4075 = vmatprep.subr.bf16.mxu0 %v7610_v54  ;;  %4107 = vmatprep.subr.bf16.mxu1 %v7611_v29 }
 0x32e   :  { %v1053_v42 = vpop.f32.mrb[8].mxu0  ;;  %v1124_v21 = vpop.f32.mrb[8].mxu1 }
 0x32f   :  { %v1054_v40 = vadd.f32 %v1053_v42, %v7612_v56  ;;  %v1055_v9 = vpop.f32.mrb[9].mxu0  ;;  %v1126_v38 = vpop.f32.mrb[9].mxu1  ;;  %v1125_v8 = vadd.f32 %v1124_v21, %v7614_v43 }
 0x330   :  { %v1056_v0 = vadd.f32 %v1055_v9, %v7613_v33  ;;  %v1127_v37 = vadd.f32 %v1126_v38, %v7615_v20 }
 0x331   :  { %v1129_v44 = vmul.f32 0.5, %v1054_v40 }
 0x332   :  { %v1130_v27 = vmul.f32 0.5, %v1056_v0  ;;  %v1131_v54 = vmul.f32 0.5, %v1127_v37 }
 0x333   :  { %5091 = vtanh.f32 %v1129_v44 }
 0x334   :  { %5093 = vtanh.f32 %v1130_v27 }
 0x335   :  { %5095 = vtanh.f32 %v1125_v8 }
 0x336   :  { %5097 = vtanh.f32 %v1131_v54 }
 0x33d   :  { %v5092_v26 = vpop.eup %5091 }
 0x33e   :  { %v5094_v29 = vpop.eup %5093  ;;  %v1136_v14 = vmul.f32 0.5, %v5092_v26 }
 0x33f   :  { %v1137_v47 = vmul.f32 0.5, %v5094_v29  ;;  %v5096_v56 = vpop.eup %5095 }
 0x340   :  { %v1139_v42 = vadd.f32 0.5, %v1136_v14  ;;  %v5098_v44 = vpop.eup %5097 }
 0x341   :  { %v1140_v15 = vadd.f32 0.5, %v1137_v47  ;;  %v1138_v8 = vmul.f32 0.5, %v5098_v44 }
 0x342   :  { %v1144_v2 = vmul.f32 %v5096_v56, %v1139_v42  ;;  %v7617_v56 = vld [vmem:[#allocation65_spill] sm:$0xff] }
 0x343   :  { %v1143_v9 = vmul.f32 %v1140_v15, %v6491_v59  ;;  %v1142_v29 = vadd.f32 0.5, %v1138_v8  ;;  %v7618_v59 = vld [vmem:[#allocation66_spill] sm:$0xff] }
 0x345   :  { %v6609_v40 = vadd.f32 %v1144_v2, %v1143_v9 }
 0x347   :  { %7616 = vst [vmem:[#allocation70_spill] sm:$0xff] %v6609_v40  ;;  %5099 = vtanh.f32 %v6609_v40 }
 0x34e   :  { %v1214_v21 = vpop.f32.mrb[10].mxu0  ;;  %v1285_v38 = vpop.f32.mrb[10].mxu1 }
 0x34f   :  { %v1294_v37 = vrot.slane %v1214_v21, 6  ;;  %v1296_v0 = vrot.slane %v1285_v38, 6  ;;  %v1216_v27 = vpop.f32.mrb[11].mxu0  ;;  %v1287_v26 = vpop.f32.mrb[11].mxu1 }
 0x350   :  { %v1295_v54 = vrot.slane %v1216_v27, 6  ;;  %v1297_v40 = vrot.slane %v1287_v26, 6 }
 0x351   :  { %v5100_v14 = vpop.eup %5099  ;;  %v1302_v47 = vadd.f32 %v1294_v37, %v7553_v60  ;;  %v1304_v9 = vadd.f32 %v1296_v0, %v7618_v59 }
 0x352   :  { %v1303_v42 = vadd.f32 %v1295_v54, %v7617_v56  ;;  %v6614_v15 = vmul.f32 %v5100_v14, %v1142_v29  ;;  %v1305_v27 = vadd.f32 %v1297_v40, %v6364_v32 }
 0x353   :  { %v1310_v2 = vrot.slane %v1302_v47, 2  ;;  %v1312_v8 = vrot.slane %v1304_v9, 2 }
 0x354   :  { %v1311_v44 = vrot.slane %v1303_v42, 2  ;;  %1401 = vmatprep.mubr.f32.mxu0 %v6614_v15  ;;  %1472 = vmatprep.mubr.f32.mxu1 %v6614_v15  ;;  %v1313_v37 = vrot.slane %v1305_v27, 2  ;;  %v7622_v27 = vld [vmem:[#allocation10_spill] sm:$0xff] }
 0x355   :  { %v1318_v21 = vmul.f32 0.5, %v1310_v2 }
 0x356   :  { %v1319_v38 = vmul.f32 0.5, %v1311_v44  ;;  %v1320_v29 = vmul.f32 0.5, %v1313_v37  ;;  %v7623_v37 = vld [vmem:[#allocation11_spill] sm:$0xff] }
 0x357   :  { %5101 = vtanh.f32 %v1318_v21 }
 0x358   :  { %5103 = vtanh.f32 %v1319_v38 }
 0x359   :  { %5105 = vtanh.f32 %v1312_v8 }
 0x35a   :  { %5107 = vtanh.f32 %v1320_v29  ;;  %v7624_v29 = vld [vmem:[#allocation12_spill] sm:$0xff] }
 0x361   :  { %v5102_v54 = vpop.eup %5101 }
 0x362   :  { %v5104_v14 = vpop.eup %5103  ;;  %v1325_v47 = vmul.f32 0.5, %v5102_v54  ;;  %v7625_v54 = vld [vmem:[#allocation13_spill] sm:$0xff] }
 0x363   :  { %v1326_v0 = vmul.f32 0.5, %v5104_v14  ;;  %v5106_v42 = vpop.eup %5105  ;;  %v7626_v14 = vld [vmem:[#allocation14_spill] sm:$0xff] }
 0x364   :  { %v1328_v26 = vadd.f32 0.5, %v1325_v47  ;;  %v5108_v40 = vpop.eup %5107  ;;  %v7627_v47 = vld [vmem:[#allocation15_spill] sm:$0xff] }
 0x365   :  { %v1329_v59 = vadd.f32 0.5, %v1326_v0  ;;  %v1327_v9 = vmul.f32 0.5, %v5108_v40  ;;  %v7628_v0 = vld [vmem:[#allocation16_spill] sm:$0xff] }
 0x366   :  { %v1333_v56 = vmul.f32 %v5106_v42, %v1328_v26  ;;  %v7629_v26 = vld [vmem:[#allocation17_spill] sm:$0xff]  ;;  %v7630_v42 = vld [vmem:[#allocation18_spill] sm:$0xff]  ;;  %v7632_v40 = vld [vmem:[#allocation20_spill] sm:$0xff] }
 0x367   :  { %v1332_v2 = vmul.f32 %v1329_v59, %v6503_v19  ;;  %v1331_v21 = vadd.f32 0.5, %v1327_v9  ;;  %v7619_v19 = vld [vmem:[#allocation7_spill] sm:$0xff]  ;;  %v7621_v59 = vld [vmem:[#allocation9_spill] sm:$0xff] }
 0x368   :  { %v7633_v9 = vld [vmem:[#allocation21_spill] sm:$0xff] }
 0x369   :  { %v6621_v44 = vadd.f32 %v1333_v56, %v1332_v2  ;;  %v7620_v56 = vld [vmem:[#allocation8_spill] sm:$0xff]  ;;  %v7631_v2 = vld [vmem:[#allocation19_spill] sm:$0xff] }
 0x36b   :  { %5109 = vtanh.f32 %v6621_v44 }
 0x375   :  { %v5110_v38 = vpop.eup %5109 }
 0x376   :  { %v1336_v8 = vmul.f32 %v5110_v38, %v1331_v21  ;;  %v7634_v21 = vld [vmem:[#allocation22_spill] sm:$0xff]  ;;  %v7635_v38 = vld [vmem:[#allocation23_spill] sm:$0xff] }
 0x378   :  { %1402 = vmatmul.mubr.f32.vlgmr.msra.gmra.mrb[12].mxu0 %v1336_v8  ;;  %1473 = vmatmul.mubr.f32.vlgmr.msra.gmra.mrb[12].mxu1 %v1336_v8 }
 0x379   :  { %4077 = vmatpush1.bf16.msra.mxu0 %v5506_v49  ;;  %4109 = vmatpush1.bf16.msra.mxu1 %v5509_v50 }
 0x37a   :  { %4079 = vmatprep.subr.bf16.mxu0 %v5511_v51  ;;  %4111 = vmatprep.subr.bf16.mxu1 %v5523_v55 }
 0x37b   :  { %1562 = vmatprep.mubr.f32.mxu0 %v7490_v3  ;;  %1633 = vmatprep.mubr.f32.mxu1 %v7490_v3 }
 0x37d   :  { %4081 = vmatpush1.bf16.msra.mxu0 %v5541_v61  ;;  %4113 = vmatpush1.bf16.msra.mxu1 %v5545_v62 }
 0x37e   :  { %4083 = vmatprep.subr.bf16.mxu0 %v5547_v63  ;;  %4115 = vmatprep.subr.bf16.mxu1 %v5559_v4 }
 0x381   :  { %4085 = vmatpush1.bf16.msra.mxu0 %v5579_v10  ;;  %4117 = vmatpush1.bf16.msra.mxu1 %v5583_v11 }
 0x382   :  { %4087 = vmatprep.subr.bf16.mxu0 %v5585_v12  ;;  %4119 = vmatprep.subr.bf16.mxu1 %v5597_v16 }
 0x385   :  { %4089 = vmatpush1.bf16.msra.mxu0 %v5615_v22  ;;  %4121 = vmatpush1.bf16.msra.mxu1 %v5619_v23 }
 0x386   :  { %4091 = vmatprep.subr.bf16.mxu0 %v5621_v24  ;;  %4123 = vmatprep.subr.bf16.mxu1 %v5633_v28 }
 0x389   :  { %4093 = vmatpush1.bf16.msra.mxu0 %v5651_v34  ;;  %4125 = vmatpush1.bf16.msra.mxu1 %v5655_v35 }
 0x38a   :  { %4095 = vmatprep.subr.bf16.mxu0 %v5657_v36  ;;  %4127 = vmatprep.subr.bf16.mxu1 %v5669_v41 }
 0x38d   :  { %4097 = vmatpush1.bf16.msra.mxu0 %v5687_v48  ;;  %4129 = vmatpush1.bf16.msra.mxu1 %v5691_v52 }
 0x38e   :  { %4099 = vmatprep.subr.bf16.mxu0 %v5693_v53  ;;  %4131 = vmatprep.subr.bf16.mxu1 %v5705_v58 }
 0x391   :  { %4101 = vmatpush1.bf16.msra.mxu0 %v5723_v5  ;;  %4133 = vmatpush1.bf16.msra.mxu1 %v5727_v6 }
 0x392   :  { %4103 = vmatprep.subr.bf16.mxu0 %v5729_v7  ;;  %4135 = vmatprep.subr.bf16.mxu1 %v5738_v13 }
 0x395   :  { %4105 = vmatpush1.bf16.msra.mxu0 %v5747_v17  ;;  %4137 = vmatpush1.bf16.msra.mxu1 %v5751_v18 }
 0x396   :  { %4139 = vmatprep.subr.bf16.mxu0 %v5769_v25  ;;  %4203 = vmatprep.subr.bf16.mxu1 %v5780_v30 }
 0x398   :  { %1563 = vmatmul.mubr.f32.vlgmr.msra.gmra.mrb[14].mxu0 %v1336_v8  ;;  %1634 = vmatmul.mubr.f32.vlgmr.msra.gmra.mrb[14].mxu1 %v1336_v8  ;;  %v7636_v8 = vld [vmem:[#allocation24_spill] sm:$0xff] }
 0x399   :  { %4141 = vmatpush1.bf16.msra.mxu0 %v5782_v31  ;;  %4205 = vmatpush1.bf16.msra.mxu1 %v5794_v39 }
 0x39a   :  { %4143 = vmatprep.subr.bf16.mxu0 %v5807_v45  ;;  %4207 = vmatprep.subr.bf16.mxu1 %v5809_v46 }
 0x39d   :  { %4145 = vmatpush1.bf16.msra.mxu0 %v5821_v57  ;;  %4209 = vmatpush1.bf16.msra.mxu1 %v5834_v1 }
 0x39e   :  { %4147 = vmatprep.subr.bf16.mxu0 %v7619_v19  ;;  %4211 = vmatprep.subr.bf16.mxu1 %v7620_v56 }
 0x3a1   :  { %4149 = vmatpush1.bf16.msra.mxu0 %v7621_v59  ;;  %4213 = vmatpush1.bf16.msra.mxu1 %v7622_v27 }
 0x3a2   :  { %4151 = vmatprep.subr.bf16.mxu0 %v7623_v37  ;;  %4215 = vmatprep.subr.bf16.mxu1 %v7624_v29 }
 0x3a5   :  { %4153 = vmatpush1.bf16.msra.mxu0 %v7625_v54  ;;  %4217 = vmatpush1.bf16.msra.mxu1 %v7626_v14  ;;  %v7637_v14 = vld [vmem:[#allocation25_spill] sm:$0xff]  ;;  %v7677_v54 = vld [vmem:[#allocation63_spill] sm:$0xff] }
 0x3a6   :  { %4155 = vmatprep.subr.bf16.mxu0 %v7627_v47  ;;  %4219 = vmatprep.subr.bf16.mxu1 %v7628_v0  ;;  %v7638_v47 = vld [vmem:[#allocation26_spill] sm:$0xff]  ;;  %v7639_v0 = vld [vmem:[#allocation27_spill] sm:$0xff] }
 0x3a9   :  { %4157 = vmatpush1.bf16.msra.mxu0 %v7629_v26  ;;  %4221 = vmatpush1.bf16.msra.mxu1 %v7630_v42  ;;  %v7640_v26 = vld [vmem:[#allocation28_spill] sm:$0xff]  ;;  %v7641_v42 = vld [vmem:[#allocation29_spill] sm:$0xff] }
 0x3aa   :  { %4159 = vmatprep.subr.bf16.mxu0 %v7631_v2  ;;  %4223 = vmatprep.subr.bf16.mxu1 %v7632_v40  ;;  %v7642_v2 = vld [vmem:[#allocation30_spill] sm:$0xff]  ;;  %v7643_v40 = vld [vmem:[#allocation31_spill] sm:$0xff] }
 0x3ad   :  { %4161 = vmatpush1.bf16.msra.mxu0 %v7633_v9  ;;  %4225 = vmatpush1.bf16.msra.mxu1 %v7634_v21  ;;  %v7644_v9 = vld [vmem:[#allocation32_spill] sm:$0xff]  ;;  %v7645_v21 = vld [vmem:[#allocation33_spill] sm:$0xff] }
 0x3ae   :  { %4163 = vmatprep.subr.bf16.mxu0 %v7635_v38  ;;  %4227 = vmatprep.subr.bf16.mxu1 %v7636_v8  ;;  %v7646_v38 = vld [vmem:[#allocation34_spill] sm:$0xff]  ;;  %v7647_v8 = vld [vmem:[#allocation35_spill] sm:$0xff] }
 0x3b1   :  { %4165 = vmatpush1.bf16.msra.mxu0 %v7637_v14  ;;  %4229 = vmatpush1.bf16.msra.mxu1 %v7638_v47  ;;  %v7648_v14 = vld [vmem:[#allocation36_spill] sm:$0xff]  ;;  %v7649_v47 = vld [vmem:[#allocation37_spill] sm:$0xff] }
 0x3b2   :  { %4167 = vmatprep.subr.bf16.mxu0 %v7639_v0  ;;  %4231 = vmatprep.subr.bf16.mxu1 %v7640_v26  ;;  %v7650_v0 = vld [vmem:[#allocation38_spill] sm:$0xff]  ;;  %v7651_v26 = vld [vmem:[#allocation39_spill] sm:$0xff] }
 0x3b5   :  { %4169 = vmatpush1.bf16.msra.mxu0 %v7641_v42  ;;  %4233 = vmatpush1.bf16.msra.mxu1 %v7642_v2  ;;  %v7652_v42 = vld [vmem:[#allocation40_spill] sm:$0xff]  ;;  %v7653_v2 = vld [vmem:[#allocation41_spill] sm:$0xff] }
 0x3b6   :  { %4171 = vmatprep.subr.bf16.mxu0 %v7643_v40  ;;  %4235 = vmatprep.subr.bf16.mxu1 %v7644_v9  ;;  %v7654_v40 = vld [vmem:[#allocation42_spill] sm:$0xff]  ;;  %v7655_v9 = vld [vmem:[#allocation43_spill] sm:$0xff] }
 0x3b9   :  { %4173 = vmatpush1.bf16.msra.mxu0 %v7645_v21  ;;  %4237 = vmatpush1.bf16.msra.mxu1 %v7646_v38  ;;  %v7656_v21 = vld [vmem:[#allocation44_spill] sm:$0xff]  ;;  %v7657_v38 = vld [vmem:[#allocation45_spill] sm:$0xff] }
 0x3ba   :  { %4175 = vmatprep.subr.bf16.mxu0 %v7647_v8  ;;  %4239 = vmatprep.subr.bf16.mxu1 %v7648_v14  ;;  %v7658_v8 = vld [vmem:[#allocation46_spill] sm:$0xff]  ;;  %v7659_v14 = vld [vmem:[#allocation47_spill] sm:$0xff] }
 0x3bd   :  { %4177 = vmatpush1.bf16.msra.mxu0 %v7649_v47  ;;  %4241 = vmatpush1.bf16.msra.mxu1 %v7650_v0  ;;  %v7660_v47 = vld [vmem:[#allocation48_spill] sm:$0xff]  ;;  %v7661_v0 = vld [vmem:[#allocation49_spill] sm:$0xff] }
 0x3be   :  { %4179 = vmatprep.subr.bf16.mxu0 %v7651_v26  ;;  %4243 = vmatprep.subr.bf16.mxu1 %v7652_v42  ;;  %v7662_v26 = vld [vmem:[#allocation50_spill] sm:$0xff]  ;;  %v7663_v42 = vld [vmem:[#allocation51_spill] sm:$0xff] }
 0x3c1   :  { %4181 = vmatpush1.bf16.msra.mxu0 %v7653_v2  ;;  %4245 = vmatpush1.bf16.msra.mxu1 %v7654_v40  ;;  %v7664_v2 = vld [vmem:[#allocation52_spill] sm:$0xff]  ;;  %v7665_v40 = vld [vmem:[#allocation53_spill] sm:$0xff] }
 0x3c2   :  { %4183 = vmatprep.subr.bf16.mxu0 %v7655_v9  ;;  %4247 = vmatprep.subr.bf16.mxu1 %v7656_v21  ;;  %v7666_v9 = vld [vmem:[#allocation54_spill] sm:$0xff]  ;;  %v7667_v21 = vld [vmem:[#allocation55_spill] sm:$0xff] }
 0x3c5   :  { %4185 = vmatpush1.bf16.msra.mxu0 %v7657_v38  ;;  %4249 = vmatpush1.bf16.msra.mxu1 %v7658_v8  ;;  %v7668_v38 = vld [vmem:[#allocation56_spill] sm:$0xff]  ;;  %v7669_v8 = vld [vmem:[#allocation57_spill] sm:$0xff] }
 0x3c6   :  { %4187 = vmatprep.subr.bf16.mxu0 %v7659_v14  ;;  %4251 = vmatprep.subr.bf16.mxu1 %v7660_v47  ;;  %v7670_v14 = vld [vmem:[#allocation58_spill] sm:$0xff]  ;;  %v7671_v47 = vld [vmem:[#allocation59_spill] sm:$0xff] }
 0x3c9   :  { %4189 = vmatpush1.bf16.msra.mxu0 %v7661_v0  ;;  %4253 = vmatpush1.bf16.msra.mxu1 %v7662_v26  ;;  %v7672_v0 = vld [vmem:[#allocation60_spill] sm:$0xff]  ;;  %v7673_v26 = vld [vmem:[#allocation61_spill] sm:$0xff] }
 0x3ca   :  { %4191 = vmatprep.subr.bf16.mxu0 %v7663_v42  ;;  %4255 = vmatprep.subr.bf16.mxu1 %v7664_v2  ;;  %v7674_v42 = vld [vmem:[#allocation62_spill] sm:$0xff] }
 0x3cb   :  { %v7675_v2 = vld [vmem:[#allocation2_spill] sm:$0xff] }
 0x3cd   :  { %4193 = vmatpush1.bf16.msra.mxu0 %v7665_v40  ;;  %4257 = vmatpush1.bf16.msra.mxu1 %v7666_v9  ;;  %v7676_v40 = vld [vmem:[#allocation3_spill] sm:$0xff] }
 0x3ce   :  { %4195 = vmatprep.subr.bf16.mxu0 %v7667_v21  ;;  %4259 = vmatprep.subr.bf16.mxu1 %v7668_v38 }
 0x3d1   :  { %4197 = vmatpush1.bf16.msra.mxu0 %v7669_v8  ;;  %4261 = vmatpush1.bf16.msra.mxu1 %v7670_v14 }
 0x3d2   :  { %4199 = vmatprep.subr.bf16.mxu0 %v7671_v47  ;;  %4263 = vmatprep.subr.bf16.mxu1 %v7672_v0 }
 0x3d5   :  { %4201 = vmatpush1.bf16.msra.mxu0 %v7673_v26  ;;  %4265 = vmatpush1.bf16.msra.mxu1 %v7674_v42 }
 0x3d6   :  { %4267 = vmatprep.subr.bf16.mxu0 %v7675_v2  ;;  %4299 = vmatprep.subr.bf16.mxu1 %v7676_v40 }
 0x44b   :  { %v1403_v9 = vpop.f32.mrb[12].mxu0  ;;  %v1474_v21 = vpop.f32.mrb[12].mxu1 }
 0x44c   :  { %v1404_v38 = vadd.f32 %v1403_v9, %v7677_v54  ;;  %v1405_v29 = vpop.f32.mrb[13].mxu0  ;;  %v1476_v8 = vpop.f32.mrb[13].mxu1  ;;  %v1475_v0 = vadd.f32 %v1474_v21, %v7614_v43 }
 0x44d   :  { %v1406_v14 = vadd.f32 %v1405_v29, %v7613_v33  ;;  %v1477_v42 = vadd.f32 %v1476_v8, %v7615_v20  ;;  %v7678_v29 = vld [vmem:[#allocation70_spill] sm:$0xff] }
 0x44e   :  { %v1479_v37 = vmul.f32 0.5, %v1404_v38 }
 0x44f   :  { %v1480_v47 = vmul.f32 0.5, %v1406_v14  ;;  %v1481_v2 = vmul.f32 0.5, %v1477_v42 }
 0x450   :  { %5111 = vtanh.f32 %v1479_v37 }
 0x451   :  { %5113 = vtanh.f32 %v1480_v47 }
 0x452   :  { %5115 = vtanh.f32 %v1475_v0 }
 0x453   :  { %5117 = vtanh.f32 %v1481_v2 }
 0x45a   :  { %v5112_v26 = vpop.eup %5111 }
 0x45b   :  { %v5114_v40 = vpop.eup %5113  ;;  %v1486_v27 = vmul.f32 0.5, %v5112_v26 }
 0x45c   :  { %v1487_v59 = vmul.f32 0.5, %v5114_v40  ;;  %v5116_v54 = vpop.eup %5115 }
 0x45d   :  { %v1489_v9 = vadd.f32 0.5, %v1486_v27  ;;  %v5118_v37 = vpop.eup %5117 }
 0x45e   :  { %v1490_v56 = vadd.f32 0.5, %v1487_v59  ;;  %v1488_v47 = vmul.f32 0.5, %v5118_v37  ;;  %v3249_v59 = vrot.slane %v6614_v15, 7 }
 0x45f   :  { %v1494_v19 = vmul.f32 %v5116_v54, %v1489_v9 }
 0x460   :  { %v1493_v38 = vmul.f32 %v1490_v56, %v7678_v29  ;;  %v1492_v40 = vadd.f32 0.5, %v1488_v47  ;;  %v7682_v47 = vld [vmem:[#allocation64_spill] sm:$0xff] }
 0x462   :  { %v6727_v14 = vadd.f32 %v1494_v19, %v1493_v38  ;;  %v7680_v19 = vld [vmem:[#allocation65_spill] sm:$0xff]  ;;  %v7681_v38 = vld [vmem:[#allocation66_spill] sm:$0xff] }
 0x464   :  { %7679 = vst [vmem:[#allocation70_spill] sm:$0xff] %v6727_v14  ;;  %5119 = vtanh.f32 %v6727_v14 }
 0x46b   :  { %v1564_v0 = vpop.f32.mrb[14].mxu0  ;;  %v1635_v21 = vpop.f32.mrb[14].mxu1 }
 0x46c   :  { %v1644_v42 = vrot.slane %v1564_v0, 5  ;;  %v1646_v8 = vrot.slane %v1635_v21, 5  ;;  %v1566_v20 = vpop.f32.mrb[15].mxu0  ;;  %v1637_v26 = vpop.f32.mrb[15].mxu1 }
 0x46d   :  { %v1645_v2 = vrot.slane %v1566_v20, 5  ;;  %v1647_v14 = vrot.slane %v1637_v26, 5  ;;  %v3270_v20 = vsel %vm3269_vm0, %v7682_v47, %v3249_v59 }
 0x46e   :  { %v5120_v27 = vpop.eup %5119  ;;  %v1652_v54 = vadd.f32 %v1644_v42, %v7553_v60  ;;  %v1654_v37 = vadd.f32 %v1646_v8, %v7681_v38 }
 0x46f   :  { %v1653_v56 = vadd.f32 %v1645_v2, %v7680_v19  ;;  %v1497_v9 = vmul.f32 %v5120_v27, %v1492_v40  ;;  %v1655_v2 = vadd.f32 %v1647_v14, %v6364_v32 }
 0x470   :  { %v1660_v29 = vrot.slane %v1652_v54, 3  ;;  %v1662_v42 = vrot.slane %v1654_v37, 3 }
 0x471   :  { %v1661_v0 = vrot.slane %v1653_v56, 3  ;;  %1751 = vmatprep.mubr.f32.mxu0 %v1497_v9  ;;  %v3252_v21 = vrot.slane %v1497_v9, 6  ;;  %1822 = vmatprep.mubr.f32.mxu1 %v1497_v9  ;;  %v1663_v40 = vrot.slane %v1655_v2, 3  ;;  %v7687_v2 = vld [vmem:[#allocation11_spill] sm:$0xff] }
 0x472   :  { %v1668_v43 = vmul.f32 0.5, %v1660_v29 }
 0x473   :  { %v1669_v33 = vmul.f32 0.5, %v1661_v0  ;;  %v6735_v15 = vsel %vm3271_vm1, %v3270_v20, %v3252_v21  ;;  %v1670_v8 = vmul.f32 0.5, %v1663_v40  ;;  %v7685_v20 = vld [vmem:[#allocation9_spill] sm:$0xff]  ;;  %v7688_v40 = vld [vmem:[#allocation12_spill] sm:$0xff] }
 0x474   :  { %5121 = vtanh.f32 %v1668_v43 }
 0x475   :  { %5123 = vtanh.f32 %v1669_v33 }
 0x476   :  { %5125 = vtanh.f32 %v1662_v42  ;;  %v7686_v42 = vld [vmem:[#allocation10_spill] sm:$0xff] }
 0x477   :  { %5127 = vtanh.f32 %v1670_v8  ;;  %v7689_v8 = vld [vmem:[#allocation13_spill] sm:$0xff] }
 0x47e   :  { %v5122_v26 = vpop.eup %5121 }
 0x47f   :  { %v5124_v27 = vpop.eup %5123  ;;  %v1675_v54 = vmul.f32 0.5, %v5122_v26  ;;  %v7690_v26 = vld [vmem:[#allocation14_spill] sm:$0xff] }
 0x480   :  { %v1676_v56 = vmul.f32 0.5, %v5124_v27  ;;  %v5126_v38 = vpop.eup %5125  ;;  %v7691_v27 = vld [vmem:[#allocation15_spill] sm:$0xff] }
 0x481   :  { %v1678_v9 = vadd.f32 0.5, %v1675_v54  ;;  %v5128_v43 = vpop.eup %5127  ;;  %v7692_v54 = vld [vmem:[#allocation16_spill] sm:$0xff] }
 0x482   :  { %v1679_v59 = vadd.f32 0.5, %v1676_v56  ;;  %v1677_v33 = vmul.f32 0.5, %v5128_v43  ;;  %v7693_v56 = vld [vmem:[#allocation17_spill] sm:$0xff]  ;;  %v7698_v43 = vld [vmem:[#allocation22_spill] sm:$0xff] }
 0x483   :  { %v1683_v29 = vmul.f32 %v5126_v38, %v1678_v9  ;;  %v7684_v38 = vld [vmem:[#allocation8_spill] sm:$0xff]  ;;  %v7694_v9 = vld [vmem:[#allocation18_spill] sm:$0xff] }
 0x484   :  { %v1682_v0 = vmul.f32 %v1679_v59, %v6621_v44  ;;  %v1681_v14 = vadd.f32 0.5, %v1677_v33  ;;  %v7683_v44 = vld [vmem:[#allocation7_spill] sm:$0xff] }
 0x485   :  { %v7695_v59 = vld [vmem:[#allocation19_spill] sm:$0xff] }
 0x486   :  { %v6739_v21 = vadd.f32 %v1683_v29, %v1682_v0  ;;  %v7696_v29 = vld [vmem:[#allocation20_spill] sm:$0xff]  ;;  %v7697_v0 = vld [vmem:[#allocation21_spill] sm:$0xff]  ;;  %v7699_v33 = vld [vmem:[#allocation23_spill] sm:$0xff] }
 0x488   :  { %5129 = vtanh.f32 %v6739_v21 }
 0x492   :  { %v5130_v37 = vpop.eup %5129 }
 0x493   :  { %v1686_v47 = vmul.f32 %v5130_v37, %v1681_v14  ;;  %v7700_v14 = vld [vmem:[#allocation24_spill] sm:$0xff]  ;;  %v7701_v37 = vld [vmem:[#allocation25_spill] sm:$0xff] }
 0x495   :  { %1752 = vmatmul.mubr.f32.vlgmr.msra.gmra.mrb[16].mxu0 %v1686_v47  ;;  %1823 = vmatmul.mubr.f32.vlgmr.msra.gmra.mrb[16].mxu1 %v1686_v47 }
 0x496   :  { %4269 = vmatpush1.bf16.msra.mxu0 %v5506_v49  ;;  %4301 = vmatpush1.bf16.msra.mxu1 %v5509_v50 }
 0x497   :  { %4271 = vmatprep.subr.bf16.mxu0 %v5511_v51  ;;  %4303 = vmatprep.subr.bf16.mxu1 %v5523_v55 }
 0x498   :  { %1912 = vmatprep.mubr.f32.mxu0 %v7490_v3  ;;  %1983 = vmatprep.mubr.f32.mxu1 %v7490_v3 }
 0x49a   :  { %4273 = vmatpush1.bf16.msra.mxu0 %v5541_v61  ;;  %4305 = vmatpush1.bf16.msra.mxu1 %v5545_v62 }
 0x49b   :  { %4275 = vmatprep.subr.bf16.mxu0 %v5547_v63  ;;  %4307 = vmatprep.subr.bf16.mxu1 %v5559_v4 }
 0x49e   :  { %4277 = vmatpush1.bf16.msra.mxu0 %v5579_v10  ;;  %4309 = vmatpush1.bf16.msra.mxu1 %v5583_v11 }
 0x49f   :  { %4279 = vmatprep.subr.bf16.mxu0 %v5585_v12  ;;  %4311 = vmatprep.subr.bf16.mxu1 %v5597_v16 }
 0x4a2   :  { %4281 = vmatpush1.bf16.msra.mxu0 %v5615_v22  ;;  %4313 = vmatpush1.bf16.msra.mxu1 %v5619_v23 }
 0x4a3   :  { %4283 = vmatprep.subr.bf16.mxu0 %v5621_v24  ;;  %4315 = vmatprep.subr.bf16.mxu1 %v5633_v28 }
 0x4a6   :  { %4285 = vmatpush1.bf16.msra.mxu0 %v5651_v34  ;;  %4317 = vmatpush1.bf16.msra.mxu1 %v5655_v35 }
 0x4a7   :  { %4287 = vmatprep.subr.bf16.mxu0 %v5657_v36  ;;  %4319 = vmatprep.subr.bf16.mxu1 %v5669_v41 }
 0x4aa   :  { %4289 = vmatpush1.bf16.msra.mxu0 %v5687_v48  ;;  %4321 = vmatpush1.bf16.msra.mxu1 %v5691_v52 }
 0x4ab   :  { %4291 = vmatprep.subr.bf16.mxu0 %v5693_v53  ;;  %4323 = vmatprep.subr.bf16.mxu1 %v5705_v58 }
 0x4ae   :  { %4293 = vmatpush1.bf16.msra.mxu0 %v5723_v5  ;;  %4325 = vmatpush1.bf16.msra.mxu1 %v5727_v6 }
 0x4af   :  { %4295 = vmatprep.subr.bf16.mxu0 %v5729_v7  ;;  %4327 = vmatprep.subr.bf16.mxu1 %v5738_v13 }
 0x4b2   :  { %4297 = vmatpush1.bf16.msra.mxu0 %v5747_v17  ;;  %4329 = vmatpush1.bf16.msra.mxu1 %v5751_v18 }
 0x4b3   :  { %4331 = vmatprep.subr.bf16.mxu0 %v5769_v25  ;;  %4395 = vmatprep.subr.bf16.mxu1 %v5780_v30 }
 0x4b5   :  { %1913 = vmatmul.mubr.f32.vlgmr.msra.gmra.mrb[18].mxu0 %v1686_v47  ;;  %1984 = vmatmul.mubr.f32.vlgmr.msra.gmra.mrb[18].mxu1 %v1686_v47  ;;  %v7702_v47 = vld [vmem:[#allocation26_spill] sm:$0xff] }
 0x4b6   :  { %4333 = vmatpush1.bf16.msra.mxu0 %v5782_v31  ;;  %4397 = vmatpush1.bf16.msra.mxu1 %v5794_v39 }
 0x4b7   :  { %4335 = vmatprep.subr.bf16.mxu0 %v5807_v45  ;;  %4399 = vmatprep.subr.bf16.mxu1 %v5809_v46 }
 0x4ba   :  { %4337 = vmatpush1.bf16.msra.mxu0 %v5821_v57  ;;  %4401 = vmatpush1.bf16.msra.mxu1 %v5834_v1 }
 0x4bb   :  { %4339 = vmatprep.subr.bf16.mxu0 %v7683_v44  ;;  %4403 = vmatprep.subr.bf16.mxu1 %v7684_v38 }
 0x4be   :  { %4341 = vmatpush1.bf16.msra.mxu0 %v7685_v20  ;;  %4405 = vmatpush1.bf16.msra.mxu1 %v7686_v42 }
 0x4bf   :  { %4343 = vmatprep.subr.bf16.mxu0 %v7687_v2  ;;  %4407 = vmatprep.subr.bf16.mxu1 %v7688_v40 }
 0x4c2   :  { %4345 = vmatpush1.bf16.msra.mxu0 %v7689_v8  ;;  %4409 = vmatpush1.bf16.msra.mxu1 %v7690_v26  ;;  %v7742_v8 = vld [vmem:[#allocation67_spill] sm:$0xff] }
 0x4c3   :  { %4347 = vmatprep.subr.bf16.mxu0 %v7691_v27  ;;  %4411 = vmatprep.subr.bf16.mxu1 %v7692_v54  ;;  %v7703_v54 = vld [vmem:[#allocation27_spill] sm:$0xff] }
 0x4c4   :  { %v7741_v27 = vld [vmem:[#allocation63_spill] sm:$0xff] }
 0x4c6   :  { %4349 = vmatpush1.bf16.msra.mxu0 %v7693_v56  ;;  %4413 = vmatpush1.bf16.msra.mxu1 %v7694_v9  ;;  %v7704_v56 = vld [vmem:[#allocation28_spill] sm:$0xff]  ;;  %v7705_v9 = vld [vmem:[#allocation29_spill] sm:$0xff] }
 0x4c7   :  { %4351 = vmatprep.subr.bf16.mxu0 %v7695_v59  ;;  %4415 = vmatprep.subr.bf16.mxu1 %v7696_v29  ;;  %v7706_v59 = vld [vmem:[#allocation30_spill] sm:$0xff]  ;;  %v7707_v29 = vld [vmem:[#allocation31_spill] sm:$0xff] }
 0x4ca   :  { %4353 = vmatpush1.bf16.msra.mxu0 %v7697_v0  ;;  %4417 = vmatpush1.bf16.msra.mxu1 %v7698_v43  ;;  %v7708_v0 = vld [vmem:[#allocation32_spill] sm:$0xff]  ;;  %v7709_v43 = vld [vmem:[#allocation33_spill] sm:$0xff] }
 0x4cb   :  { %4355 = vmatprep.subr.bf16.mxu0 %v7699_v33  ;;  %4419 = vmatprep.subr.bf16.mxu1 %v7700_v14  ;;  %v7710_v33 = vld [vmem:[#allocation34_spill] sm:$0xff]  ;;  %v7711_v14 = vld [vmem:[#allocation35_spill] sm:$0xff] }
 0x4ce   :  { %4357 = vmatpush1.bf16.msra.mxu0 %v7701_v37  ;;  %4421 = vmatpush1.bf16.msra.mxu1 %v7702_v47  ;;  %v7712_v37 = vld [vmem:[#allocation36_spill] sm:$0xff]  ;;  %v7713_v47 = vld [vmem:[#allocation37_spill] sm:$0xff] }
 0x4cf   :  { %4359 = vmatprep.subr.bf16.mxu0 %v7703_v54  ;;  %4423 = vmatprep.subr.bf16.mxu1 %v7704_v56  ;;  %v7714_v54 = vld [vmem:[#allocation38_spill] sm:$0xff]  ;;  %v7715_v56 = vld [vmem:[#allocation39_spill] sm:$0xff] }
 0x4d2   :  { %4361 = vmatpush1.bf16.msra.mxu0 %v7705_v9  ;;  %4425 = vmatpush1.bf16.msra.mxu1 %v7706_v59  ;;  %v7716_v9 = vld [vmem:[#allocation40_spill] sm:$0xff]  ;;  %v7717_v59 = vld [vmem:[#allocation41_spill] sm:$0xff] }
 0x4d3   :  { %4363 = vmatprep.subr.bf16.mxu0 %v7707_v29  ;;  %4427 = vmatprep.subr.bf16.mxu1 %v7708_v0  ;;  %v7718_v29 = vld [vmem:[#allocation42_spill] sm:$0xff]  ;;  %v7719_v0 = vld [vmem:[#allocation43_spill] sm:$0xff] }
 0x4d6   :  { %4365 = vmatpush1.bf16.msra.mxu0 %v7709_v43  ;;  %4429 = vmatpush1.bf16.msra.mxu1 %v7710_v33  ;;  %v7720_v43 = vld [vmem:[#allocation44_spill] sm:$0xff]  ;;  %v7721_v33 = vld [vmem:[#allocation45_spill] sm:$0xff] }
 0x4d7   :  { %4367 = vmatprep.subr.bf16.mxu0 %v7711_v14  ;;  %4431 = vmatprep.subr.bf16.mxu1 %v7712_v37  ;;  %v7722_v14 = vld [vmem:[#allocation46_spill] sm:$0xff]  ;;  %v7723_v37 = vld [vmem:[#allocation47_spill] sm:$0xff] }
 0x4da   :  { %4369 = vmatpush1.bf16.msra.mxu0 %v7713_v47  ;;  %4433 = vmatpush1.bf16.msra.mxu1 %v7714_v54  ;;  %v7724_v47 = vld [vmem:[#allocation48_spill] sm:$0xff]  ;;  %v7725_v54 = vld [vmem:[#allocation49_spill] sm:$0xff] }
 0x4db   :  { %4371 = vmatprep.subr.bf16.mxu0 %v7715_v56  ;;  %4435 = vmatprep.subr.bf16.mxu1 %v7716_v9  ;;  %v7726_v56 = vld [vmem:[#allocation50_spill] sm:$0xff]  ;;  %v7727_v9 = vld [vmem:[#allocation51_spill] sm:$0xff] }
 0x4de   :  { %4373 = vmatpush1.bf16.msra.mxu0 %v7717_v59  ;;  %4437 = vmatpush1.bf16.msra.mxu1 %v7718_v29  ;;  %v7728_v59 = vld [vmem:[#allocation52_spill] sm:$0xff]  ;;  %v7729_v29 = vld [vmem:[#allocation53_spill] sm:$0xff] }
 0x4df   :  { %4375 = vmatprep.subr.bf16.mxu0 %v7719_v0  ;;  %4439 = vmatprep.subr.bf16.mxu1 %v7720_v43  ;;  %v7730_v0 = vld [vmem:[#allocation54_spill] sm:$0xff]  ;;  %v7731_v43 = vld [vmem:[#allocation55_spill] sm:$0xff] }
 0x4e2   :  { %4377 = vmatpush1.bf16.msra.mxu0 %v7721_v33  ;;  %4441 = vmatpush1.bf16.msra.mxu1 %v7722_v14  ;;  %v7732_v33 = vld [vmem:[#allocation56_spill] sm:$0xff]  ;;  %v7733_v14 = vld [vmem:[#allocation57_spill] sm:$0xff] }
 0x4e3   :  { %4379 = vmatprep.subr.bf16.mxu0 %v7723_v37  ;;  %4443 = vmatprep.subr.bf16.mxu1 %v7724_v47  ;;  %v7734_v37 = vld [vmem:[#allocation58_spill] sm:$0xff]  ;;  %v7735_v47 = vld [vmem:[#allocation59_spill] sm:$0xff] }
 0x4e6   :  { %4381 = vmatpush1.bf16.msra.mxu0 %v7725_v54  ;;  %4445 = vmatpush1.bf16.msra.mxu1 %v7726_v56  ;;  %v7736_v54 = vld [vmem:[#allocation60_spill] sm:$0xff]  ;;  %v7737_v56 = vld [vmem:[#allocation61_spill] sm:$0xff] }
 0x4e7   :  { %4383 = vmatprep.subr.bf16.mxu0 %v7727_v9  ;;  %4447 = vmatprep.subr.bf16.mxu1 %v7728_v59  ;;  %v7738_v9 = vld [vmem:[#allocation62_spill] sm:$0xff] }
 0x4e8   :  { %v7739_v59 = vld [vmem:[#allocation2_spill] sm:$0xff] }
 0x4ea   :  { %4385 = vmatpush1.bf16.msra.mxu0 %v7729_v29  ;;  %4449 = vmatpush1.bf16.msra.mxu1 %v7730_v0  ;;  %v7740_v29 = vld [vmem:[#allocation3_spill] sm:$0xff] }
 0x4eb   :  { %4387 = vmatprep.subr.bf16.mxu0 %v7731_v43  ;;  %4451 = vmatprep.subr.bf16.mxu1 %v7732_v33 }
 0x4ee   :  { %4389 = vmatpush1.bf16.msra.mxu0 %v7733_v14  ;;  %4453 = vmatpush1.bf16.msra.mxu1 %v7734_v37 }
 0x4ef   :  { %4391 = vmatprep.subr.bf16.mxu0 %v7735_v47  ;;  %4455 = vmatprep.subr.bf16.mxu1 %v7736_v54  ;;  %v7743_v54 = vld [vmem:[#allocation68_spill] sm:$0xff] }
 0x4f2   :  { %4393 = vmatpush1.bf16.msra.mxu0 %v7737_v56  ;;  %4457 = vmatpush1.bf16.msra.mxu1 %v7738_v9  ;;  %v7744_v9 = vld [vmem:[#allocation69_spill] sm:$0xff] }
 0x4f3   :  { %4459 = vmatprep.subr.bf16.mxu0 %v7739_v59  ;;  %4491 = vmatprep.subr.bf16.mxu1 %v7740_v29 }
 0x568   :  { %v1753_v0 = vpop.f32.mrb[16].mxu0  ;;  %v1824_v43 = vpop.f32.mrb[16].mxu1 }
 0x569   :  { %v1754_v33 = vadd.f32 %v1753_v0, %v7741_v27  ;;  %v1755_v26 = vpop.f32.mrb[17].mxu0  ;;  %v1826_v14 = vpop.f32.mrb[17].mxu1  ;;  %v1825_v2 = vadd.f32 %v1824_v43, %v7743_v54 }
 0x56a   :  { %v1756_v37 = vadd.f32 %v1755_v26, %v7742_v8  ;;  %v1827_v56 = vadd.f32 %v1826_v14, %v7744_v9  ;;  %v7745_v26 = vld [vmem:[#allocation70_spill] sm:$0xff] }
 0x56b   :  { %v1829_v40 = vmul.f32 0.5, %v1754_v33 }
 0x56c   :  { %v1830_v47 = vmul.f32 0.5, %v1756_v37  ;;  %v1831_v59 = vmul.f32 0.5, %v1827_v56 }
 0x56d   :  { %5131 = vtanh.f32 %v1829_v40 }
 0x56e   :  { %5133 = vtanh.f32 %v1830_v47 }
 0x56f   :  { %5135 = vtanh.f32 %v1825_v2 }
 0x570   :  { %5137 = vtanh.f32 %v1831_v59 }
 0x577   :  { %v5132_v42 = vpop.eup %5131 }
 0x578   :  { %v5134_v29 = vpop.eup %5133  ;;  %v1836_v20 = vmul.f32 0.5, %v5132_v42 }
 0x579   :  { %v1837_v38 = vmul.f32 0.5, %v5134_v29  ;;  %v5136_v27 = vpop.eup %5135 }
 0x57a   :  { %v1839_v0 = vadd.f32 0.5, %v1836_v20  ;;  %v5138_v40 = vpop.eup %5137 }
 0x57b   :  { %v1840_v44 = vadd.f32 0.5, %v1837_v38  ;;  %v1838_v2 = vmul.f32 0.5, %v5138_v40 }
 0x57c   :  { %v1844_v1 = vmul.f32 %v5136_v27, %v1839_v0  ;;  %v7747_v0 = vld [vmem:[#allocation66_spill] sm:$0xff] }
 0x57d   :  { %v1843_v33 = vmul.f32 %v1840_v44, %v7745_v26  ;;  %v1842_v29 = vadd.f32 0.5, %v1838_v2 }
 0x57f   :  { %v6845_v37 = vadd.f32 %v1844_v1, %v1843_v33 }
 0x581   :  { %7746 = vst [vmem:[#allocation65_spill] sm:$0xff] %v6845_v37  ;;  %5139 = vtanh.f32 %v6845_v37 }
 0x588   :  { %v1914_v43 = vpop.f32.mrb[18].mxu0  ;;  %v1985_v14 = vpop.f32.mrb[18].mxu1 }
 0x589   :  { %v1994_v56 = vrot.slane %v1914_v43, 4  ;;  %v1996_v47 = vrot.slane %v1985_v14, 4  ;;  %v1916_v9 = vpop.f32.mrb[19].mxu0  ;;  %v1987_v42 = vpop.f32.mrb[19].mxu1 }
 0x58a   :  { %v1995_v59 = vrot.slane %v1916_v9, 4  ;;  %v1997_v33 = vrot.slane %v1987_v42, 4 }
 0x58b   :  { %v5140_v20 = vpop.eup %5139  ;;  %v2002_v38 = vadd.f32 %v1994_v56, %v7553_v60  ;;  %v2004_v26 = vadd.f32 %v1996_v47, %v7747_v0 }
 0x58c   :  { %v2003_v27 = vadd.f32 %v1995_v59, %v7680_v19  ;;  %v1847_v44 = vmul.f32 %v5140_v20, %v1842_v29  ;;  %v2005_v56 = vadd.f32 %v1997_v33, %v6364_v32 }
 0x58d   :  { %v2010_v1 = vrot.slane %v2002_v38, 4  ;;  %v2012_v9 = vrot.slane %v2004_v26, 4 }
 0x58e   :  { %v2011_v40 = vrot.slane %v2003_v27, 4  ;;  %2101 = vmatprep.mubr.f32.mxu0 %v1847_v44  ;;  %v3255_v37 = vrot.slane %v1847_v44, 5  ;;  %2172 = vmatprep.mubr.f32.mxu1 %v1847_v44  ;;  %v2013_v29 = vrot.slane %v2005_v56, 4  ;;  %v7749_v56 = vld [vmem:[#allocation7_spill] sm:$0xff] }
 0x58f   :  { %v2018_v43 = vmul.f32 0.5, %v2010_v1 }
 0x590   :  { %v2019_v14 = vmul.f32 0.5, %v2011_v40  ;;  %v6852_v2 = vsel %vm3273_vm2, %v6735_v15, %v3255_v37  ;;  %v2020_v59 = vmul.f32 0.5, %v2013_v29  ;;  %v7750_v29 = vld [vmem:[#allocation8_spill] sm:$0xff] }
 0x591   :  { %5141 = vtanh.f32 %v2018_v43 }
 0x592   :  { %5143 = vtanh.f32 %v2019_v14 }
 0x593   :  { %5145 = vtanh.f32 %v2012_v9 }
 0x594   :  { %5147 = vtanh.f32 %v2020_v59  ;;  %v7751_v59 = vld [vmem:[#allocation9_spill] sm:$0xff] }
 0x59b   :  { %v5142_v47 = vpop.eup %5141 }
 0x59c   :  { %v5144_v42 = vpop.eup %5143  ;;  %v2025_v20 = vmul.f32 0.5, %v5142_v47  ;;  %v7752_v47 = vld [vmem:[#allocation10_spill] sm:$0xff] }
 0x59d   :  { %v2026_v38 = vmul.f32 0.5, %v5144_v42  ;;  %v5146_v44 = vpop.eup %5145  ;;  %v7753_v42 = vld [vmem:[#allocation11_spill] sm:$0xff] }
 0x59e   :  { %v2028_v27 = vadd.f32 0.5, %v2025_v20  ;;  %v5148_v26 = vpop.eup %5147  ;;  %v7754_v20 = vld [vmem:[#allocation12_spill] sm:$0xff] }
 0x59f   :  { %v2029_v1 = vadd.f32 0.5, %v2026_v38  ;;  %v2027_v33 = vmul.f32 0.5, %v5148_v26  ;;  %v7755_v38 = vld [vmem:[#allocation13_spill] sm:$0xff]  ;;  %v7761_v26 = vld [vmem:[#allocation19_spill] sm:$0xff] }
 0x5a0   :  { %v2033_v40 = vmul.f32 %v5146_v44, %v2028_v27  ;;  %v7756_v27 = vld [vmem:[#allocation14_spill] sm:$0xff]  ;;  %v7757_v44 = vld [vmem:[#allocation15_spill] sm:$0xff] }
 0x5a1   :  { %v2032_v15 = vmul.f32 %v2029_v1, %v6739_v21  ;;  %v2031_v43 = vadd.f32 0.5, %v2027_v33  ;;  %v7748_v21 = vld [vmem:[#allocation6_spill] sm:$0xff]  ;;  %v7758_v1 = vld [vmem:[#allocation16_spill] sm:$0xff] }
 0x5a2   :  { %v7762_v33 = vld [vmem:[#allocation20_spill] sm:$0xff] }
 0x5a3   :  { %v6856_v37 = vadd.f32 %v2033_v40, %v2032_v15  ;;  %v7759_v40 = vld [vmem:[#allocation17_spill] sm:$0xff]  ;;  %v7760_v15 = vld [vmem:[#allocation18_spill] sm:$0xff] }
 0x5a5   :  { %5149 = vtanh.f32 %v6856_v37 }
 0x5af   :  { %v5150_v14 = vpop.eup %5149 }
 0x5b0   :  { %v2036_v9 = vmul.f32 %v5150_v14, %v2031_v43  ;;  %v7763_v43 = vld [vmem:[#allocation21_spill] sm:$0xff]  ;;  %v7764_v14 = vld [vmem:[#allocation22_spill] sm:$0xff] }
 0x5b2   :  { %2102 = vmatmul.mubr.f32.vlgmr.msra.gmra.mrb[20].mxu0 %v2036_v9  ;;  %2173 = vmatmul.mubr.f32.vlgmr.msra.gmra.mrb[20].mxu1 %v2036_v9 }
 0x5b3   :  { %4461 = vmatpush1.bf16.msra.mxu0 %v5506_v49  ;;  %4493 = vmatpush1.bf16.msra.mxu1 %v5509_v50 }
 0x5b4   :  { %4463 = vmatprep.subr.bf16.mxu0 %v5511_v51  ;;  %4495 = vmatprep.subr.bf16.mxu1 %v5523_v55 }
 0x5b5   :  { %2262 = vmatprep.mubr.f32.mxu0 %v7490_v3  ;;  %2333 = vmatprep.mubr.f32.mxu1 %v7490_v3 }
 0x5b7   :  { %4465 = vmatpush1.bf16.msra.mxu0 %v5541_v61  ;;  %4497 = vmatpush1.bf16.msra.mxu1 %v5545_v62 }
 0x5b8   :  { %4467 = vmatprep.subr.bf16.mxu0 %v5547_v63  ;;  %4499 = vmatprep.subr.bf16.mxu1 %v5559_v4 }
 0x5bb   :  { %4469 = vmatpush1.bf16.msra.mxu0 %v5579_v10  ;;  %4501 = vmatpush1.bf16.msra.mxu1 %v5583_v11 }
 0x5bc   :  { %4471 = vmatprep.subr.bf16.mxu0 %v5585_v12  ;;  %4503 = vmatprep.subr.bf16.mxu1 %v5597_v16 }
 0x5bf   :  { %4473 = vmatpush1.bf16.msra.mxu0 %v5615_v22  ;;  %4505 = vmatpush1.bf16.msra.mxu1 %v5619_v23 }
 0x5c0   :  { %4475 = vmatprep.subr.bf16.mxu0 %v5621_v24  ;;  %4507 = vmatprep.subr.bf16.mxu1 %v5633_v28 }
 0x5c3   :  { %4477 = vmatpush1.bf16.msra.mxu0 %v5651_v34  ;;  %4509 = vmatpush1.bf16.msra.mxu1 %v5655_v35 }
 0x5c4   :  { %4479 = vmatprep.subr.bf16.mxu0 %v5657_v36  ;;  %4511 = vmatprep.subr.bf16.mxu1 %v5669_v41 }
 0x5c7   :  { %4481 = vmatpush1.bf16.msra.mxu0 %v5687_v48  ;;  %4513 = vmatpush1.bf16.msra.mxu1 %v5691_v52 }
 0x5c8   :  { %4483 = vmatprep.subr.bf16.mxu0 %v5693_v53  ;;  %4515 = vmatprep.subr.bf16.mxu1 %v5705_v58 }
 0x5cb   :  { %4485 = vmatpush1.bf16.msra.mxu0 %v5723_v5  ;;  %4517 = vmatpush1.bf16.msra.mxu1 %v5727_v6 }
 0x5cc   :  { %4487 = vmatprep.subr.bf16.mxu0 %v5729_v7  ;;  %4519 = vmatprep.subr.bf16.mxu1 %v5738_v13 }
 0x5cf   :  { %4489 = vmatpush1.bf16.msra.mxu0 %v5747_v17  ;;  %4521 = vmatpush1.bf16.msra.mxu1 %v5751_v18 }
 0x5d0   :  { %4523 = vmatprep.subr.bf16.mxu0 %v5769_v25  ;;  %4587 = vmatprep.subr.bf16.mxu1 %v5780_v30 }
 0x5d2   :  { %2263 = vmatmul.mubr.f32.vlgmr.msra.gmra.mrb[22].mxu0 %v2036_v9  ;;  %2334 = vmatmul.mubr.f32.vlgmr.msra.gmra.mrb[22].mxu1 %v2036_v9  ;;  %v7765_v9 = vld [vmem:[#allocation23_spill] sm:$0xff] }
 0x5d3   :  { %4525 = vmatpush1.bf16.msra.mxu0 %v5782_v31  ;;  %4589 = vmatpush1.bf16.msra.mxu1 %v5794_v39 }
 0x5d4   :  { %4527 = vmatprep.subr.bf16.mxu0 %v5807_v45  ;;  %4591 = vmatprep.subr.bf16.mxu1 %v5809_v46 }
 0x5d7   :  { %4529 = vmatpush1.bf16.msra.mxu0 %v5821_v57  ;;  %4593 = vmatpush1.bf16.msra.mxu1 %v7748_v21 }
 0x5d8   :  { %4531 = vmatprep.subr.bf16.mxu0 %v7749_v56  ;;  %4595 = vmatprep.subr.bf16.mxu1 %v7750_v29 }
 0x5db   :  { %4533 = vmatpush1.bf16.msra.mxu0 %v7751_v59  ;;  %4597 = vmatpush1.bf16.msra.mxu1 %v7752_v47 }
 0x5dc   :  { %4535 = vmatprep.subr.bf16.mxu0 %v7753_v42  ;;  %4599 = vmatprep.subr.bf16.mxu1 %v7754_v20  ;;  %v7807_v20 = vld [vmem:[#allocation63_spill] sm:$0xff] }
 0x5df   :  { %4537 = vmatpush1.bf16.msra.mxu0 %v7755_v38  ;;  %4601 = vmatpush1.bf16.msra.mxu1 %v7756_v27  ;;  %v7766_v38 = vld [vmem:[#allocation24_spill] sm:$0xff]  ;;  %v7767_v27 = vld [vmem:[#allocation25_spill] sm:$0xff] }
 0x5e0   :  { %4539 = vmatprep.subr.bf16.mxu0 %v7757_v44  ;;  %4603 = vmatprep.subr.bf16.mxu1 %v7758_v1  ;;  %v7768_v44 = vld [vmem:[#allocation26_spill] sm:$0xff]  ;;  %v7769_v1 = vld [vmem:[#allocation27_spill] sm:$0xff] }
 0x5e3   :  { %4541 = vmatpush1.bf16.msra.mxu0 %v7759_v40  ;;  %4605 = vmatpush1.bf16.msra.mxu1 %v7760_v15  ;;  %v7770_v40 = vld [vmem:[#allocation28_spill] sm:$0xff]  ;;  %v7771_v15 = vld [vmem:[#allocation29_spill] sm:$0xff] }
 0x5e4   :  { %4543 = vmatprep.subr.bf16.mxu0 %v7761_v26  ;;  %4607 = vmatprep.subr.bf16.mxu1 %v7762_v33  ;;  %v7772_v26 = vld [vmem:[#allocation30_spill] sm:$0xff]  ;;  %v7773_v33 = vld [vmem:[#allocation31_spill] sm:$0xff] }
 0x5e7   :  { %4545 = vmatpush1.bf16.msra.mxu0 %v7763_v43  ;;  %4609 = vmatpush1.bf16.msra.mxu1 %v7764_v14  ;;  %v7774_v43 = vld [vmem:[#allocation32_spill] sm:$0xff]  ;;  %v7775_v14 = vld [vmem:[#allocation33_spill] sm:$0xff] }
 0x5e8   :  { %4547 = vmatprep.subr.bf16.mxu0 %v7765_v9  ;;  %4611 = vmatprep.subr.bf16.mxu1 %v7766_v38  ;;  %v7776_v9 = vld [vmem:[#allocation34_spill] sm:$0xff]  ;;  %v7777_v38 = vld [vmem:[#allocation35_spill] sm:$0xff] }
 0x5eb   :  { %4549 = vmatpush1.bf16.msra.mxu0 %v7767_v27  ;;  %4613 = vmatpush1.bf16.msra.mxu1 %v7768_v44  ;;  %v7778_v27 = vld [vmem:[#allocation36_spill] sm:$0xff]  ;;  %v7779_v44 = vld [vmem:[#allocation37_spill] sm:$0xff] }
 0x5ec   :  { %4551 = vmatprep.subr.bf16.mxu0 %v7769_v1  ;;  %4615 = vmatprep.subr.bf16.mxu1 %v7770_v40  ;;  %v7780_v1 = vld [vmem:[#allocation38_spill] sm:$0xff]  ;;  %v7781_v40 = vld [vmem:[#allocation39_spill] sm:$0xff] }
 0x5ef   :  { %4553 = vmatpush1.bf16.msra.mxu0 %v7771_v15  ;;  %4617 = vmatpush1.bf16.msra.mxu1 %v7772_v26  ;;  %v7782_v15 = vld [vmem:[#allocation40_spill] sm:$0xff]  ;;  %v7783_v26 = vld [vmem:[#allocation41_spill] sm:$0xff] }
 0x5f0   :  { %4555 = vmatprep.subr.bf16.mxu0 %v7773_v33  ;;  %4619 = vmatprep.subr.bf16.mxu1 %v7774_v43  ;;  %v7784_v33 = vld [vmem:[#allocation42_spill] sm:$0xff]  ;;  %v7785_v43 = vld [vmem:[#allocation43_spill] sm:$0xff] }
 0x5f3   :  { %4557 = vmatpush1.bf16.msra.mxu0 %v7775_v14  ;;  %4621 = vmatpush1.bf16.msra.mxu1 %v7776_v9  ;;  %v7786_v14 = vld [vmem:[#allocation44_spill] sm:$0xff]  ;;  %v7787_v9 = vld [vmem:[#allocation45_spill] sm:$0xff] }
 0x5f4   :  { %4559 = vmatprep.subr.bf16.mxu0 %v7777_v38  ;;  %4623 = vmatprep.subr.bf16.mxu1 %v7778_v27  ;;  %v7788_v38 = vld [vmem:[#allocation46_spill] sm:$0xff]  ;;  %v7789_v27 = vld [vmem:[#allocation47_spill] sm:$0xff] }
 0x5f7   :  { %4561 = vmatpush1.bf16.msra.mxu0 %v7779_v44  ;;  %4625 = vmatpush1.bf16.msra.mxu1 %v7780_v1  ;;  %v7790_v44 = vld [vmem:[#allocation48_spill] sm:$0xff]  ;;  %v7791_v1 = vld [vmem:[#allocation49_spill] sm:$0xff] }
 0x5f8   :  { %4563 = vmatprep.subr.bf16.mxu0 %v7781_v40  ;;  %4627 = vmatprep.subr.bf16.mxu1 %v7782_v15  ;;  %v7792_v40 = vld [vmem:[#allocation50_spill] sm:$0xff]  ;;  %v7793_v15 = vld [vmem:[#allocation51_spill] sm:$0xff] }
 0x5fb   :  { %4565 = vmatpush1.bf16.msra.mxu0 %v7783_v26  ;;  %4629 = vmatpush1.bf16.msra.mxu1 %v7784_v33  ;;  %v7794_v26 = vld [vmem:[#allocation52_spill] sm:$0xff]  ;;  %v7795_v33 = vld [vmem:[#allocation53_spill] sm:$0xff] }
 0x5fc   :  { %4567 = vmatprep.subr.bf16.mxu0 %v7785_v43  ;;  %4631 = vmatprep.subr.bf16.mxu1 %v7786_v14  ;;  %v7796_v43 = vld [vmem:[#allocation54_spill] sm:$0xff]  ;;  %v7797_v14 = vld [vmem:[#allocation55_spill] sm:$0xff] }
 0x5ff   :  { %4569 = vmatpush1.bf16.msra.mxu0 %v7787_v9  ;;  %4633 = vmatpush1.bf16.msra.mxu1 %v7788_v38  ;;  %v7798_v9 = vld [vmem:[#allocation56_spill] sm:$0xff]  ;;  %v7799_v38 = vld [vmem:[#allocation57_spill] sm:$0xff] }
 0x600   :  { %4571 = vmatprep.subr.bf16.mxu0 %v7789_v27  ;;  %4635 = vmatprep.subr.bf16.mxu1 %v7790_v44  ;;  %v7800_v27 = vld [vmem:[#allocation58_spill] sm:$0xff]  ;;  %v7801_v44 = vld [vmem:[#allocation59_spill] sm:$0xff] }
 0x603   :  { %4573 = vmatpush1.bf16.msra.mxu0 %v7791_v1  ;;  %4637 = vmatpush1.bf16.msra.mxu1 %v7792_v40  ;;  %v7802_v1 = vld [vmem:[#allocation60_spill] sm:$0xff]  ;;  %v7803_v40 = vld [vmem:[#allocation61_spill] sm:$0xff] }
 0x604   :  { %4575 = vmatprep.subr.bf16.mxu0 %v7793_v15  ;;  %4639 = vmatprep.subr.bf16.mxu1 %v7794_v26  ;;  %v7804_v15 = vld [vmem:[#allocation62_spill] sm:$0xff] }
 0x605   :  { %v7805_v26 = vld [vmem:[#allocation2_spill] sm:$0xff] }
 0x607   :  { %4577 = vmatpush1.bf16.msra.mxu0 %v7795_v33  ;;  %4641 = vmatpush1.bf16.msra.mxu1 %v7796_v43  ;;  %v7806_v33 = vld [vmem:[#allocation3_spill] sm:$0xff] }
 0x608   :  { %4579 = vmatprep.subr.bf16.mxu0 %v7797_v14  ;;  %4643 = vmatprep.subr.bf16.mxu1 %v7798_v9 }
 0x60b   :  { %4581 = vmatpush1.bf16.msra.mxu0 %v7799_v38  ;;  %4645 = vmatpush1.bf16.msra.mxu1 %v7800_v27 }
 0x60c   :  { %4583 = vmatprep.subr.bf16.mxu0 %v7801_v44  ;;  %4647 = vmatprep.subr.bf16.mxu1 %v7802_v1 }
 0x60f   :  { %4585 = vmatpush1.bf16.msra.mxu0 %v7803_v40  ;;  %4649 = vmatpush1.bf16.msra.mxu1 %v7804_v15  ;;  %v7808_v15 = vld [vmem:[#allocation69_spill] sm:$0xff] }
 0x610   :  { %4651 = vmatprep.subr.bf16.mxu0 %v7805_v26  ;;  %4683 = vmatprep.subr.bf16.mxu1 %v7806_v33 }
 0x685   :  { %v2103_v43 = vpop.f32.mrb[20].mxu0  ;;  %v2174_v14 = vpop.f32.mrb[20].mxu1 }
 0x686   :  { %v2104_v9 = vadd.f32 %v2103_v43, %v7807_v20  ;;  %v2105_v42 = vpop.f32.mrb[21].mxu0  ;;  %v2176_v38 = vpop.f32.mrb[21].mxu1  ;;  %v2175_v1 = vadd.f32 %v2174_v14, %v7743_v54 }
 0x687   :  { %v2106_v27 = vadd.f32 %v2105_v42, %v7742_v8  ;;  %v2177_v40 = vadd.f32 %v2176_v38, %v7808_v15  ;;  %v7809_v42 = vld [vmem:[#allocation65_spill] sm:$0xff] }
 0x688   :  { %v2179_v47 = vmul.f32 0.5, %v2104_v9 }
 0x689   :  { %v2180_v44 = vmul.f32 0.5, %v2106_v27  ;;  %v2181_v26 = vmul.f32 0.5, %v2177_v40 }
 0x68a   :  { %5151 = vtanh.f32 %v2179_v47 }
 0x68b   :  { %5153 = vtanh.f32 %v2180_v44 }
 0x68c   :  { %5155 = vtanh.f32 %v2175_v1 }
 0x68d   :  { %5157 = vtanh.f32 %v2181_v26 }
 0x694   :  { %v5152_v59 = vpop.eup %5151 }
 0x695   :  { %v5154_v33 = vpop.eup %5153  ;;  %v2186_v29 = vmul.f32 0.5, %v5152_v59 }
 0x696   :  { %v2187_v56 = vmul.f32 0.5, %v5154_v33  ;;  %v5156_v20 = vpop.eup %5155 }
 0x697   :  { %v2189_v43 = vadd.f32 0.5, %v2186_v29  ;;  %v5158_v47 = vpop.eup %5157 }
 0x698   :  { %v2190_v21 = vadd.f32 0.5, %v2187_v56  ;;  %v2188_v44 = vmul.f32 0.5, %v5158_v47 }
 0x699   :  { %v2194_v57 = vmul.f32 %v5156_v20, %v2189_v43 }
 0x69a   :  { %v2193_v9 = vmul.f32 %v2190_v21, %v7809_v42  ;;  %v2192_v33 = vadd.f32 0.5, %v2188_v44 }
 0x69c   :  { %v6962_v27 = vadd.f32 %v2194_v57, %v2193_v9 }
 0x69e   :  { %5159 = vtanh.f32 %v6962_v27 }
 0x6a5   :  { %v2264_v1 = vpop.f32.mrb[22].mxu0  ;;  %v2335_v38 = vpop.f32.mrb[22].mxu1 }
 0x6a6   :  { %v2344_v40 = vrot.slane %v2264_v1, 3  ;;  %v2346_v14 = vrot.slane %v2335_v38, 3  ;;  %v2266_v15 = vpop.f32.mrb[23].mxu0  ;;  %v2337_v59 = vpop.f32.mrb[23].mxu1 }
 0x6a7   :  { %v2345_v26 = vrot.slane %v2266_v15, 3  ;;  %v2347_v42 = vrot.slane %v2337_v59, 3 }
 0x6a8   :  { %v5160_v29 = vpop.eup %5159  ;;  %v2352_v56 = vadd.f32 %v2344_v40, %v7553_v60  ;;  %v2354_v43 = vadd.f32 %v2346_v14, %v7747_v0 }
 0x6a9   :  { %v2353_v20 = vadd.f32 %v2345_v26, %v7680_v19  ;;  %v2197_v21 = vmul.f32 %v5160_v29, %v2192_v33  ;;  %v2355_v40 = vadd.f32 %v2347_v42, %v6364_v32 }
 0x6aa   :  { %v2360_v57 = vrot.slane %v2352_v56, 5  ;;  %v2362_v15 = vrot.slane %v2354_v43, 5 }
 0x6ab   :  { %v2361_v9 = vrot.slane %v2353_v20, 5  ;;  %2451 = vmatprep.mubr.f32.mxu0 %v2197_v21  ;;  %v3258_v47 = vrot.slane %v2197_v21, 4  ;;  %2522 = vmatprep.mubr.f32.mxu1 %v2197_v21  ;;  %v2363_v33 = vrot.slane %v2355_v40, 5  ;;  %v7811_v40 = vld [vmem:[#allocation6_spill] sm:$0xff] }
 0x6ac   :  { %v2368_v1 = vmul.f32 0.5, %v2360_v57 }
 0x6ad   :  { %v2369_v38 = vmul.f32 0.5, %v2361_v9  ;;  %v6969_v44 = vsel %vm3275_vm3, %v6852_v2, %v3258_v47  ;;  %v2370_v26 = vmul.f32 0.5, %v2363_v33  ;;  %v7812_v33 = vld [vmem:[#allocation7_spill] sm:$0xff] }
 0x6ae   :  { %5161 = vtanh.f32 %v2368_v1 }
 0x6af   :  { %5163 = vtanh.f32 %v2369_v38 }
 0x6b0   :  { %5165 = vtanh.f32 %v2362_v15 }
 0x6b1   :  { %5167 = vtanh.f32 %v2370_v26  ;;  %v7813_v26 = vld [vmem:[#allocation8_spill] sm:$0xff] }
 0x6b8   :  { %v5162_v14 = vpop.eup %5161 }
 0x6b9   :  { %v5164_v59 = vpop.eup %5163  ;;  %v2375_v29 = vmul.f32 0.5, %v5162_v14  ;;  %v7814_v14 = vld [vmem:[#allocation9_spill] sm:$0xff] }
 0x6ba   :  { %v2376_v56 = vmul.f32 0.5, %v5164_v59  ;;  %v5166_v21 = vpop.eup %5165  ;;  %v7815_v59 = vld [vmem:[#allocation10_spill] sm:$0xff] }
 0x6bb   :  { %v2378_v20 = vadd.f32 0.5, %v2375_v29  ;;  %v5168_v43 = vpop.eup %5167  ;;  %v7816_v29 = vld [vmem:[#allocation11_spill] sm:$0xff] }
 0x6bc   :  { %v2379_v57 = vadd.f32 0.5, %v2376_v56  ;;  %v2377_v42 = vmul.f32 0.5, %v5168_v43  ;;  %v7817_v56 = vld [vmem:[#allocation12_spill] sm:$0xff]  ;;  %v7823_v43 = vld [vmem:[#allocation18_spill] sm:$0xff] }
 0x6bd   :  { %v2383_v9 = vmul.f32 %v5166_v21, %v2378_v20  ;;  %v7818_v20 = vld [vmem:[#allocation13_spill] sm:$0xff]  ;;  %v7819_v21 = vld [vmem:[#allocation14_spill] sm:$0xff] }
 0x6be   :  { %v2382_v2 = vmul.f32 %v2379_v57, %v6856_v37  ;;  %v2381_v1 = vadd.f32 0.5, %v2377_v42  ;;  %v7810_v37 = vld [vmem:[#allocation5_spill] sm:$0xff]  ;;  %v7820_v57 = vld [vmem:[#allocation15_spill] sm:$0xff] }
 0x6bf   :  { %v7824_v42 = vld [vmem:[#allocation19_spill] sm:$0xff] }
 0x6c0   :  { %v6973_v47 = vadd.f32 %v2383_v9, %v2382_v2  ;;  %v7821_v9 = vld [vmem:[#allocation16_spill] sm:$0xff]  ;;  %v7822_v2 = vld [vmem:[#allocation17_spill] sm:$0xff] }
 0x6c2   :  { %5169 = vtanh.f32 %v6973_v47 }
 0x6cc   :  { %v5170_v38 = vpop.eup %5169 }
 0x6cd   :  { %v2386_v15 = vmul.f32 %v5170_v38, %v2381_v1  ;;  %v7825_v1 = vld [vmem:[#allocation20_spill] sm:$0xff]  ;;  %v7826_v38 = vld [vmem:[#allocation21_spill] sm:$0xff] }
 0x6cf   :  { %2452 = vmatmul.mubr.f32.vlgmr.msra.gmra.mrb[24].mxu0 %v2386_v15  ;;  %2523 = vmatmul.mubr.f32.vlgmr.msra.gmra.mrb[24].mxu1 %v2386_v15 }
 0x6d0   :  { %4653 = vmatpush1.bf16.msra.mxu0 %v5506_v49  ;;  %4685 = vmatpush1.bf16.msra.mxu1 %v5509_v50 }
 0x6d1   :  { %4655 = vmatprep.subr.bf16.mxu0 %v5511_v51  ;;  %4687 = vmatprep.subr.bf16.mxu1 %v5523_v55 }
 0x6d2   :  { %2612 = vmatprep.mubr.f32.mxu0 %v7490_v3  ;;  %2683 = vmatprep.mubr.f32.mxu1 %v7490_v3 }
 0x6d4   :  { %4657 = vmatpush1.bf16.msra.mxu0 %v5541_v61  ;;  %4689 = vmatpush1.bf16.msra.mxu1 %v5545_v62 }
 0x6d5   :  { %4659 = vmatprep.subr.bf16.mxu0 %v5547_v63  ;;  %4691 = vmatprep.subr.bf16.mxu1 %v5559_v4 }
 0x6d8   :  { %4661 = vmatpush1.bf16.msra.mxu0 %v5579_v10  ;;  %4693 = vmatpush1.bf16.msra.mxu1 %v5583_v11 }
 0x6d9   :  { %4663 = vmatprep.subr.bf16.mxu0 %v5585_v12  ;;  %4695 = vmatprep.subr.bf16.mxu1 %v5597_v16 }
 0x6dc   :  { %4665 = vmatpush1.bf16.msra.mxu0 %v5615_v22  ;;  %4697 = vmatpush1.bf16.msra.mxu1 %v5619_v23 }
 0x6dd   :  { %4667 = vmatprep.subr.bf16.mxu0 %v5621_v24  ;;  %4699 = vmatprep.subr.bf16.mxu1 %v5633_v28 }
 0x6e0   :  { %4669 = vmatpush1.bf16.msra.mxu0 %v5651_v34  ;;  %4701 = vmatpush1.bf16.msra.mxu1 %v5655_v35 }
 0x6e1   :  { %4671 = vmatprep.subr.bf16.mxu0 %v5657_v36  ;;  %4703 = vmatprep.subr.bf16.mxu1 %v5669_v41 }
 0x6e4   :  { %4673 = vmatpush1.bf16.msra.mxu0 %v5687_v48  ;;  %4705 = vmatpush1.bf16.msra.mxu1 %v5691_v52 }
 0x6e5   :  { %4675 = vmatprep.subr.bf16.mxu0 %v5693_v53  ;;  %4707 = vmatprep.subr.bf16.mxu1 %v5705_v58 }
 0x6e8   :  { %4677 = vmatpush1.bf16.msra.mxu0 %v5723_v5  ;;  %4709 = vmatpush1.bf16.msra.mxu1 %v5727_v6 }
 0x6e9   :  { %4679 = vmatprep.subr.bf16.mxu0 %v5729_v7  ;;  %4711 = vmatprep.subr.bf16.mxu1 %v5738_v13 }
 0x6ec   :  { %4681 = vmatpush1.bf16.msra.mxu0 %v5747_v17  ;;  %4713 = vmatpush1.bf16.msra.mxu1 %v5751_v18 }
 0x6ed   :  { %4715 = vmatprep.subr.bf16.mxu0 %v5769_v25  ;;  %4779 = vmatprep.subr.bf16.mxu1 %v5780_v30 }
 0x6ef   :  { %2613 = vmatmul.mubr.f32.vlgmr.msra.gmra.mrb[26].mxu0 %v2386_v15  ;;  %2684 = vmatmul.mubr.f32.vlgmr.msra.gmra.mrb[26].mxu1 %v2386_v15  ;;  %v7827_v15 = vld [vmem:[#allocation22_spill] sm:$0xff] }
 0x6f0   :  { %4717 = vmatpush1.bf16.msra.mxu0 %v5782_v31  ;;  %4781 = vmatpush1.bf16.msra.mxu1 %v5794_v39 }
 0x6f1   :  { %4719 = vmatprep.subr.bf16.mxu0 %v5807_v45  ;;  %4783 = vmatprep.subr.bf16.mxu1 %v5809_v46 }
 0x6f4   :  { %4721 = vmatpush1.bf16.msra.mxu0 %v7810_v37  ;;  %4785 = vmatpush1.bf16.msra.mxu1 %v7811_v40 }
 0x6f5   :  { %4723 = vmatprep.subr.bf16.mxu0 %v7812_v33  ;;  %4787 = vmatprep.subr.bf16.mxu1 %v7813_v26 }
 0x6f8   :  { %4725 = vmatpush1.bf16.msra.mxu0 %v7814_v14  ;;  %4789 = vmatpush1.bf16.msra.mxu1 %v7815_v59 }
 0x6f9   :  { %4727 = vmatprep.subr.bf16.mxu0 %v7816_v29  ;;  %4791 = vmatprep.subr.bf16.mxu1 %v7817_v56  ;;  %v7828_v56 = vld [vmem:[#allocation23_spill] sm:$0xff] }
 0x6fa   :  { %v7870_v29 = vld [vmem:[#allocation63_spill] sm:$0xff] }
 0x6fc   :  { %4729 = vmatpush1.bf16.msra.mxu0 %v7818_v20  ;;  %4793 = vmatpush1.bf16.msra.mxu1 %v7819_v21  ;;  %v7829_v20 = vld [vmem:[#allocation24_spill] sm:$0xff]  ;;  %v7830_v21 = vld [vmem:[#allocation25_spill] sm:$0xff] }
 0x6fd   :  { %4731 = vmatprep.subr.bf16.mxu0 %v7820_v57  ;;  %4795 = vmatprep.subr.bf16.mxu1 %v7821_v9  ;;  %v7831_v57 = vld [vmem:[#allocation26_spill] sm:$0xff]  ;;  %v7832_v9 = vld [vmem:[#allocation27_spill] sm:$0xff] }
 0x700   :  { %4733 = vmatpush1.bf16.msra.mxu0 %v7822_v2  ;;  %4797 = vmatpush1.bf16.msra.mxu1 %v7823_v43  ;;  %v7833_v2 = vld [vmem:[#allocation28_spill] sm:$0xff]  ;;  %v7834_v43 = vld [vmem:[#allocation29_spill] sm:$0xff] }
 0x701   :  { %4735 = vmatprep.subr.bf16.mxu0 %v7824_v42  ;;  %4799 = vmatprep.subr.bf16.mxu1 %v7825_v1  ;;  %v7835_v42 = vld [vmem:[#allocation30_spill] sm:$0xff]  ;;  %v7836_v1 = vld [vmem:[#allocation31_spill] sm:$0xff] }
 0x704   :  { %4737 = vmatpush1.bf16.msra.mxu0 %v7826_v38  ;;  %4801 = vmatpush1.bf16.msra.mxu1 %v7827_v15  ;;  %v7837_v38 = vld [vmem:[#allocation32_spill] sm:$0xff]  ;;  %v7838_v15 = vld [vmem:[#allocation33_spill] sm:$0xff] }
 0x705   :  { %4739 = vmatprep.subr.bf16.mxu0 %v7828_v56  ;;  %4803 = vmatprep.subr.bf16.mxu1 %v7829_v20  ;;  %v7839_v56 = vld [vmem:[#allocation34_spill] sm:$0xff]  ;;  %v7840_v20 = vld [vmem:[#allocation35_spill] sm:$0xff] }
 0x708   :  { %4741 = vmatpush1.bf16.msra.mxu0 %v7830_v21  ;;  %4805 = vmatpush1.bf16.msra.mxu1 %v7831_v57  ;;  %v7841_v21 = vld [vmem:[#allocation36_spill] sm:$0xff]  ;;  %v7842_v57 = vld [vmem:[#allocation37_spill] sm:$0xff] }
 0x709   :  { %4743 = vmatprep.subr.bf16.mxu0 %v7832_v9  ;;  %4807 = vmatprep.subr.bf16.mxu1 %v7833_v2  ;;  %v7843_v9 = vld [vmem:[#allocation38_spill] sm:$0xff]  ;;  %v7844_v2 = vld [vmem:[#allocation39_spill] sm:$0xff] }
 0x70c   :  { %4745 = vmatpush1.bf16.msra.mxu0 %v7834_v43  ;;  %4809 = vmatpush1.bf16.msra.mxu1 %v7835_v42  ;;  %v7845_v43 = vld [vmem:[#allocation40_spill] sm:$0xff]  ;;  %v7846_v42 = vld [vmem:[#allocation41_spill] sm:$0xff] }
 0x70d   :  { %4747 = vmatprep.subr.bf16.mxu0 %v7836_v1  ;;  %4811 = vmatprep.subr.bf16.mxu1 %v7837_v38  ;;  %v7847_v1 = vld [vmem:[#allocation42_spill] sm:$0xff]  ;;  %v7848_v38 = vld [vmem:[#allocation43_spill] sm:$0xff] }
 0x710   :  { %4749 = vmatpush1.bf16.msra.mxu0 %v7838_v15  ;;  %4813 = vmatpush1.bf16.msra.mxu1 %v7839_v56  ;;  %v7849_v15 = vld [vmem:[#allocation44_spill] sm:$0xff]  ;;  %v7850_v56 = vld [vmem:[#allocation45_spill] sm:$0xff] }
 0x711   :  { %4751 = vmatprep.subr.bf16.mxu0 %v7840_v20  ;;  %4815 = vmatprep.subr.bf16.mxu1 %v7841_v21  ;;  %v7851_v20 = vld [vmem:[#allocation46_spill] sm:$0xff]  ;;  %v7852_v21 = vld [vmem:[#allocation47_spill] sm:$0xff] }
 0x714   :  { %4753 = vmatpush1.bf16.msra.mxu0 %v7842_v57  ;;  %4817 = vmatpush1.bf16.msra.mxu1 %v7843_v9  ;;  %v7853_v57 = vld [vmem:[#allocation48_spill] sm:$0xff]  ;;  %v7854_v9 = vld [vmem:[#allocation49_spill] sm:$0xff] }
 0x715   :  { %4755 = vmatprep.subr.bf16.mxu0 %v7844_v2  ;;  %4819 = vmatprep.subr.bf16.mxu1 %v7845_v43  ;;  %v7855_v2 = vld [vmem:[#allocation50_spill] sm:$0xff]  ;;  %v7856_v43 = vld [vmem:[#allocation51_spill] sm:$0xff] }
 0x718   :  { %4757 = vmatpush1.bf16.msra.mxu0 %v7846_v42  ;;  %4821 = vmatpush1.bf16.msra.mxu1 %v7847_v1  ;;  %v7857_v42 = vld [vmem:[#allocation52_spill] sm:$0xff]  ;;  %v7858_v1 = vld [vmem:[#allocation53_spill] sm:$0xff] }
 0x719   :  { %4759 = vmatprep.subr.bf16.mxu0 %v7848_v38  ;;  %4823 = vmatprep.subr.bf16.mxu1 %v7849_v15  ;;  %v7859_v38 = vld [vmem:[#allocation54_spill] sm:$0xff]  ;;  %v7860_v15 = vld [vmem:[#allocation55_spill] sm:$0xff] }
 0x71c   :  { %4761 = vmatpush1.bf16.msra.mxu0 %v7850_v56  ;;  %4825 = vmatpush1.bf16.msra.mxu1 %v7851_v20  ;;  %v7861_v56 = vld [vmem:[#allocation56_spill] sm:$0xff]  ;;  %v7862_v20 = vld [vmem:[#allocation57_spill] sm:$0xff] }
 0x71d   :  { %4763 = vmatprep.subr.bf16.mxu0 %v7852_v21  ;;  %4827 = vmatprep.subr.bf16.mxu1 %v7853_v57  ;;  %v7863_v21 = vld [vmem:[#allocation58_spill] sm:$0xff]  ;;  %v7864_v57 = vld [vmem:[#allocation59_spill] sm:$0xff] }
 0x720   :  { %4765 = vmatpush1.bf16.msra.mxu0 %v7854_v9  ;;  %4829 = vmatpush1.bf16.msra.mxu1 %v7855_v2  ;;  %v7865_v9 = vld [vmem:[#allocation60_spill] sm:$0xff]  ;;  %v7866_v2 = vld [vmem:[#allocation61_spill] sm:$0xff] }
 0x721   :  { %4767 = vmatprep.subr.bf16.mxu0 %v7856_v43  ;;  %4831 = vmatprep.subr.bf16.mxu1 %v7857_v42  ;;  %v7867_v43 = vld [vmem:[#allocation62_spill] sm:$0xff] }
 0x722   :  { %v7868_v42 = vld [vmem:[#allocation2_spill] sm:$0xff] }
 0x724   :  { %4769 = vmatpush1.bf16.msra.mxu0 %v7858_v1  ;;  %4833 = vmatpush1.bf16.msra.mxu1 %v7859_v38  ;;  %v7869_v1 = vld [vmem:[#allocation3_spill] sm:$0xff] }
 0x725   :  { %4771 = vmatprep.subr.bf16.mxu0 %v7860_v15  ;;  %4835 = vmatprep.subr.bf16.mxu1 %v7861_v56 }
 0x728   :  { %4773 = vmatpush1.bf16.msra.mxu0 %v7862_v20  ;;  %4837 = vmatpush1.bf16.msra.mxu1 %v7863_v21 }
 0x729   :  { %4775 = vmatprep.subr.bf16.mxu0 %v7864_v57  ;;  %4839 = vmatprep.subr.bf16.mxu1 %v7865_v9 }
 0x72c   :  { %4777 = vmatpush1.bf16.msra.mxu0 %v7866_v2  ;;  %4841 = vmatpush1.bf16.msra.mxu1 %v7867_v43  ;;  %v7871_v43 = vld [vmem:[#allocation69_spill] sm:$0xff] }
 0x72d   :  { %4843 = vmatprep.subr.bf16.mxu0 %v7868_v42  ;;  %4875 = vmatprep.subr.bf16.mxu1 %v7869_v1 }
 0x7a2   :  { %v2453_v38 = vpop.f32.mrb[24].mxu0  ;;  %v2524_v15 = vpop.f32.mrb[24].mxu1 }
 0x7a3   :  { %v2454_v56 = vadd.f32 %v2453_v38, %v7870_v29  ;;  %v2455_v59 = vpop.f32.mrb[25].mxu0  ;;  %v2526_v20 = vpop.f32.mrb[25].mxu1  ;;  %v2525_v9 = vadd.f32 %v2524_v15, %v7743_v54 }
 0x7a4   :  { %v2456_v21 = vadd.f32 %v2455_v59, %v7742_v8  ;;  %v2527_v2 = vadd.f32 %v2526_v20, %v7871_v43 }
 0x7a5   :  { %v2529_v14 = vmul.f32 0.5, %v2454_v56 }
 0x7a6   :  { %v2530_v57 = vmul.f32 0.5, %v2456_v21  ;;  %v2531_v42 = vmul.f32 0.5, %v2527_v2 }
 0x7a7   :  { %5171 = vtanh.f32 %v2529_v14 }
 0x7a8   :  { %5173 = vtanh.f32 %v2530_v57 }
 0x7a9   :  { %5175 = vtanh.f32 %v2525_v9 }
 0x7aa   :  { %5177 = vtanh.f32 %v2531_v42 }
 0x7b1   :  { %v5172_v26 = vpop.eup %5171 }
 0x7b2   :  { %v5174_v1 = vpop.eup %5173  ;;  %v2536_v33 = vmul.f32 0.5, %v5172_v26 }
 0x7b3   :  { %v2537_v40 = vmul.f32 0.5, %v5174_v1  ;;  %v5176_v29 = vpop.eup %5175 }
 0x7b4   :  { %v2539_v38 = vadd.f32 0.5, %v2536_v33  ;;  %v5178_v14 = vpop.eup %5177 }
 0x7b5   :  { %v2540_v37 = vadd.f32 0.5, %v2537_v40  ;;  %v2538_v21 = vmul.f32 0.5, %v5178_v14 }
 0x7b6   :  { %v2544_v46 = vmul.f32 %v5176_v29, %v2539_v38 }
 0x7b7   :  { %v2543_v59 = vmul.f32 %v2540_v37, %v6962_v27  ;;  %v2542_v1 = vadd.f32 0.5, %v2538_v21 }
 0x7b9   :  { %v7079_v56 = vadd.f32 %v2544_v46, %v2543_v59 }
 0x7bb   :  { %5179 = vtanh.f32 %v7079_v56 }
 0x7c2   :  { %v2614_v57 = vpop.f32.mrb[26].mxu0  ;;  %v2685_v20 = vpop.f32.mrb[26].mxu1 }
 0x7c3   :  { %v2694_v9 = vrot.slane %v2614_v57, 2  ;;  %v2696_v2 = vrot.slane %v2685_v20, 2  ;;  %v2616_v15 = vpop.f32.mrb[27].mxu0  ;;  %v2687_v26 = vpop.f32.mrb[27].mxu1 }
 0x7c4   :  { %v2695_v42 = vrot.slane %v2616_v15, 2  ;;  %v2697_v38 = vrot.slane %v2687_v26, 2 }
 0x7c5   :  { %v5180_v33 = vpop.eup %5179  ;;  %v2702_v40 = vadd.f32 %v2694_v9, %v7553_v60  ;;  %v2704_v37 = vadd.f32 %v2696_v2, %v7747_v0 }
 0x7c6   :  { %v2703_v29 = vadd.f32 %v2695_v42, %v7680_v19  ;;  %v2547_v27 = vmul.f32 %v5180_v33, %v2542_v1  ;;  %v2705_v9 = vadd.f32 %v2697_v38, %v6364_v32 }
 0x7c7   :  { %v2710_v46 = vrot.slane %v2702_v40, 6  ;;  %v2712_v15 = vrot.slane %v2704_v37, 6 }
 0x7c8   :  { %v2711_v59 = vrot.slane %v2703_v29, 6  ;;  %2801 = vmatprep.mubr.f32.mxu0 %v2547_v27  ;;  %v3261_v14 = vrot.slane %v2547_v27, 3  ;;  %2872 = vmatprep.mubr.f32.mxu1 %v2547_v27  ;;  %v2713_v1 = vrot.slane %v2705_v9, 6  ;;  %v7908_v9 = vld [vmem:[#allocation40_spill] sm:$0xff] }
 0x7c9   :  { %v2718_v57 = vmul.f32 0.5, %v2710_v46 }
 0x7ca   :  { %v2719_v20 = vmul.f32 0.5, %v2711_v59  ;;  %v7086_v21 = vsel %vm3277_vm4, %v6969_v44, %v3261_v14  ;;  %v2720_v42 = vmul.f32 0.5, %v2713_v1  ;;  %v7909_v1 = vld [vmem:[#allocation41_spill] sm:$0xff] }
 0x7cb   :  { %5181 = vtanh.f32 %v2718_v57 }
 0x7cc   :  { %5183 = vtanh.f32 %v2719_v20 }
 0x7cd   :  { %5185 = vtanh.f32 %v2712_v15 }
 0x7ce   :  { %5187 = vtanh.f32 %v2720_v42  ;;  %v7910_v42 = vld [vmem:[#allocation42_spill] sm:$0xff] }
 0x7d5   :  { %v5182_v2 = vpop.eup %5181 }
 0x7d6   :  { %v5184_v26 = vpop.eup %5183  ;;  %v2725_v33 = vmul.f32 0.5, %v5182_v2  ;;  %v7911_v2 = vld [vmem:[#allocation43_spill] sm:$0xff] }
 0x7d7   :  { %v2726_v40 = vmul.f32 0.5, %v5184_v26  ;;  %v5186_v27 = vpop.eup %5185  ;;  %v7912_v26 = vld [vmem:[#allocation44_spill] sm:$0xff] }
 0x7d8   :  { %v2728_v29 = vadd.f32 0.5, %v2725_v33  ;;  %v5188_v37 = vpop.eup %5187  ;;  %v7913_v33 = vld [vmem:[#allocation45_spill] sm:$0xff] }
 0x7d9   :  { %v2729_v46 = vadd.f32 0.5, %v2726_v40  ;;  %v2727_v38 = vmul.f32 0.5, %v5188_v37  ;;  %v7914_v40 = vld [vmem:[#allocation46_spill] sm:$0xff]  ;;  %v7920_v37 = vld [vmem:[#allocation52_spill] sm:$0xff] }
 0x7da   :  { %v2733_v59 = vmul.f32 %v5186_v27, %v2728_v29  ;;  %v7915_v29 = vld [vmem:[#allocation47_spill] sm:$0xff]  ;;  %v7916_v27 = vld [vmem:[#allocation48_spill] sm:$0xff] }
 0x7db   :  { %v2732_v44 = vmul.f32 %v2729_v46, %v6973_v47  ;;  %v2731_v57 = vadd.f32 0.5, %v2727_v38  ;;  %v7907_v47 = vld [vmem:[#allocation39_spill] sm:$0xff]  ;;  %v7917_v46 = vld [vmem:[#allocation49_spill] sm:$0xff] }
 0x7dc   :  { %v7921_v38 = vld [vmem:[#allocation53_spill] sm:$0xff] }
 0x7dd   :  { %v7090_v14 = vadd.f32 %v2733_v59, %v2732_v44  ;;  %v7918_v59 = vld [vmem:[#allocation50_spill] sm:$0xff]  ;;  %v7919_v44 = vld [vmem:[#allocation51_spill] sm:$0xff] }
 0x7df   :  { %5189 = vtanh.f32 %v7090_v14 }
 0x7e9   :  { %v5190_v20 = vpop.eup %5189 }
 0x7ea   :  { %v2736_v15 = vmul.f32 %v5190_v20, %v2731_v57  ;;  %v7922_v57 = vld [vmem:[#allocation54_spill] sm:$0xff]  ;;  %v7923_v20 = vld [vmem:[#allocation55_spill] sm:$0xff] }
 0x7ec   :  { %2802 = vmatmul.mubr.f32.vlgmr.msra.gmra.mrb[28].mxu0 %v2736_v15  ;;  %2873 = vmatmul.mubr.f32.vlgmr.msra.gmra.mrb[28].mxu1 %v2736_v15 }
 0x7ed   :  { %4845 = vmatpush1.bf16.msra.mxu0 %v5506_v49  ;;  %4877 = vmatpush1.bf16.msra.mxu1 %v5509_v50  ;;  %v7872_v49 = vld [vmem:[#allocation4_spill] sm:$0xff]  ;;  %v7873_v50 = vld [vmem:[#allocation5_spill] sm:$0xff] }
 0x7ee   :  { %4847 = vmatprep.subr.bf16.mxu0 %v5511_v51  ;;  %4879 = vmatprep.subr.bf16.mxu1 %v5523_v55  ;;  %v7874_v51 = vld [vmem:[#allocation6_spill] sm:$0xff]  ;;  %v7875_v55 = vld [vmem:[#allocation7_spill] sm:$0xff] }
 0x7ef   :  { %2962 = vmatprep.mubr.f32.mxu0 %v7490_v3  ;;  %3033 = vmatprep.mubr.f32.mxu1 %v7490_v3 }
 0x7f1   :  { %4849 = vmatpush1.bf16.msra.mxu0 %v5541_v61  ;;  %4881 = vmatpush1.bf16.msra.mxu1 %v5545_v62  ;;  %v7876_v61 = vld [vmem:[#allocation8_spill] sm:$0xff]  ;;  %v7877_v62 = vld [vmem:[#allocation9_spill] sm:$0xff] }
 0x7f2   :  { %4851 = vmatprep.subr.bf16.mxu0 %v5547_v63  ;;  %4883 = vmatprep.subr.bf16.mxu1 %v5559_v4  ;;  %v7878_v63 = vld [vmem:[#allocation10_spill] sm:$0xff]  ;;  %v7879_v4 = vld [vmem:[#allocation11_spill] sm:$0xff] }
 0x7f5   :  { %4853 = vmatpush1.bf16.msra.mxu0 %v5579_v10  ;;  %4885 = vmatpush1.bf16.msra.mxu1 %v5583_v11  ;;  %v7880_v10 = vld [vmem:[#allocation12_spill] sm:$0xff]  ;;  %v7881_v11 = vld [vmem:[#allocation13_spill] sm:$0xff] }
 0x7f6   :  { %4855 = vmatprep.subr.bf16.mxu0 %v5585_v12  ;;  %4887 = vmatprep.subr.bf16.mxu1 %v5597_v16  ;;  %v7882_v12 = vld [vmem:[#allocation14_spill] sm:$0xff]  ;;  %v7883_v16 = vld [vmem:[#allocation15_spill] sm:$0xff] }
 0x7f9   :  { %4857 = vmatpush1.bf16.msra.mxu0 %v5615_v22  ;;  %4889 = vmatpush1.bf16.msra.mxu1 %v5619_v23  ;;  %v7884_v22 = vld [vmem:[#allocation16_spill] sm:$0xff]  ;;  %v7885_v23 = vld [vmem:[#allocation17_spill] sm:$0xff] }
 0x7fa   :  { %4859 = vmatprep.subr.bf16.mxu0 %v5621_v24  ;;  %4891 = vmatprep.subr.bf16.mxu1 %v5633_v28  ;;  %v7886_v24 = vld [vmem:[#allocation18_spill] sm:$0xff]  ;;  %v7887_v28 = vld [vmem:[#allocation19_spill] sm:$0xff] }
 0x7fd   :  { %4861 = vmatpush1.bf16.msra.mxu0 %v5651_v34  ;;  %4893 = vmatpush1.bf16.msra.mxu1 %v5655_v35  ;;  %v7888_v34 = vld [vmem:[#allocation20_spill] sm:$0xff]  ;;  %v7889_v35 = vld [vmem:[#allocation21_spill] sm:$0xff] }
 0x7fe   :  { %4863 = vmatprep.subr.bf16.mxu0 %v5657_v36  ;;  %4895 = vmatprep.subr.bf16.mxu1 %v5669_v41  ;;  %v7890_v36 = vld [vmem:[#allocation22_spill] sm:$0xff]  ;;  %v7891_v41 = vld [vmem:[#allocation23_spill] sm:$0xff] }
 0x801   :  { %4865 = vmatpush1.bf16.msra.mxu0 %v5687_v48  ;;  %4897 = vmatpush1.bf16.msra.mxu1 %v5691_v52  ;;  %v7892_v48 = vld [vmem:[#allocation24_spill] sm:$0xff]  ;;  %v7893_v52 = vld [vmem:[#allocation25_spill] sm:$0xff] }
 0x802   :  { %4867 = vmatprep.subr.bf16.mxu0 %v5693_v53  ;;  %4899 = vmatprep.subr.bf16.mxu1 %v5705_v58  ;;  %v7894_v53 = vld [vmem:[#allocation26_spill] sm:$0xff]  ;;  %v7895_v58 = vld [vmem:[#allocation27_spill] sm:$0xff] }
 0x805   :  { %4869 = vmatpush1.bf16.msra.mxu0 %v5723_v5  ;;  %4901 = vmatpush1.bf16.msra.mxu1 %v5727_v6  ;;  %v7896_v5 = vld [vmem:[#allocation28_spill] sm:$0xff]  ;;  %v7897_v6 = vld [vmem:[#allocation29_spill] sm:$0xff] }
 0x806   :  { %4871 = vmatprep.subr.bf16.mxu0 %v5729_v7  ;;  %4903 = vmatprep.subr.bf16.mxu1 %v5738_v13  ;;  %v7898_v7 = vld [vmem:[#allocation30_spill] sm:$0xff]  ;;  %v7899_v13 = vld [vmem:[#allocation31_spill] sm:$0xff] }
 0x809   :  { %4873 = vmatpush1.bf16.msra.mxu0 %v5747_v17  ;;  %4905 = vmatpush1.bf16.msra.mxu1 %v5751_v18  ;;  %v7900_v17 = vld [vmem:[#allocation32_spill] sm:$0xff]  ;;  %v7901_v18 = vld [vmem:[#allocation33_spill] sm:$0xff] }
 0x80a   :  { %4907 = vmatprep.subr.bf16.mxu0 %v5769_v25  ;;  %4971 = vmatprep.subr.bf16.mxu1 %v5780_v30  ;;  %v7902_v25 = vld [vmem:[#allocation34_spill] sm:$0xff]  ;;  %v7903_v30 = vld [vmem:[#allocation35_spill] sm:$0xff] }
 0x80c   :  { %2963 = vmatmul.mubr.f32.vlgmr.msra.gmra.mrb[30].mxu0 %v2736_v15  ;;  %3034 = vmatmul.mubr.f32.vlgmr.msra.gmra.mrb[30].mxu1 %v2736_v15  ;;  %v7924_v15 = vld [vmem:[#allocation56_spill] sm:$0xff] }
 0x80d   :  { %4909 = vmatpush1.bf16.msra.mxu0 %v5782_v31  ;;  %4973 = vmatpush1.bf16.msra.mxu1 %v5794_v39  ;;  %v7904_v31 = vld [vmem:[#allocation36_spill] sm:$0xff]  ;;  %v7905_v39 = vld [vmem:[#allocation37_spill] sm:$0xff] }
 0x80e   :  { %4911 = vmatprep.subr.bf16.mxu0 %v5807_v45  ;;  %4975 = vmatprep.subr.bf16.mxu1 %v7872_v49  ;;  %v7906_v45 = vld [vmem:[#allocation38_spill] sm:$0xff]  ;;  %v7925_v49 = vld [vmem:[#allocation57_spill] sm:$0xff] }
 0x811   :  { %4913 = vmatpush1.bf16.msra.mxu0 %v7873_v50  ;;  %4977 = vmatpush1.bf16.msra.mxu1 %v7874_v51  ;;  %v7926_v50 = vld [vmem:[#allocation58_spill] sm:$0xff]  ;;  %v7927_v51 = vld [vmem:[#allocation59_spill] sm:$0xff] }
 0x812   :  { %4915 = vmatprep.subr.bf16.mxu0 %v7875_v55  ;;  %4979 = vmatprep.subr.bf16.mxu1 %v7876_v61  ;;  %v7928_v55 = vld [vmem:[#allocation60_spill] sm:$0xff]  ;;  %v7929_v61 = vld [vmem:[#allocation61_spill] sm:$0xff] }
 0x815   :  { %4917 = vmatpush1.bf16.msra.mxu0 %v7877_v62  ;;  %4981 = vmatpush1.bf16.msra.mxu1 %v7878_v63  ;;  %v7930_v62 = vld [vmem:[#allocation62_spill] sm:$0xff] }
 0x816   :  { %4919 = vmatprep.subr.bf16.mxu0 %v7879_v4  ;;  %4983 = vmatprep.subr.bf16.mxu1 %v7880_v10  ;;  %v7931_v10 = vld [vmem:[#allocation63_spill] sm:$0xff] }
 0x819   :  { %4921 = vmatpush1.bf16.msra.mxu0 %v7881_v11  ;;  %4985 = vmatpush1.bf16.msra.mxu1 %v7882_v12 }
 0x81a   :  { %4923 = vmatprep.subr.bf16.mxu0 %v7883_v16  ;;  %4987 = vmatprep.subr.bf16.mxu1 %v7884_v22 }
 0x81d   :  { %4925 = vmatpush1.bf16.msra.mxu0 %v7885_v23  ;;  %4989 = vmatpush1.bf16.msra.mxu1 %v7886_v24 }
 0x81e   :  { %4927 = vmatprep.subr.bf16.mxu0 %v7887_v28  ;;  %4991 = vmatprep.subr.bf16.mxu1 %v7888_v34 }
 0x821   :  { %4929 = vmatpush1.bf16.msra.mxu0 %v7889_v35  ;;  %4993 = vmatpush1.bf16.msra.mxu1 %v7890_v36 }
 0x822   :  { %4931 = vmatprep.subr.bf16.mxu0 %v7891_v41  ;;  %4995 = vmatprep.subr.bf16.mxu1 %v7892_v48 }
 0x825   :  { %4933 = vmatpush1.bf16.msra.mxu0 %v7893_v52  ;;  %4997 = vmatpush1.bf16.msra.mxu1 %v7894_v53 }
 0x826   :  { %4935 = vmatprep.subr.bf16.mxu0 %v7895_v58  ;;  %4999 = vmatprep.subr.bf16.mxu1 %v7896_v5 }
 0x829   :  { %4937 = vmatpush1.bf16.msra.mxu0 %v7897_v6  ;;  %5001 = vmatpush1.bf16.msra.mxu1 %v7898_v7 }
 0x82a   :  { %4939 = vmatprep.subr.bf16.mxu0 %v7899_v13  ;;  %5003 = vmatprep.subr.bf16.mxu1 %v7900_v17 }
 0x82d   :  { %4941 = vmatpush1.bf16.msra.mxu0 %v7901_v18  ;;  %5005 = vmatpush1.bf16.msra.mxu1 %v7902_v25 }
 0x82e   :  { %4943 = vmatprep.subr.bf16.mxu0 %v7903_v30  ;;  %5007 = vmatprep.subr.bf16.mxu1 %v7904_v31 }
 0x831   :  { %4945 = vmatpush1.bf16.msra.mxu0 %v7905_v39  ;;  %5009 = vmatpush1.bf16.msra.mxu1 %v7906_v45 }
 0x832   :  { %4947 = vmatprep.subr.bf16.mxu0 %v7907_v47  ;;  %5011 = vmatprep.subr.bf16.mxu1 %v7908_v9 }
 0x835   :  { %4949 = vmatpush1.bf16.msra.mxu0 %v7909_v1  ;;  %5013 = vmatpush1.bf16.msra.mxu1 %v7910_v42 }
 0x836   :  { %4951 = vmatprep.subr.bf16.mxu0 %v7911_v2  ;;  %5015 = vmatprep.subr.bf16.mxu1 %v7912_v26 }
 0x839   :  { %4953 = vmatpush1.bf16.msra.mxu0 %v7913_v33  ;;  %5017 = vmatpush1.bf16.msra.mxu1 %v7914_v40 }
 0x83a   :  { %4955 = vmatprep.subr.bf16.mxu0 %v7915_v29  ;;  %5019 = vmatprep.subr.bf16.mxu1 %v7916_v27 }
 0x83d   :  { %4957 = vmatpush1.bf16.msra.mxu0 %v7917_v46  ;;  %5021 = vmatpush1.bf16.msra.mxu1 %v7918_v59 }
 0x83e   :  { %4959 = vmatprep.subr.bf16.mxu0 %v7919_v44  ;;  %5023 = vmatprep.subr.bf16.mxu1 %v7920_v37 }
 0x841   :  { %4961 = vmatpush1.bf16.msra.mxu0 %v7921_v38  ;;  %5025 = vmatpush1.bf16.msra.mxu1 %v7922_v57 }
 0x842   :  { %4963 = vmatprep.subr.bf16.mxu0 %v7923_v20  ;;  %5027 = vmatprep.subr.bf16.mxu1 %v7924_v15 }
 0x845   :  { %4965 = vmatpush1.bf16.msra.mxu0 %v7925_v49  ;;  %5029 = vmatpush1.bf16.msra.mxu1 %v7926_v50 }
 0x846   :  { %4967 = vmatprep.subr.bf16.mxu0 %v7927_v51  ;;  %5031 = vmatprep.subr.bf16.mxu1 %v7928_v55 }
 0x849   :  { %4969 = vmatpush1.bf16.msra.mxu0 %v7929_v61  ;;  %5033 = vmatpush1.bf16.msra.mxu1 %v7930_v62 }
 0x8bf   :  { %v2803_v63 = vpop.f32.mrb[28].mxu0  ;;  %v2874_v4 = vpop.f32.mrb[28].mxu1 }
 0x8c0   :  { %v2804_v11 = vadd.f32 %v2803_v63, %v7931_v10  ;;  %v2805_v12 = vpop.f32.mrb[29].mxu0  ;;  %v2876_v16 = vpop.f32.mrb[29].mxu1  ;;  %v2875_v28 = vadd.f32 %v2874_v4, %v7743_v54 }
 0x8c1   :  { %v2806_v22 = vadd.f32 %v2805_v12, %v7742_v8  ;;  %v2877_v34 = vadd.f32 %v2876_v16, %v7871_v43  ;;  %v3283_v16 = vld [vmem:[%s7272_s6] sm:$0xff] }
 0x8c2   :  { %v2879_v23 = vmul.f32 0.5, %v2804_v11 }
 0x8c3   :  { %v2880_v24 = vmul.f32 0.5, %v2806_v22  ;;  %v2881_v35 = vmul.f32 0.5, %v2877_v34  ;;  %v3284_v22 = vld [vmem:[%s7272_s6 + $0x8] sm:$0xff] }
 0x8c4   :  { %5191 = vtanh.f32 %v2879_v23  ;;  %v5035_v23 = vpack.c.bf16 %v3284_v22, %v3283_v16 }
 0x8c5   :  { %5193 = vtanh.f32 %v2880_v24  ;;  %v5222_v24 = vmov 0.0|0.0  }
 0x8c6   :  { %5195 = vtanh.f32 %v2875_v28  ;;  %5034 = vmatprep.subr.bf16.mxu0 %v5222_v24  ;;  %v3286_v28 = vld [vmem:[%s7272_s6 + $0x18] sm:$0xff] }
 0x8c7   :  { %5197 = vtanh.f32 %v2881_v35  ;;  %v3287_v35 = vld [vmem:[%s7272_s6 + $0x20] sm:$0xff] }
 0x8ce   :  { %v5192_v36 = vpop.eup %5191 }
 0x8cf   :  { %v5194_v41 = vpop.eup %5193  ;;  %v2886_v48 = vmul.f32 0.5, %v5192_v36  ;;  %v3288_v36 = vld [vmem:[%s7272_s6 + $0x28] sm:$0xff] }
 0x8d0   :  { %v2887_v52 = vmul.f32 0.5, %v5194_v41  ;;  %v5196_v58 = vpop.eup %5195  ;;  %v5041_v41 = vpack.c.bf16 %v3288_v36, %v3287_v35 }
 0x8d1   :  { %v2889_v53 = vadd.f32 0.5, %v2886_v48  ;;  %v5198_v17 = vpop.eup %5197  ;;  %v3289_v48 = vld [vmem:[%s7272_s6 + $0x30] sm:$0xff] }
 0x8d2   :  { %v2890_v5 = vadd.f32 0.5, %v2887_v52  ;;  %v2888_v18 = vmul.f32 0.5, %v5198_v17  ;;  %v3290_v52 = vld [vmem:[%s7272_s6 + $0x38] sm:$0xff] }
 0x8d3   :  { %v2894_v6 = vmul.f32 %v5196_v58, %v2889_v53  ;;  %v5044_v53 = vpack.c.bf16 %v3290_v52, %v3289_v48  ;;  %v3291_v58 = vld [vmem:[%s7272_s6 + $0x40] sm:$0xff]  ;;  %v3294_v17 = vld [vmem:[%s7272_s6 + $0x58] sm:$0xff] }
 0x8d4   :  { %v2893_v7 = vmul.f32 %v2890_v5, %v7079_v56  ;;  %v2892_v9 = vadd.f32 0.5, %v2888_v18  ;;  %v3292_v5 = vld [vmem:[%s7272_s6 + $0x48] sm:$0xff] }
 0x8d6   :  { %v7194_v13 = vadd.f32 %v2894_v6, %v2893_v7  ;;  %v5047_v6 = vpack.c.bf16 %v3292_v5, %v3291_v58  ;;  %v3293_v7 = vld [vmem:[%s7272_s6 + $0x50] sm:$0xff] }
 0x8d7   :  { %v5050_v18 = vpack.c.bf16 %v3294_v17, %v3293_v7 }
 0x8d8   :  { %5199 = vtanh.f32 %v7194_v13 }
 0x8df   :  { %v2964_v25 = vpop.f32.mrb[30].mxu0  ;;  %v3035_v30 = vpop.f32.mrb[30].mxu1 }
 0x8e0   :  { %v3044_v31 = vrot.slane %v2964_v25, 1  ;;  %v3046_v39 = vrot.slane %v3035_v30, 1  ;;  %v2966_v45 = vpop.f32.mrb[31].mxu0  ;;  %v3037_v47 = vpop.f32.mrb[31].mxu1  ;;  %v3295_v25 = vld [vmem:[%s7272_s6 + $0x60] sm:$0xff]  ;;  %v3296_v30 = vld [vmem:[%s7272_s6 + $0x68] sm:$0xff] }
 0x8e1   :  { %v3045_v1 = vrot.slane %v2966_v45, 1  ;;  %v3047_v29 = vrot.slane %v3037_v47, 1  ;;  %v3298_v45 = vld [vmem:[%s7272_s6 + $0x78] sm:$0xff] }
 0x8e2   :  { %v5200_v42 = vpop.eup %5199  ;;  %v3052_v2 = vadd.f32 %v3044_v31, %v7553_v60  ;;  %v3054_v40 = vadd.f32 %v3046_v39, %v7747_v0  ;;  %v5053_v31 = vpack.c.bf16 %v3296_v30, %v3295_v25  ;;  %v3297_v39 = vld [vmem:[%s7272_s6 + $0x70] sm:$0xff] }
 0x8e3   :  { %v3053_v26 = vadd.f32 %v3045_v1, %v7680_v19  ;;  %v2897_v56 = vmul.f32 %v5200_v42, %v2892_v9  ;;  %v3055_v60 = vadd.f32 %v3047_v29, %v6364_v32  ;;  %v5056_v47 = vpack.c.bf16 %v3298_v45, %v3297_v39 }
 0x8e4   :  { %v3060_v33 = vrot.slane %v3052_v2, 7  ;;  %v3062_v38 = vrot.slane %v3054_v40, 7 }
 0x8e5   :  { %v3061_v27 = vrot.slane %v3053_v26, 7  ;;  %3151 = vmatprep.mubr.f32.mxu0 %v2897_v56  ;;  %v3264_v46 = vrot.slane %v2897_v56, 2  ;;  %3222 = vmatprep.mubr.f32.mxu1 %v2897_v56  ;;  %v3063_v19 = vrot.slane %v3055_v60, 7 }
 0x8e6   :  { %v3068_v59 = vmul.f32 0.5, %v3060_v33 }
 0x8e7   :  { %v3069_v44 = vmul.f32 0.5, %v3061_v27  ;;  %v7201_v37 = vsel %vm3279_vm5, %v7086_v21, %v3264_v46  ;;  %v3070_v57 = vmul.f32 0.5, %v3063_v19 }
 0x8e8   :  { %5201 = vtanh.f32 %v3068_v59 }
 0x8e9   :  { %5203 = vtanh.f32 %v3069_v44 }
 0x8ea   :  { %5205 = vtanh.f32 %v3062_v38 }
 0x8eb   :  { %5207 = vtanh.f32 %v3070_v57 }
 0x8f2   :  { %v5202_v0 = vpop.eup %5201 }
 0x8f3   :  { %v5204_v20 = vpop.eup %5203  ;;  %v3075_v15 = vmul.f32 0.5, %v5202_v0 }
 0x8f4   :  { %v3076_v49 = vmul.f32 0.5, %v5204_v20  ;;  %v5206_v51 = vpop.eup %5205 }
 0x8f5   :  { %v3078_v50 = vadd.f32 0.5, %v3075_v15  ;;  %v5208_v63 = vpop.eup %5207 }
 0x8f6   :  { %v3079_v55 = vadd.f32 0.5, %v3076_v49  ;;  %v3077_v4 = vmul.f32 0.5, %v5208_v63 }
 0x8f7   :  { %v3083_v61 = vmul.f32 %v5206_v51, %v3078_v50 }
 0x8f8   :  { %v3082_v21 = vmul.f32 %v3079_v55, %v7090_v14  ;;  %v3081_v32 = vadd.f32 0.5, %v3077_v4  ;;  %v3285_v14 = vld [vmem:[%s7272_s6 + $0x10] sm:$0xff]  ;;  %v3381_v55 = vld [vmem:[%s7273_s7] ss:$0 sm:$0xff] }
 0x8f9   :  { %v5038_v34 = vpack.c.bf16 %v3286_v28, %v3285_v14 }
 0x8fa   :  { %v3084_v62 = vadd.f32 %v3083_v61, %v3082_v21 }
 0x8fc   :  { %5209 = vtanh.f32 %v3084_v62 }
 0x906   :  { %v5210_v11 = vpop.eup %5209 }
 0x907   :  { %v3086_v12 = vmul.f32 %v5210_v11, %v3081_v32 }
 0x909   :  { %3152 = vmatmul.mubr.f32.vlgmr.msra.gmra.mrb[32].mxu0 %v3086_v12  ;;  %3223 = vmatmul.mubr.f32.vlgmr.msra.gmra.mrb[32].mxu1 %v3086_v12 }
 0x90a   :  { %5036 = vmatpush3.bf16.msra.mxu0 %v5035_v23  ;;  %3431 = vmatprep.mubr.msk.f32.mxu0 %vm5223_vm6, %v7490_v3 }
 0x90b   :  { %5037 = vmatprep.subr.bf16.mxu0 %v5222_v24 }
 0x90e   :  { %5039 = vmatpush3.bf16.msra.mxu0 %v5038_v34 }
 0x90f   :  { %5040 = vmatprep.subr.bf16.mxu0 %v5222_v24 }
 0x912   :  { %5042 = vmatpush3.bf16.msra.mxu0 %v5041_v41 }
 0x913   :  { %5043 = vmatprep.subr.bf16.mxu0 %v5222_v24 }
 0x916   :  { %5045 = vmatpush3.bf16.msra.mxu0 %v5044_v53 }
 0x917   :  { %5046 = vmatprep.subr.bf16.mxu0 %v5222_v24 }
 0x91a   :  { %5048 = vmatpush3.bf16.msra.mxu0 %v5047_v6 }
 0x91b   :  { %5049 = vmatprep.subr.bf16.mxu0 %v5222_v24 }
 0x91e   :  { %5051 = vmatpush3.bf16.msra.mxu0 %v5050_v18 }
 0x91f   :  { %5052 = vmatprep.subr.bf16.mxu0 %v5222_v24 }
 0x922   :  { %5054 = vmatpush3.bf16.msra.mxu0 %v5053_v31 }
 0x923   :  { %5055 = vmatprep.subr.bf16.mxu0 %v5222_v24 }
 0x926   :  { %5057 = vmatpush3.bf16.msra.mxu0 %v5056_v47 }
 0x9dc   :  { %v3153_v9 = vpop.f32.mrb[32].mxu0  ;;  %v3224_v1 = vpop.f32.mrb[32].mxu1 }
 0x9dd   :  { %v3154_v42 = vadd.f32 %v3153_v9, %v7931_v10  ;;  %v3155_v2 = vpop.f32.mrb[33].mxu0  ;;  %v3226_v26 = vpop.f32.mrb[33].mxu1  ;;  %v3225_v29 = vadd.f32 %v3224_v1, %v7743_v54 }
 0x9de   :  { %v3156_v56 = vadd.f32 %v3155_v2, %v7742_v8  ;;  %v3227_v27 = vadd.f32 %v3226_v26, %v7871_v43 }
 0x9df   :  { %v3229_v33 = vmul.f32 0.5, %v3154_v42 }
 0x9e0   :  { %v3230_v40 = vmul.f32 0.5, %v3156_v56  ;;  %v3231_v46 = vmul.f32 0.5, %v3227_v27 }
 0x9e1   :  { %5211 = vtanh.f32 %v3229_v33 }
 0x9e2   :  { %5213 = vtanh.f32 %v3230_v40 }
 0x9e3   :  { %5215 = vtanh.f32 %v3225_v29 }
 0x9e4   :  { %5217 = vtanh.f32 %v3231_v46 }
 0x9eb   :  { %v5212_v59 = vpop.eup %5211 }
 0x9ec   :  { %v5214_v3 = vpop.eup %5213  ;;  %v3236_v44 = vmul.f32 0.5, %v5212_v59 }
 0x9ed   :  { %v3237_v38 = vmul.f32 0.5, %v5214_v3  ;;  %v5216_v60 = vpop.eup %5215 }
 0x9ee   :  { %v3239_v10 = vadd.f32 0.5, %v3236_v44  ;;  %v5218_v20 = vpop.eup %5217 }
 0x9ef   :  { %v3240_v19 = vadd.f32 0.5, %v3237_v38  ;;  %v3238_v54 = vmul.f32 0.5, %v5218_v20 }
 0x9f0   :  { %v3244_v57 = vmul.f32 %v5216_v60, %v3239_v10 }
 0x9f1   :  { %v3243_v8 = vmul.f32 %v3240_v19, %v7194_v13  ;;  %v3242_v15 = vadd.f32 0.5, %v3238_v54 }
 0x9f3   :  { %v3245_v0 = vadd.f32 %v3244_v57, %v3243_v8 }
 0x9f5   :  { %5219 = vtanh.f32 %v3245_v0 }
 0x9ff   :  { %v5220_v49 = vpop.eup %5219 }
 0xa00   :  { %v3247_v50 = vmul.f32 %v5220_v49, %v3242_v15 }
 0xa02   :  { %v3267_v43 = vrot.slane %v3247_v50, 1 }
 0xa04   :  { %v3282_v51 = vsel %vm3281_vm7, %v7201_v37, %v3267_v43 }
 0xa05   :  { %3432 = vmatmul.mubr.f32.vlgmr.msra.gmra.mrb[34].mxu0 %v3282_v51 }
 0xad8   :  { %v3372_v61 = vpop.f32.mrb[34].mxu0 }
 0xad9   :  { %v3373_v21 = vadd.f32 %v3381_v55, %v3372_v61  ;;  %v3433_v62 = vpop.f32.mrb[35].mxu0 }
 0xadb   :  { %3376 = vst [vmem:[%s7274_s8] sm:$0xff] %v3373_v21 }

</bundles_post_ra>
